<compile_context>
chip_gen: v6e
topology: v6e:2x2x1
jax: 0.10.0
libtpu: 0.0.40
codegen_flags: <defaults>
</compile_context>

<pallas_src>
import jax
import jax.numpy as jnp
from jax import lax
from jax.experimental import pallas as pl
from jax.experimental.pallas import tpu as pltpu


# ---------------- fused Conv2d(5x5, pad=2) + bias + MaxPool2d(2) kernel ----------------

def _conv_pool_kernel(xcol_ref, w_ref, b_ref, o_ref):
    """xcol_ref: (4, TM, 25*Cin) bf16 -- im2col rows for the 4 pooling-window corners
       w_ref:    (25*Cin, Cout)   bf16
       b_ref:    (1, Cout)        f32
       o_ref:    (TM, Cout)       bf16 -- pooled output rows in (n, ho, wo) order
    """
    w = w_ref[...]
    y = jnp.dot(xcol_ref[0], w, preferred_element_type=jnp.float32)
    for c in range(1, 4):
        y = jnp.maximum(y, jnp.dot(xcol_ref[c], w,
                                   preferred_element_type=jnp.float32))
    # bias is per-channel, so max(conv) + b == max(conv + b)
    o_ref[...] = (y + b_ref[...]).astype(o_ref.dtype)


def _im2col_pooled_corners(x_nhwc):
    """Build (4, N*Ho*Wo, 25*Cin): for each 2x2 pooling corner, the im2col matrix of the
    conv output pixels belonging to that corner, with the 25 taps folded into K."""
    N, H, W, Cin = x_nhwc.shape
    Ho, Wo = H // 2, W // 2
    xp = jnp.pad(x_nhwc, ((0, 0), (2, 2), (2, 2), (0, 0)))
    corners = []
    for a in range(2):
        for b in range(2):
            taps = []
            for kh in range(5):
                for kw in range(5):
                    h0, w0 = a + kh, b + kw
                    taps.append(lax.slice(
                        xp,
                        (0, h0, w0, 0),
                        (N, h0 + 2 * (Ho - 1) + 1, w0 + 2 * (Wo - 1) + 1, Cin),
                        (1, 2, 2, 1)))                       # (N, Ho, Wo, Cin)
            corners.append(
                jnp.concatenate(taps, axis=-1).reshape(N * Ho * Wo, 25 * Cin))
    return jnp.stack(corners, axis=0)                        # (4, M, 25*Cin)


def conv5x5_pool2(x_nhwc, wk, b):
    """x_nhwc (N,H,W,Cin) bf16; wk (25*Cin, Cout) bf16; b (1, Cout) f32.
    Returns the pooled activation (N, H//2, W//2, Cout) in bf16."""
    N, H, W, Cin = x_nhwc.shape
    K, Cout = wk.shape
    assert K == 25 * Cin
    Ho, Wo = H // 2, W // 2
    M = N * Ho * Wo

    # Row tiling: bounded VMEM if batch grows; >=2 tiles when possible so both v7x
    # TensorCores get work (parallel axis). Tiles stay multiples of 16 sublanes (bf16).
    if M % 256 == 0:
        TM = 256
    elif M >= 128 and (M // 2) % 16 == 0:
        TM = M // 2
    else:
        TM = M
    num_tiles = M // TM

    xcol4 = _im2col_pooled_corners(x_nhwc)                   # (4, M, K) bf16

    out = pl.pallas_call(
        _conv_pool_kernel,
        out_shape=jax.ShapeDtypeStruct((M, Cout), jnp.bfloat16),
        grid=(num_tiles,),
        in_specs=[
            pl.BlockSpec((4, TM, K), lambda i: (0, i, 0)),
            pl.BlockSpec((K, Cout), lambda i: (0, 0)),
            pl.BlockSpec((1, Cout), lambda i: (0, 0)),
        ],
        out_specs=pl.BlockSpec((TM, Cout), lambda i: (i, 0)),
        compiler_params=pltpu.CompilerParams(
            dimension_semantics=("parallel",)),
    )(xcol4, wk, b)
    return out.reshape(N, Ho, Wo, Cout)


# ----------------------- Linear(1024,64) -> Linear(64,10) head -----------------------

def _mlp_kernel(x_ref, w1_ref, b1_ref, w2_ref, b2_ref, o_ref):
    h = jnp.dot(x_ref[...], w1_ref[...],
                preferred_element_type=jnp.float32) + b1_ref[...]
    o = jnp.dot(h.astype(jnp.bfloat16), w2_ref[...],
                preferred_element_type=jnp.float32) + b2_ref[...]
    o_ref[...] = o


def linear_head(xf, w1p, b1, w2p, b2):
    """xf: (N, 1024) bf16 in NHWC-flatten order; w1p: (1024, 64); w2p: (64, 10)."""
    vmem = pl.BlockSpec(memory_space=pltpu.MemorySpace.VMEM)
    return pl.pallas_call(
        _mlp_kernel,
        out_shape=jax.ShapeDtypeStruct((xf.shape[0], w2p.shape[1]), jnp.float32),
        in_specs=[vmem] * 5,
        out_specs=vmem,
    )(xf, w1p, b1, w2p, b2)


# --------------------------------- full network ---------------------------------------

def prepare_params(params):
    """One-time weight prep (outside jit): conv weights -> (25*Cin, Cout) bf16; fold the
    NCHW flatten permutation into fc1's rows; pre-transpose FC weights; biases f32 (1,C)."""
    pp = {}
    for name in ("conv1", "conv2", "conv3"):
        w, bb = params[name]                                  # w: (Cout, Cin, 5, 5) OIHW
        Cout, Cin = w.shape[0], w.shape[1]
        pp[name + "_w"] = (jnp.transpose(w, (2, 3, 1, 0))
                           .reshape(25 * Cin, Cout).astype(jnp.bfloat16))
        pp[name + "_b"] = bb.astype(jnp.float32).reshape(1, Cout)
    w1, b1 = params["fc1"]                                    # (64, 1024): features (c,h,w)
    w2, b2 = params["fc2"]                                    # (10, 64)
    C, Hf, Wf = 64, 4, 4
    w1p = jnp.transpose(w1.reshape(64, C, Hf, Wf), (2, 3, 1, 0)).reshape(Hf * Wf * C, 64)
    pp["fc1_w"] = w1p.astype(jnp.bfloat16)                    # rows in NHWC (h,w,c) order
    pp["fc1_b"] = b1.astype(jnp.float32).reshape(1, -1)
    pp["fc2_w"] = w2.T.astype(jnp.bfloat16)
    pp["fc2_b"] = b2.astype(jnp.float32).reshape(1, -1)
    return pp


@jax.jit
def net_forward(x_nchw, pp):
    x = jnp.transpose(x_nchw, (0, 2, 3, 1)).astype(jnp.bfloat16)   # NCHW -> NHWC, bf16
    x = conv5x5_pool2(x, pp["conv1_w"], pp["conv1_b"])
    x = conv5x5_pool2(x, pp["conv2_w"], pp["conv2_b"])
    x = conv5x5_pool2(x, pp["conv3_w"], pp["conv3_b"])
    xf = x.reshape(x.shape[0], -1)    # NHWC flatten; permutation already folded into fc1_w
    return linear_head(xf, pp["fc1_w"], pp["fc1_b"], pp["fc2_w"], pp["fc2_b"])


# ------------------------------------ reference ----------------------------------------

def reference_forward(x_nchw, params, matmul_dtype):
    """Pure-XLA reference. matmul_dtype=bfloat16 mirrors the kernels' numerics
    (bf16 matmul inputs, f32 accumulation); matmul_dtype=float32 is the full-precision
    PyTorch-equivalent forward."""
    cast = lambda a: a.astype(matmul_dtype)
    x = jnp.transpose(x_nchw, (0, 2, 3, 1))
    for name in ("conv1", "conv2", "conv3"):
        w, b = params[name]
        wf = jnp.transpose(w, (2, 3, 1, 0))                   # OIHW -> HWIO
        x = lax.conv_general_dilated(
            cast(x), cast(wf), (1, 1), "SAME",
            dimension_numbers=("NHWC", "HWIO", "NHWC"),
            preferred_element_type=jnp.float32,
            precision=lax.Precision.HIGHEST) + b
        x = lax.reduce_window(x, -jnp.inf, lax.max,
                              (1, 2, 2, 1), (1, 2, 2, 1), "VALID")
    N = x.shape[0]
    xf = jnp.transpose(x, (0, 3, 1, 2)).reshape(N, -1)        # NCHW flatten (PyTorch)
    w1, b1 = params["fc1"]
    w2, b2 = params["fc2"]
    h = jnp.dot(cast(xf), cast(w1.T), preferred_element_type=jnp.float32,
                precision=lax.Precision.HIGHEST) + b1
    return jnp.dot(cast(h), cast(w2.T), preferred_element_type=jnp.float32,
                   precision=lax.Precision.HIGHEST) + b2


def init_params(key):
    ks = jax.random.split(key, 10)

    def w(k, shape, scale=0.05):
        return scale * jax.random.normal(k, shape, jnp.float32)

    return {
        "conv1": (w(ks[0], (32, 3, 5, 5)),  w(ks[1], (32,))),
        "conv2": (w(ks[2], (32, 32, 5, 5)), w(ks[3], (32,))),
        "conv3": (w(ks[4], (64, 32, 5, 5)), w(ks[5], (64,))),
        "fc1":   (w(ks[6], (64, 1024)),     w(ks[7], (64,))),
        "fc2":   (w(ks[8], (10, 64)),       w(ks[9], (10,))),
    }


if __name__ == "__main__":
    key = jax.random.PRNGKey(0)
    pkey, xkey = jax.random.split(key)
    params = init_params(pkey)
    prepared = prepare_params(params)

    # Input must be 32x32 so that flatten yields 1024 features (64 * 4 * 4).
    x = jax.random.normal(xkey, (2, 3, 32, 32), jnp.float32)

    out = jax.block_until_ready(net_forward(x, prepared))
    assert out.shape == (2, 10), out.shape

    # Tight check vs an XLA reference with identical (bf16-input / f32-accum) numerics.
    ref_bf16 = jax.block_until_ready(reference_forward(x, params, jnp.bfloat16))
    err_m = float(jnp.max(jnp.abs(out - ref_bf16)))
    assert bool(jnp.allclose(out, ref_bf16, rtol=5e-3, atol=5e-3)), (
        f"mismatch vs bf16-matched reference: max abs err {err_m}")

    # Looser check vs the full-f32 reference (bf16 MXU inputs cost a little precision).
    ref_f32 = jax.block_until_ready(reference_forward(x, params, jnp.float32))
    err_f = float(jnp.max(jnp.abs(out - ref_f32)))
    assert bool(jnp.allclose(out, ref_f32, rtol=5e-2, atol=5e-2)), (
        f"mismatch vs f32 reference: max abs err {err_f}")

    print("KERNEL_OK")
</pallas_src>

<mosaic_0001>
module attributes {stable_mosaic.version = 11 : i64} {
  func.func @_conv_pool_kernel(%arg0: i32, %arg1: memref<4x256x75xbf16, #tpu.memory_space<vmem>>, %arg2: memref<75x32xbf16, #tpu.memory_space<vmem>>, %arg3: memref<1x32xf32, #tpu.memory_space<vmem>>, %arg4: memref<256x32xbf16, #tpu.memory_space<vmem>>) attributes {dimension_semantics = [#tpu.dimension_semantics<parallel>], iteration_bounds = array<i64: 2>, scalar_prefetch = 0 : i64, scratch_operands = 0 : i64, tpu.core_type = #tpu.core_type<tc>, window_params = [{transform_indices = @transform_0, window_bounds = array<i64: 4, 256, 75>}, {pipeline_mode = #tpu.pipeline_mode<synchronous>, transform_indices = @transform_1, window_bounds = array<i64: 75, 32>}, {pipeline_mode = #tpu.pipeline_mode<synchronous>, transform_indices = @transform_2, window_bounds = array<i64: 1, 32>}, {transform_indices = @transform_3, window_bounds = array<i64: 256, 32>}]} {
    %c0 = arith.constant 0 : index
    %c0_0 = arith.constant 0 : index
    %0 = vector.load %arg2[%c0, %c0_0] : memref<75x32xbf16, #tpu.memory_space<vmem>>, vector<75x32xbf16>
    %c0_1 = arith.constant 0 : index
    %c0_2 = arith.constant 0 : index
    %c0_3 = arith.constant 0 : index
    %1 = vector.load %arg1[%c0_1, %c0_2, %c0_3] : memref<4x256x75xbf16, #tpu.memory_space<vmem>>, vector<1x256x75xbf16>
    %2 = vector.shape_cast %1 : vector<1x256x75xbf16> to vector<256x75xbf16>
    %cst = arith.constant dense<0.000000e+00> : vector<256x32xf32>
    %3 = tpu.matmul %2, %0, %cst {dimension_numbers = #tpu.dot_dimension_numbers<[1], [0], [0], [1], [0, 0, 1, 1], [], []>} : vector<256x75xbf16>, vector<75x32xbf16>, vector<256x32xf32> -> vector<256x32xf32>
    %c1 = arith.constant 1 : index
    %c0_4 = arith.constant 0 : index
    %c0_5 = arith.constant 0 : index
    %4 = vector.load %arg1[%c1, %c0_4, %c0_5] : memref<4x256x75xbf16, #tpu.memory_space<vmem>>, vector<1x256x75xbf16>
    %5 = vector.shape_cast %4 : vector<1x256x75xbf16> to vector<256x75xbf16>
    %cst_6 = arith.constant dense<0.000000e+00> : vector<256x32xf32>
    %6 = tpu.matmul %5, %0, %cst_6 {dimension_numbers = #tpu.dot_dimension_numbers<[1], [0], [0], [1], [0, 0, 1, 1], [], []>} : vector<256x75xbf16>, vector<75x32xbf16>, vector<256x32xf32> -> vector<256x32xf32>
    %7 = arith.maximumf %3, %6 : vector<256x32xf32>
    %c2 = arith.constant 2 : index
    %c0_7 = arith.constant 0 : index
    %c0_8 = arith.constant 0 : index
    %8 = vector.load %arg1[%c2, %c0_7, %c0_8] : memref<4x256x75xbf16, #tpu.memory_space<vmem>>, vector<1x256x75xbf16>
    %9 = vector.shape_cast %8 : vector<1x256x75xbf16> to vector<256x75xbf16>
    %cst_9 = arith.constant dense<0.000000e+00> : vector<256x32xf32>
    %10 = tpu.matmul %9, %0, %cst_9 {dimension_numbers = #tpu.dot_dimension_numbers<[1], [0], [0], [1], [0, 0, 1, 1], [], []>} : vector<256x75xbf16>, vector<75x32xbf16>, vector<256x32xf32> -> vector<256x32xf32>
    %11 = arith.maximumf %7, %10 : vector<256x32xf32>
    %c3 = arith.constant 3 : index
    %c0_10 = arith.constant 0 : index
    %c0_11 = arith.constant 0 : index
    %12 = vector.load %arg1[%c3, %c0_10, %c0_11] : memref<4x256x75xbf16, #tpu.memory_space<vmem>>, vector<1x256x75xbf16>
    %13 = vector.shape_cast %12 : vector<1x256x75xbf16> to vector<256x75xbf16>
    %cst_12 = arith.constant dense<0.000000e+00> : vector<256x32xf32>
    %14 = tpu.matmul %13, %0, %cst_12 {dimension_numbers = #tpu.dot_dimension_numbers<[1], [0], [0], [1], [0, 0, 1, 1], [], []>} : vector<256x75xbf16>, vector<75x32xbf16>, vector<256x32xf32> -> vector<256x32xf32>
    %15 = arith.maximumf %11, %14 : vector<256x32xf32>
    %c0_13 = arith.constant 0 : index
    %c0_14 = arith.constant 0 : index
    %16 = vector.load %arg3[%c0_13, %c0_14] : memref<1x32xf32, #tpu.memory_space<vmem>>, vector<1x32xf32>
    %17 = vector.broadcast %16 : vector<1x32xf32> to vector<256x32xf32>
    %18 = arith.addf %15, %17 : vector<256x32xf32>
    %19 = arith.truncf %18 : vector<256x32xf32> to vector<256x32xbf16>
    %c0_15 = arith.constant 0 : index
    %c0_16 = arith.constant 0 : index
    %20 = vector.load %arg4[%c0_15, %c0_16] : memref<256x32xbf16, #tpu.memory_space<vmem>>, vector<256x32xbf16>
    tpu.vector_store %arg4[%c0_15, %c0_16], %19 {strides = array<i32>} : memref<256x32xbf16, #tpu.memory_space<vmem>>, vector<256x32xbf16>,
    return
  }
  func.func @transform_0(%arg0: i32) -> (i32, i32, i32) {
    %c0_i32 = arith.constant 0 : i32
    %c0_i32_0 = arith.constant 0 : i32
    %c0_i32_1 = arith.constant 0 : i32
    return %c0_i32, %arg0, %c0_i32_0 : i32, i32, i32
  }
  func.func @transform_1(%arg0: i32) -> (i32, i32) {
    %c0_i32 = arith.constant 0 : i32
    %c0_i32_0 = arith.constant 0 : i32
    %c0_i32_1 = arith.constant 0 : i32
    return %c0_i32, %c0_i32_0 : i32, i32
  }
  func.func @transform_2(%arg0: i32) -> (i32, i32) {
    %c0_i32 = arith.constant 0 : i32
    %c0_i32_0 = arith.constant 0 : i32
    %c0_i32_1 = arith.constant 0 : i32
    return %c0_i32, %c0_i32_0 : i32, i32
  }
  func.func @transform_3(%arg0: i32) -> (i32, i32) {
    %c0_i32 = arith.constant 0 : i32
    %c0_i32_0 = arith.constant 0 : i32
    return %arg0, %c0_i32 : i32, i32
  }
}

module attributes {stable_mosaic.version = 11 : i64} {
  func.func @_conv_pool_kernel(%arg0: i32, %arg1: memref<4x64x800xbf16, #tpu.memory_space<vmem>>, %arg2: memref<800x32xbf16, #tpu.memory_space<vmem>>, %arg3: memref<1x32xf32, #tpu.memory_space<vmem>>, %arg4: memref<64x32xbf16, #tpu.memory_space<vmem>>) attributes {dimension_semantics = [#tpu.dimension_semantics<parallel>], iteration_bounds = array<i64: 2>, scalar_prefetch = 0 : i64, scratch_operands = 0 : i64, tpu.core_type = #tpu.core_type<tc>, window_params = [{transform_indices = @transform_0, window_bounds = array<i64: 4, 64, 800>}, {pipeline_mode = #tpu.pipeline_mode<synchronous>, transform_indices = @transform_1, window_bounds = array<i64: 800, 32>}, {pipeline_mode = #tpu.pipeline_mode<synchronous>, transform_indices = @transform_2, window_bounds = array<i64: 1, 32>}, {transform_indices = @transform_3, window_bounds = array<i64: 64, 32>}]} {
    %c0 = arith.constant 0 : index
    %c0_0 = arith.constant 0 : index
    %0 = vector.load %arg2[%c0, %c0_0] : memref<800x32xbf16, #tpu.memory_space<vmem>>, vector<800x32xbf16>
    %c0_1 = arith.constant 0 : index
    %c0_2 = arith.constant 0 : index
    %c0_3 = arith.constant 0 : index
    %1 = vector.load %arg1[%c0_1, %c0_2, %c0_3] : memref<4x64x800xbf16, #tpu.memory_space<vmem>>, vector<1x64x800xbf16>
    %2 = vector.shape_cast %1 : vector<1x64x800xbf16> to vector<64x800xbf16>
    %cst = arith.constant dense<0.000000e+00> : vector<64x32xf32>
    %3 = tpu.matmul %2, %0, %cst {dimension_numbers = #tpu.dot_dimension_numbers<[1], [0], [0], [1], [0, 0, 1, 1], [], []>} : vector<64x800xbf16>, vector<800x32xbf16>, vector<64x32xf32> -> vector<64x32xf32>
    %c1 = arith.constant 1 : index
    %c0_4 = arith.constant 0 : index
    %c0_5 = arith.constant 0 : index
    %4 = vector.load %arg1[%c1, %c0_4, %c0_5] : memref<4x64x800xbf16, #tpu.memory_space<vmem>>, vector<1x64x800xbf16>
    %5 = vector.shape_cast %4 : vector<1x64x800xbf16> to vector<64x800xbf16>
    %cst_6 = arith.constant dense<0.000000e+00> : vector<64x32xf32>
    %6 = tpu.matmul %5, %0, %cst_6 {dimension_numbers = #tpu.dot_dimension_numbers<[1], [0], [0], [1], [0, 0, 1, 1], [], []>} : vector<64x800xbf16>, vector<800x32xbf16>, vector<64x32xf32> -> vector<64x32xf32>
    %7 = arith.maximumf %3, %6 : vector<64x32xf32>
    %c2 = arith.constant 2 : index
    %c0_7 = arith.constant 0 : index
    %c0_8 = arith.constant 0 : index
    %8 = vector.load %arg1[%c2, %c0_7, %c0_8] : memref<4x64x800xbf16, #tpu.memory_space<vmem>>, vector<1x64x800xbf16>
    %9 = vector.shape_cast %8 : vector<1x64x800xbf16> to vector<64x800xbf16>
    %cst_9 = arith.constant dense<0.000000e+00> : vector<64x32xf32>
    %10 = tpu.matmul %9, %0, %cst_9 {dimension_numbers = #tpu.dot_dimension_numbers<[1], [0], [0], [1], [0, 0, 1, 1], [], []>} : vector<64x800xbf16>, vector<800x32xbf16>, vector<64x32xf32> -> vector<64x32xf32>
    %11 = arith.maximumf %7, %10 : vector<64x32xf32>
    %c3 = arith.constant 3 : index
    %c0_10 = arith.constant 0 : index
    %c0_11 = arith.constant 0 : index
    %12 = vector.load %arg1[%c3, %c0_10, %c0_11] : memref<4x64x800xbf16, #tpu.memory_space<vmem>>, vector<1x64x800xbf16>
    %13 = vector.shape_cast %12 : vector<1x64x800xbf16> to vector<64x800xbf16>
    %cst_12 = arith.constant dense<0.000000e+00> : vector<64x32xf32>
    %14 = tpu.matmul %13, %0, %cst_12 {dimension_numbers = #tpu.dot_dimension_numbers<[1], [0], [0], [1], [0, 0, 1, 1], [], []>} : vector<64x800xbf16>, vector<800x32xbf16>, vector<64x32xf32> -> vector<64x32xf32>
    %15 = arith.maximumf %11, %14 : vector<64x32xf32>
    %c0_13 = arith.constant 0 : index
    %c0_14 = arith.constant 0 : index
    %16 = vector.load %arg3[%c0_13, %c0_14] : memref<1x32xf32, #tpu.memory_space<vmem>>, vector<1x32xf32>
    %17 = vector.broadcast %16 : vector<1x32xf32> to vector<64x32xf32>
    %18 = arith.addf %15, %17 : vector<64x32xf32>
    %19 = arith.truncf %18 : vector<64x32xf32> to vector<64x32xbf16>
    %c0_15 = arith.constant 0 : index
    %c0_16 = arith.constant 0 : index
    %20 = vector.load %arg4[%c0_15, %c0_16] : memref<64x32xbf16, #tpu.memory_space<vmem>>, vector<64x32xbf16>
    tpu.vector_store %arg4[%c0_15, %c0_16], %19 {strides = array<i32>} : memref<64x32xbf16, #tpu.memory_space<vmem>>, vector<64x32xbf16>,
    return
  }
  func.func @transform_0(%arg0: i32) -> (i32, i32, i32) {
    %c0_i32 = arith.constant 0 : i32
    %c0_i32_0 = arith.constant 0 : i32
    %c0_i32_1 = arith.constant 0 : i32
    return %c0_i32, %arg0, %c0_i32_0 : i32, i32, i32
  }
  func.func @transform_1(%arg0: i32) -> (i32, i32) {
    %c0_i32 = arith.constant 0 : i32
    %c0_i32_0 = arith.constant 0 : i32
    %c0_i32_1 = arith.constant 0 : i32
    return %c0_i32, %c0_i32_0 : i32, i32
  }
  func.func @transform_2(%arg0: i32) -> (i32, i32) {
    %c0_i32 = arith.constant 0 : i32
    %c0_i32_0 = arith.constant 0 : i32
    %c0_i32_1 = arith.constant 0 : i32
    return %c0_i32, %c0_i32_0 : i32, i32
  }
  func.func @transform_3(%arg0: i32) -> (i32, i32) {
    %c0_i32 = arith.constant 0 : i32
    %c0_i32_0 = arith.constant 0 : i32
    return %arg0, %c0_i32 : i32, i32
  }
}

module attributes {stable_mosaic.version = 11 : i64} {
  func.func @_conv_pool_kernel(%arg0: i32, %arg1: memref<4x32x800xbf16, #tpu.memory_space<vmem>>, %arg2: memref<800x64xbf16, #tpu.memory_space<vmem>>, %arg3: memref<1x64xf32, #tpu.memory_space<vmem>>, %arg4: memref<32x64xbf16, #tpu.memory_space<vmem>>) attributes {dimension_semantics = [#tpu.dimension_semantics<parallel>], iteration_bounds = array<i64: 1>, scalar_prefetch = 0 : i64, scratch_operands = 0 : i64, tpu.core_type = #tpu.core_type<tc>, window_params = [{transform_indices = @transform_0, window_bounds = array<i64: 4, 32, 800>}, {pipeline_mode = #tpu.pipeline_mode<synchronous>, transform_indices = @transform_1, window_bounds = array<i64: 800, 64>}, {pipeline_mode = #tpu.pipeline_mode<synchronous>, transform_indices = @transform_2, window_bounds = array<i64: 1, 64>}, {transform_indices = @transform_3, window_bounds = array<i64: 32, 64>}]} {
    %c0 = arith.constant 0 : index
    %c0_0 = arith.constant 0 : index
    %0 = vector.load %arg2[%c0, %c0_0] : memref<800x64xbf16, #tpu.memory_space<vmem>>, vector<800x64xbf16>
    %c0_1 = arith.constant 0 : index
    %c0_2 = arith.constant 0 : index
    %c0_3 = arith.constant 0 : index
    %1 = vector.load %arg1[%c0_1, %c0_2, %c0_3] : memref<4x32x800xbf16, #tpu.memory_space<vmem>>, vector<1x32x800xbf16>
    %2 = vector.shape_cast %1 : vector<1x32x800xbf16> to vector<32x800xbf16>
    %cst = arith.constant dense<0.000000e+00> : vector<32x64xf32>
    %3 = tpu.matmul %2, %0, %cst {dimension_numbers = #tpu.dot_dimension_numbers<[1], [0], [0], [1], [0, 0, 1, 1], [], []>} : vector<32x800xbf16>, vector<800x64xbf16>, vector<32x64xf32> -> vector<32x64xf32>
    %c1 = arith.constant 1 : index
    %c0_4 = arith.constant 0 : index
    %c0_5 = arith.constant 0 : index
    %4 = vector.load %arg1[%c1, %c0_4, %c0_5] : memref<4x32x800xbf16, #tpu.memory_space<vmem>>, vector<1x32x800xbf16>
    %5 = vector.shape_cast %4 : vector<1x32x800xbf16> to vector<32x800xbf16>
    %cst_6 = arith.constant dense<0.000000e+00> : vector<32x64xf32>
    %6 = tpu.matmul %5, %0, %cst_6 {dimension_numbers = #tpu.dot_dimension_numbers<[1], [0], [0], [1], [0, 0, 1, 1], [], []>} : vector<32x800xbf16>, vector<800x64xbf16>, vector<32x64xf32> -> vector<32x64xf32>
    %7 = arith.maximumf %3, %6 : vector<32x64xf32>
    %c2 = arith.constant 2 : index
    %c0_7 = arith.constant 0 : index
    %c0_8 = arith.constant 0 : index
    %8 = vector.load %arg1[%c2, %c0_7, %c0_8] : memref<4x32x800xbf16, #tpu.memory_space<vmem>>, vector<1x32x800xbf16>
    %9 = vector.shape_cast %8 : vector<1x32x800xbf16> to vector<32x800xbf16>
    %cst_9 = arith.constant dense<0.000000e+00> : vector<32x64xf32>
    %10 = tpu.matmul %9, %0, %cst_9 {dimension_numbers = #tpu.dot_dimension_numbers<[1], [0], [0], [1], [0, 0, 1, 1], [], []>} : vector<32x800xbf16>, vector<800x64xbf16>, vector<32x64xf32> -> vector<32x64xf32>
    %11 = arith.maximumf %7, %10 : vector<32x64xf32>
    %c3 = arith.constant 3 : index
    %c0_10 = arith.constant 0 : index
    %c0_11 = arith.constant 0 : index
    %12 = vector.load %arg1[%c3, %c0_10, %c0_11] : memref<4x32x800xbf16, #tpu.memory_space<vmem>>, vector<1x32x800xbf16>
    %13 = vector.shape_cast %12 : vector<1x32x800xbf16> to vector<32x800xbf16>
    %cst_12 = arith.constant dense<0.000000e+00> : vector<32x64xf32>
    %14 = tpu.matmul %13, %0, %cst_12 {dimension_numbers = #tpu.dot_dimension_numbers<[1], [0], [0], [1], [0, 0, 1, 1], [], []>} : vector<32x800xbf16>, vector<800x64xbf16>, vector<32x64xf32> -> vector<32x64xf32>
    %15 = arith.maximumf %11, %14 : vector<32x64xf32>
    %c0_13 = arith.constant 0 : index
    %c0_14 = arith.constant 0 : index
    %16 = vector.load %arg3[%c0_13, %c0_14] : memref<1x64xf32, #tpu.memory_space<vmem>>, vector<1x64xf32>
    %17 = vector.broadcast %16 : vector<1x64xf32> to vector<32x64xf32>
    %18 = arith.addf %15, %17 : vector<32x64xf32>
    %19 = arith.truncf %18 : vector<32x64xf32> to vector<32x64xbf16>
    %c0_15 = arith.constant 0 : index
    %c0_16 = arith.constant 0 : index
    %20 = vector.load %arg4[%c0_15, %c0_16] : memref<32x64xbf16, #tpu.memory_space<vmem>>, vector<32x64xbf16>
    tpu.vector_store %arg4[%c0_15, %c0_16], %19 {strides = array<i32>} : memref<32x64xbf16, #tpu.memory_space<vmem>>, vector<32x64xbf16>,
    return
  }
  func.func @transform_0(%arg0: i32) -> (i32, i32, i32) {
    %c0_i32 = arith.constant 0 : i32
    %c0_i32_0 = arith.constant 0 : i32
    %c0_i32_1 = arith.constant 0 : i32
    return %c0_i32, %arg0, %c0_i32_0 : i32, i32, i32
  }
  func.func @transform_1(%arg0: i32) -> (i32, i32) {
    %c0_i32 = arith.constant 0 : i32
    %c0_i32_0 = arith.constant 0 : i32
    %c0_i32_1 = arith.constant 0 : i32
    return %c0_i32, %c0_i32_0 : i32, i32
  }
  func.func @transform_2(%arg0: i32) -> (i32, i32) {
    %c0_i32 = arith.constant 0 : i32
    %c0_i32_0 = arith.constant 0 : i32
    %c0_i32_1 = arith.constant 0 : i32
    return %c0_i32, %c0_i32_0 : i32, i32
  }
  func.func @transform_3(%arg0: i32) -> (i32, i32) {
    %c0_i32 = arith.constant 0 : i32
    %c0_i32_0 = arith.constant 0 : i32
    return %arg0, %c0_i32 : i32, i32
  }
}

module attributes {stable_mosaic.version = 11 : i64} {
  func.func @_mlp_kernel(%arg0: memref<2x1024xbf16, #tpu.memory_space<vmem>>, %arg1: memref<1024x64xbf16, #tpu.memory_space<vmem>>, %arg2: memref<1x64xf32, #tpu.memory_space<vmem>>, %arg3: memref<64x10xbf16, #tpu.memory_space<vmem>>, %arg4: memref<1x10xf32, #tpu.memory_space<vmem>>, %arg5: memref<2x10xf32, #tpu.memory_space<vmem>>) attributes {dimension_semantics = [], scalar_prefetch = 0 : i64, scratch_operands = 0 : i64, tpu.core_type = #tpu.core_type<tc>} {
    %c0 = arith.constant 0 : index
    %c0_0 = arith.constant 0 : index
    %0 = vector.load %arg0[%c0, %c0_0] : memref<2x1024xbf16, #tpu.memory_space<vmem>>, vector<2x1024xbf16>
    %c0_1 = arith.constant 0 : index
    %c0_2 = arith.constant 0 : index
    %1 = vector.load %arg1[%c0_1, %c0_2] : memref<1024x64xbf16, #tpu.memory_space<vmem>>, vector<1024x64xbf16>
    %cst = arith.constant dense<0.000000e+00> : vector<2x64xf32>
    %2 = tpu.matmul %0, %1, %cst {dimension_numbers = #tpu.dot_dimension_numbers<[1], [0], [0], [1], [0, 0, 1, 1], [], []>} : vector<2x1024xbf16>, vector<1024x64xbf16>, vector<2x64xf32> -> vector<2x64xf32>
    %c0_3 = arith.constant 0 : index
    %c0_4 = arith.constant 0 : index
    %3 = vector.load %arg2[%c0_3, %c0_4] : memref<1x64xf32, #tpu.memory_space<vmem>>, vector<1x64xf32>
    %4 = vector.broadcast %3 : vector<1x64xf32> to vector<2x64xf32>
    %5 = arith.addf %2, %4 : vector<2x64xf32>
    %6 = arith.truncf %5 : vector<2x64xf32> to vector<2x64xbf16>
    %c0_5 = arith.constant 0 : index
    %c0_6 = arith.constant 0 : index
    %7 = vector.load %arg3[%c0_5, %c0_6] : memref<64x10xbf16, #tpu.memory_space<vmem>>, vector<64x10xbf16>
    %cst_7 = arith.constant dense<0.000000e+00> : vector<2x10xf32>
    %8 = tpu.matmul %6, %7, %cst_7 {dimension_numbers = #tpu.dot_dimension_numbers<[1], [0], [0], [1], [0, 0, 1, 1], [], []>} : vector<2x64xbf16>, vector<64x10xbf16>, vector<2x10xf32> -> vector<2x10xf32>
    %c0_8 = arith.constant 0 : index
    %c0_9 = arith.constant 0 : index
    %9 = vector.load %arg4[%c0_8, %c0_9] : memref<1x10xf32, #tpu.memory_space<vmem>>, vector<1x10xf32>
    %10 = vector.broadcast %9 : vector<1x10xf32> to vector<2x10xf32>
    %11 = arith.addf %8, %10 : vector<2x10xf32>
    %c0_10 = arith.constant 0 : index
    %c0_11 = arith.constant 0 : index
    %12 = vector.load %arg5[%c0_10, %c0_11] : memref<2x10xf32, #tpu.memory_space<vmem>>, vector<2x10xf32>
    tpu.vector_store %arg5[%c0_10, %c0_11], %11 {strides = array<i32>} : memref<2x10xf32, #tpu.memory_space<vmem>>, vector<2x10xf32>,
    return
  }
}

</mosaic_0001>

<bundles_post_ra>
// kernel: net_forward.4
= control target key start
LH: loop header
LB: loop body
LE: loop exit
PB: predicated region body
PF: predicated region fallthrough
CT: control target
= control target key end

     0   :  { %s3117_s12 = smov 0   ;;  %s3119_s13 = smov 0   ;;  %s3741_s0 = inlined_call_operand.vmem [shape: bf16[4,512,75], index: 0, kind: input, shape index: {}]   ;;  %s3742_s1 = inlined_call_operand.vmem [shape: bf16[75,32], index: 1, kind: input, shape index: {}]   ;;  %s3743_s2 = inlined_call_operand.vmem [shape: f32[1,32], index: 2, kind: input, shape index: {}]   ;;  %s3744_s3 = inlined_call_operand.vmem [shape: bf16[512,32], index: 3, kind: output, shape index: {}]  }
   0x1   :  { %s3121_s14 = smov 0  }
   0x2 LB: > { %s2418_s15 = sadd.s32 4294967295, %s3094_s14   ;;  %s3134_s16 = sadd.s32 1, %s3094_s14   ;;  %s3094_s14 = sphi %s3121_s14, %s3771_s14   ;;  %s3090_s13 = sphi %s3119_s13, %s3770_s13   ;;  %s3086_s12 = sphi %s3117_s12, %s3769_s12  }
   0x3   : > { %s17_s17 = ssub.s32 %s3094_s14, %s3134_s16  ;;  %s20_s18 = sadd.s32 1, %s3090_s13 }
   0x4   : > { %p18_p0 = scmp.eq.s32.totalorder %s17_s17, 0  ;;  %p27_p1 = scmp.ne.s32.totalorder %s3090_s13, %s3086_s12 }
   0x5   : > { %p28_p2 = scmp.eq.s32.totalorder %s3094_s14, 0  ;;  %p2421_p4 = scmp.ge.s32.totalorder %s3094_s14, 2 }
   0x6   : > { %s3143_s19 = scalar_select %p18_p0, %s3090_s13, %s20_s18  }
   0x7   : > { %p29_p3 = por %p28_p2, %p27_p1  ;;  %127 = sbr.rel (%p2421_p4) target bundleno = 48 (0x30), region = 24 }
   0xc   : > { %130 = sbr.rel (!%p29_p3) target bundleno = 48 (0x30), region = 28  ;;  %s132_s20 = sand.u32 (%p29_p3), 1, %s3090_s13  }
   0xd   : > { %s2693_s21 = sshll.u32 (%p29_p3), %s3094_s14, 7  ;;  %s2422_s22 = sshll.u32 (%p29_p3), %s132_s20, 9 }
   0xe   : > { %s3151_s25 = scalar_lea.vmem (%p29_p3), %s3741_s0, %s2693_s21  ;;  %s3156_s26 = scalar_lea.vmem (%p29_p3), [#allocation2], %s2422_s22 }
   0xf   : > { %v154_v0 = vld [vmem:[%s3151_s25] sm:$0xff] (%p29_p3)   ;;  %v158_v1 = vld [vmem:[%s3151_s25 + $0x8] sm:$0xff] (%p29_p3)   ;;  %v162_v2 = vld [vmem:[%s3151_s25 + $0x10] sm:$0xff] (%p29_p3)  }
  0x10   : > { %155 = vst [vmem:[%s3156_s26] sm:$0xff] (%p29_p3), %v154_v0   ;;  %159 = vst [vmem:[%s3156_s26 + $0x8] sm:$0xff] (%p29_p3), %v158_v1   ;;  %v166_v3 = vld [vmem:[%s3151_s25 + $0x18] sm:$0xff] (%p29_p3)   ;;  %v170_v4 = vld [vmem:[%s3151_s25 + $0x20] sm:$0xff] (%p29_p3)  }
  0x11   : > { %163 = vst [vmem:[%s3156_s26 + $0x10] sm:$0xff] %v162_v2   ;;  %v174_v5 = vld [vmem:[%s3151_s25 + $0x28] sm:$0xff]   ;;  %167 = vst [vmem:[%s3156_s26 + $0x18] sm:$0xff] %v166_v3   ;;  %v178_v6 = vld [vmem:[%s3151_s25 + $0x30] sm:$0xff]  }
  0x12   : > { %171 = vst [vmem:[%s3156_s26 + $0x20] sm:$0xff] %v170_v4   ;;  %175 = vst [vmem:[%s3156_s26 + $0x28] sm:$0xff] %v174_v5   ;;  %v182_v7 = vld [vmem:[%s3151_s25 + $0x38] sm:$0xff]   ;;  %v186_v8 = vld [vmem:[%s3151_s25 + $0x40] sm:$0xff]  }
  0x13   : > { %179 = vst [vmem:[%s3156_s26 + $0x30] sm:$0xff] %v178_v6   ;;  %183 = vst [vmem:[%s3156_s26 + $0x38] sm:$0xff] %v182_v7   ;;  %v190_v9 = vld [vmem:[%s3151_s25 + $0x48] sm:$0xff]   ;;  %v194_v10 = vld [vmem:[%s3151_s25 + $0x50] sm:$0xff]  }
  0x14   : > { %187 = vst [vmem:[%s3156_s26 + $0x40] sm:$0xff] %v186_v8   ;;  %v198_v11 = vld [vmem:[%s3151_s25 + $0x58] sm:$0xff]   ;;  %191 = vst [vmem:[%s3156_s26 + $0x48] sm:$0xff] %v190_v9   ;;  %v202_v12 = vld [vmem:[%s3151_s25 + $0x60] sm:$0xff]  }
  0x15   : > { %195 = vst [vmem:[%s3156_s26 + $0x50] sm:$0xff] %v194_v10   ;;  %199 = vst [vmem:[%s3156_s26 + $0x58] sm:$0xff] %v198_v11   ;;  %v206_v13 = vld [vmem:[%s3151_s25 + $0x68] sm:$0xff]   ;;  %v210_v14 = vld [vmem:[%s3151_s25 + $0x70] sm:$0xff]  }
  0x16   : > { %203 = vst [vmem:[%s3156_s26 + $0x60] sm:$0xff] %v202_v12   ;;  %207 = vst [vmem:[%s3156_s26 + $0x68] sm:$0xff] %v206_v13   ;;  %v214_v15 = vld [vmem:[%s3151_s25 + $0x78] sm:$0xff]   ;;  %v218_v16 = vld [vmem:[%s3151_s25 + $0x100] sm:$0xff]  }
  0x17   : > { %211 = vst [vmem:[%s3156_s26 + $0x70] sm:$0xff] %v210_v14   ;;  %v222_v17 = vld [vmem:[%s3151_s25 + $0x108] sm:$0xff]   ;;  %215 = vst [vmem:[%s3156_s26 + $0x78] sm:$0xff] %v214_v15   ;;  %v226_v18 = vld [vmem:[%s3151_s25 + $0x110] sm:$0xff]  }
  0x18   : > { %219 = vst [vmem:[%s3156_s26 + $0x80] sm:$0xff] %v218_v16   ;;  %223 = vst [vmem:[%s3156_s26 + $0x88] sm:$0xff] %v222_v17   ;;  %v230_v19 = vld [vmem:[%s3151_s25 + $0x118] sm:$0xff]   ;;  %v234_v20 = vld [vmem:[%s3151_s25 + $0x120] sm:$0xff]  }
  0x19   : > { %227 = vst [vmem:[%s3156_s26 + $0x90] sm:$0xff] %v226_v18   ;;  %231 = vst [vmem:[%s3156_s26 + $0x98] sm:$0xff] %v230_v19   ;;  %v238_v21 = vld [vmem:[%s3151_s25 + $0x128] sm:$0xff]   ;;  %v242_v22 = vld [vmem:[%s3151_s25 + $0x130] sm:$0xff]  }
  0x1a   : > { %235 = vst [vmem:[%s3156_s26 + $0xa0] sm:$0xff] %v234_v20   ;;  %v246_v23 = vld [vmem:[%s3151_s25 + $0x138] sm:$0xff]   ;;  %239 = vst [vmem:[%s3156_s26 + $0xa8] sm:$0xff] %v238_v21   ;;  %v250_v24 = vld [vmem:[%s3151_s25 + $0x140] sm:$0xff]  }
  0x1b   : > { %243 = vst [vmem:[%s3156_s26 + $0xb0] sm:$0xff] %v242_v22   ;;  %247 = vst [vmem:[%s3156_s26 + $0xb8] sm:$0xff] %v246_v23   ;;  %v254_v25 = vld [vmem:[%s3151_s25 + $0x148] sm:$0xff]   ;;  %v258_v26 = vld [vmem:[%s3151_s25 + $0x150] sm:$0xff]  }
  0x1c   : > { %251 = vst [vmem:[%s3156_s26 + $0xc0] sm:$0xff] %v250_v24   ;;  %255 = vst [vmem:[%s3156_s26 + $0xc8] sm:$0xff] %v254_v25   ;;  %v262_v27 = vld [vmem:[%s3151_s25 + $0x158] sm:$0xff]   ;;  %v266_v28 = vld [vmem:[%s3151_s25 + $0x160] sm:$0xff]  }
  0x1d   : > { %259 = vst [vmem:[%s3156_s26 + $0xd0] sm:$0xff] %v258_v26   ;;  %v270_v29 = vld [vmem:[%s3151_s25 + $0x168] sm:$0xff]   ;;  %263 = vst [vmem:[%s3156_s26 + $0xd8] sm:$0xff] %v262_v27   ;;  %v274_v30 = vld [vmem:[%s3151_s25 + $0x170] sm:$0xff]  }
  0x1e   : > { %267 = vst [vmem:[%s3156_s26 + $0xe0] sm:$0xff] %v266_v28   ;;  %271 = vst [vmem:[%s3156_s26 + $0xe8] sm:$0xff] %v270_v29   ;;  %v278_v31 = vld [vmem:[%s3151_s25 + $0x178] sm:$0xff]   ;;  %v282_v32 = vld [vmem:[%s3151_s25 + $0x200] sm:$0xff]  }
  0x1f   : > { %275 = vst [vmem:[%s3156_s26 + $0xf0] sm:$0xff] %v274_v30   ;;  %279 = vst [vmem:[%s3156_s26 + $0xf8] sm:$0xff] %v278_v31   ;;  %v286_v33 = vld [vmem:[%s3151_s25 + $0x208] sm:$0xff]   ;;  %v290_v34 = vld [vmem:[%s3151_s25 + $0x210] sm:$0xff]  }
  0x20   : > { %283 = vst [vmem:[%s3156_s26 + $0x100] sm:$0xff] %v282_v32   ;;  %v294_v35 = vld [vmem:[%s3151_s25 + $0x218] sm:$0xff]   ;;  %287 = vst [vmem:[%s3156_s26 + $0x108] sm:$0xff] %v286_v33   ;;  %v298_v36 = vld [vmem:[%s3151_s25 + $0x220] sm:$0xff]  }
  0x21   : > { %291 = vst [vmem:[%s3156_s26 + $0x110] sm:$0xff] %v290_v34   ;;  %295 = vst [vmem:[%s3156_s26 + $0x118] sm:$0xff] %v294_v35   ;;  %v302_v37 = vld [vmem:[%s3151_s25 + $0x228] sm:$0xff]   ;;  %v306_v38 = vld [vmem:[%s3151_s25 + $0x230] sm:$0xff]  }
  0x22   : > { %299 = vst [vmem:[%s3156_s26 + $0x120] sm:$0xff] %v298_v36   ;;  %303 = vst [vmem:[%s3156_s26 + $0x128] sm:$0xff] %v302_v37   ;;  %v310_v39 = vld [vmem:[%s3151_s25 + $0x238] sm:$0xff]   ;;  %v314_v40 = vld [vmem:[%s3151_s25 + $0x240] sm:$0xff]  }
  0x23   : > { %307 = vst [vmem:[%s3156_s26 + $0x130] sm:$0xff] %v306_v38   ;;  %v318_v41 = vld [vmem:[%s3151_s25 + $0x248] sm:$0xff]   ;;  %311 = vst [vmem:[%s3156_s26 + $0x138] sm:$0xff] %v310_v39   ;;  %v322_v42 = vld [vmem:[%s3151_s25 + $0x250] sm:$0xff]  }
  0x24   : > { %315 = vst [vmem:[%s3156_s26 + $0x140] sm:$0xff] %v314_v40   ;;  %319 = vst [vmem:[%s3156_s26 + $0x148] sm:$0xff] %v318_v41   ;;  %v326_v43 = vld [vmem:[%s3151_s25 + $0x258] sm:$0xff]   ;;  %v330_v44 = vld [vmem:[%s3151_s25 + $0x260] sm:$0xff]  }
  0x25   : > { %323 = vst [vmem:[%s3156_s26 + $0x150] sm:$0xff] %v322_v42   ;;  %327 = vst [vmem:[%s3156_s26 + $0x158] sm:$0xff] %v326_v43   ;;  %v334_v45 = vld [vmem:[%s3151_s25 + $0x268] sm:$0xff]   ;;  %v338_v46 = vld [vmem:[%s3151_s25 + $0x270] sm:$0xff]  }
  0x26   : > { %331 = vst [vmem:[%s3156_s26 + $0x160] sm:$0xff] %v330_v44   ;;  %v342_v47 = vld [vmem:[%s3151_s25 + $0x278] sm:$0xff]   ;;  %335 = vst [vmem:[%s3156_s26 + $0x168] sm:$0xff] %v334_v45   ;;  %v346_v48 = vld [vmem:[%s3151_s25 + $0x300] sm:$0xff]  }
  0x27   : > { %339 = vst [vmem:[%s3156_s26 + $0x170] sm:$0xff] %v338_v46   ;;  %343 = vst [vmem:[%s3156_s26 + $0x178] sm:$0xff] %v342_v47   ;;  %v350_v49 = vld [vmem:[%s3151_s25 + $0x308] sm:$0xff]   ;;  %v354_v50 = vld [vmem:[%s3151_s25 + $0x310] sm:$0xff]  }
  0x28   : > { %347 = vst [vmem:[%s3156_s26 + $0x180] sm:$0xff] %v346_v48   ;;  %351 = vst [vmem:[%s3156_s26 + $0x188] sm:$0xff] %v350_v49   ;;  %v358_v51 = vld [vmem:[%s3151_s25 + $0x318] sm:$0xff]   ;;  %v362_v52 = vld [vmem:[%s3151_s25 + $0x320] sm:$0xff]  }
  0x29   : > { %355 = vst [vmem:[%s3156_s26 + $0x190] sm:$0xff] %v354_v50   ;;  %v366_v53 = vld [vmem:[%s3151_s25 + $0x328] sm:$0xff]   ;;  %359 = vst [vmem:[%s3156_s26 + $0x198] sm:$0xff] %v358_v51   ;;  %v370_v54 = vld [vmem:[%s3151_s25 + $0x330] sm:$0xff]  }
  0x2a   : > { %363 = vst [vmem:[%s3156_s26 + $0x1a0] sm:$0xff] %v362_v52   ;;  %367 = vst [vmem:[%s3156_s26 + $0x1a8] sm:$0xff] %v366_v53   ;;  %v374_v55 = vld [vmem:[%s3151_s25 + $0x338] sm:$0xff]   ;;  %v378_v56 = vld [vmem:[%s3151_s25 + $0x340] sm:$0xff]  }
  0x2b   : > { %371 = vst [vmem:[%s3156_s26 + $0x1b0] sm:$0xff] %v370_v54   ;;  %375 = vst [vmem:[%s3156_s26 + $0x1b8] sm:$0xff] %v374_v55   ;;  %v382_v57 = vld [vmem:[%s3151_s25 + $0x348] sm:$0xff]   ;;  %v386_v58 = vld [vmem:[%s3151_s25 + $0x350] sm:$0xff]  }
  0x2c   : > { %379 = vst [vmem:[%s3156_s26 + $0x1c0] sm:$0xff] %v378_v56   ;;  %v390_v59 = vld [vmem:[%s3151_s25 + $0x358] sm:$0xff]   ;;  %383 = vst [vmem:[%s3156_s26 + $0x1c8] sm:$0xff] %v382_v57   ;;  %v394_v60 = vld [vmem:[%s3151_s25 + $0x360] sm:$0xff]  }
  0x2d   : > { %387 = vst [vmem:[%s3156_s26 + $0x1d0] sm:$0xff] %v386_v58   ;;  %391 = vst [vmem:[%s3156_s26 + $0x1d8] sm:$0xff] %v390_v59   ;;  %v398_v61 = vld [vmem:[%s3151_s25 + $0x368] sm:$0xff]   ;;  %v402_v62 = vld [vmem:[%s3151_s25 + $0x370] sm:$0xff]  }
  0x2e   : > { %395 = vst [vmem:[%s3156_s26 + $0x1e0] sm:$0xff] %v394_v60   ;;  %399 = vst [vmem:[%s3156_s26 + $0x1e8] sm:$0xff] %v398_v61   ;;  %v406_v63 = vld [vmem:[%s3151_s25 + $0x378] sm:$0xff]  }
  0x2f   : > { %403 = vst [vmem:[%s3156_s26 + $0x1f0] sm:$0xff] %v402_v62   ;;  %407 = vst [vmem:[%s3156_s26 + $0x1f8] sm:$0xff] %v406_v63  }
  0x30 PF: > { %p2425_p5 = scmp.ge.s32.totalorder %s3094_s14, 1  ;;  %p688_p6 = scmp.lt.s32.totalorder %s3094_s14, 3 }
  0x32   : > { %p689_p7 = pnand %p2425_p5, %p688_p6 }
  0x34   : > { %692 = sbr.rel (%p689_p7) target bundleno = 410 (0x19a), region = 69 }
  0x39   : > { %v3003_v0 = vld [vmem:[%s3742_s1 + $0x20] sm:$0x3f]   ;;  %vm926_vm0 = vcmask 1044480   ;;  %vm927_vm1 = vcmask 1045504   ;;  %v3096_v1 = vmov 65535   ;;  %v3004_v4 = vld [vmem:[%s3742_s1 + $0x18] sm:$0xff]  }
  0x3a   : > { %v928_v2 = vsel %vm926_vm0, 4294967295, %v3096_v1  ;;  %s695_s4 = sand.u32 1, %s3086_s12   ;;  %v3005_v6 = vld [vmem:[%s3742_s1 + $0x10] sm:$0xff]   ;;  %vm877_vm2 = vcmask 613376   ;;  %v3006_v9 = vld [vmem:[%s3742_s1 + $0x8] sm:$0xff]   ;;  %v3007_v10 = vld [vmem:[%s3742_s1] sm:$0xff]  }
  0x3b   : > { %v929_v3 = vsel %vm927_vm1, %v928_v2, 0  ;;  %s2426_s5 = sshll.u32 %s695_s4, 9  ;;  %s2427_s17 = sshll.u32 %s2418_s15, 5  ;;  %vm2323_vm3 = vcmask 257024  }
  0x3c   : > { %v931_v5 = vand.u32 %v3003_v0, %v929_v3  ;;  %s3295_s8 = scalar_lea.vmem [#allocation2], %s2426_s5  ;;  %p720_p8 = scmp.lt.s32.totalorder %s2427_s17, 63 }
  0x3d   : > { %v3008_v7 = vld [vmem:[%s3295_s8] sm:$0xff]   ;;  %v3010_v11 = vld [vmem:[%s3295_s8 + $0x8] sm:$0xff]   ;;  %v3012_v13 = vld [vmem:[%s3295_s8 + $0x10] sm:$0xff]  }
  0x3e   : > { %2810 = vmatprep.subr.bf16.mxu0 %v931_v5  ;;  %2852 = vmatprep.subr.bf16.mxu1 %v931_v5  ;;  %v3009_v8 = vld [vmem:[%s3295_s8 + $0x80] sm:$0xff]   ;;  %v3011_v12 = vld [vmem:[%s3295_s8 + $0x88] sm:$0xff]   ;;  %v3013_v14 = vld [vmem:[%s3295_s8 + $0x90] sm:$0xff]   ;;  %s3773_s17 = smov (!%p720_p8, %s2427_s17), 63 }
  0x3f   : > { %2811 = vmatpush3.bf16.msra.mxu0 %v931_v5  ;;  %2853 = vmatpush3.bf16.msra.mxu1 %v931_v5  ;;  %v3014_v15 = vld [vmem:[%s3295_s8 + $0x18] sm:$0xff]   ;;  %v3016_v17 = vld [vmem:[%s3295_s8 + $0x20] sm:$0xff]   ;;  %v3018_v19 = vld [vmem:[%s3295_s8 + $0x28] sm:$0xff]   ;;  %s2428_s18 = sshll.u32 %s3773_s17, 2 }
  0x40   : > { %2812 = vmatprep.subr.bf16.mxu0 %v3004_v4  ;;  %2854 = vmatprep.subr.bf16.mxu1 %v3004_v4  ;;  %v3015_v16 = vld [vmem:[%s3295_s8 + $0x98] sm:$0xff]   ;;  %v3017_v18 = vld [vmem:[%s3295_s8 + $0xa0] sm:$0xff]   ;;  %v3019_v20 = vld [vmem:[%s3295_s8 + $0xa8] sm:$0xff]   ;;  %s3580_s22 = scalar_lea.vmem %s3744_s3, %s2428_s18 }
  0x41   : > { %2820 = vmatprep.mubr.msk.bf16.mxu0 %vm877_vm2, %v3008_v7  ;;  %2862 = vmatprep.mubr.msk.bf16.mxu1 %vm877_vm2, %v3009_v8  ;;  %v3020_v21 = vld [vmem:[%s3295_s8 + $0x30] sm:$0xff]   ;;  %v3022_v23 = vld [vmem:[%s3295_s8 + $0x38] sm:$0xff]   ;;  %v3024_v25 = vld [vmem:[%s3295_s8 + $0x40] sm:$0xff]  }
  0x42   : > { %v3021_v22 = vld [vmem:[%s3295_s8 + $0xb0] sm:$0xff]   ;;  %v3023_v24 = vld [vmem:[%s3295_s8 + $0xb8] sm:$0xff]   ;;  %v3025_v26 = vld [vmem:[%s3295_s8 + $0xc0] sm:$0xff]  }
  0x43   : > { %2813 = vmatpush3.bf16.msra.mxu0 %v3004_v4  ;;  %2855 = vmatpush3.bf16.msra.mxu1 %v3004_v4  ;;  %v3026_v27 = vld [vmem:[%s3295_s8 + $0x48] sm:$0xff]   ;;  %v3028_v29 = vld [vmem:[%s3295_s8 + $0x50] sm:$0xff]   ;;  %v3030_v31 = vld [vmem:[%s3295_s8 + $0x58] sm:$0xff]  }
  0x44   : > { %2814 = vmatprep.subr.bf16.mxu0 %v3005_v6  ;;  %2856 = vmatprep.subr.bf16.mxu1 %v3005_v6  ;;  %v3027_v28 = vld [vmem:[%s3295_s8 + $0xc8] sm:$0xff]   ;;  %v3029_v30 = vld [vmem:[%s3295_s8 + $0xd0] sm:$0xff]   ;;  %v3031_v32 = vld [vmem:[%s3295_s8 + $0xd8] sm:$0xff]  }
  0x45   : > { %v3032_v33 = vld [vmem:[%s3295_s8 + $0x60] sm:$0xff]   ;;  %v3034_v35 = vld [vmem:[%s3295_s8 + $0x68] sm:$0xff]   ;;  %v3036_v37 = vld [vmem:[%s3295_s8 + $0x70] sm:$0xff]  }
  0x46   : > { %v3033_v34 = vld [vmem:[%s3295_s8 + $0xe0] sm:$0xff]   ;;  %v3035_v36 = vld [vmem:[%s3295_s8 + $0xe8] sm:$0xff]   ;;  %v3037_v38 = vld [vmem:[%s3295_s8 + $0xf0] sm:$0xff]  }
  0x47   : > { %2815 = vmatpush3.bf16.msra.mxu0 %v3005_v6  ;;  %2857 = vmatpush3.bf16.msra.mxu1 %v3005_v6  ;;  %v3038_v39 = vld [vmem:[%s3295_s8 + $0x78] sm:$0xff]   ;;  %v3040_v41 = vld [vmem:[%s3295_s8 + $0x100] sm:$0xff]   ;;  %v3042_v43 = vld [vmem:[%s3295_s8 + $0x108] sm:$0xff]  }
  0x48   : > { %2816 = vmatprep.subr.bf16.mxu0 %v3006_v9  ;;  %2858 = vmatprep.subr.bf16.mxu1 %v3006_v9  ;;  %v3039_v40 = vld [vmem:[%s3295_s8 + $0xf8] sm:$0xff]   ;;  %v3041_v42 = vld [vmem:[%s3295_s8 + $0x180] sm:$0xff]   ;;  %v3043_v44 = vld [vmem:[%s3295_s8 + $0x188] sm:$0xff]  }
  0x49   : > { %v3044_v45 = vld [vmem:[%s3295_s8 + $0x110] sm:$0xff]   ;;  %v3046_v47 = vld [vmem:[%s3295_s8 + $0x118] sm:$0xff]   ;;  %v3048_v49 = vld [vmem:[%s3295_s8 + $0x120] sm:$0xff]  }
  0x4a   : > { %v3045_v46 = vld [vmem:[%s3295_s8 + $0x190] sm:$0xff]   ;;  %v3047_v48 = vld [vmem:[%s3295_s8 + $0x198] sm:$0xff]   ;;  %v3049_v50 = vld [vmem:[%s3295_s8 + $0x1a0] sm:$0xff]  }
  0x4b   : > { %2817 = vmatpush3.bf16.msra.mxu0 %v3006_v9  ;;  %2859 = vmatpush3.bf16.msra.mxu1 %v3006_v9  ;;  %v3050_v51 = vld [vmem:[%s3295_s8 + $0x128] sm:$0xff]   ;;  %v3052_v53 = vld [vmem:[%s3295_s8 + $0x130] sm:$0xff]   ;;  %v3054_v55 = vld [vmem:[%s3295_s8 + $0x138] sm:$0xff]  }
  0x4c   : > { %2818 = vmatprep.subr.bf16.mxu0 %v3007_v10  ;;  %2860 = vmatprep.subr.bf16.mxu1 %v3007_v10  ;;  %v3051_v52 = vld [vmem:[%s3295_s8 + $0x1a8] sm:$0xff]   ;;  %v3053_v54 = vld [vmem:[%s3295_s8 + $0x1b0] sm:$0xff]   ;;  %v3055_v56 = vld [vmem:[%s3295_s8 + $0x1b8] sm:$0xff]  }
  0x4d   : > { %v3056_v57 = vld [vmem:[%s3295_s8 + $0x140] sm:$0xff]   ;;  %v3058_v59 = vld [vmem:[%s3295_s8 + $0x148] sm:$0xff]   ;;  %v3060_v61 = vld [vmem:[%s3295_s8 + $0x150] sm:$0xff]  }
  0x4e   : > { %v3057_v58 = vld [vmem:[%s3295_s8 + $0x1c0] sm:$0xff]   ;;  %v3059_v60 = vld [vmem:[%s3295_s8 + $0x1c8] sm:$0xff]   ;;  %v3061_v62 = vld [vmem:[%s3295_s8 + $0x1d0] sm:$0xff]  }
  0x4f   : > { %2819 = vmatpush3.bf16.msra.mxu0 %v3007_v10  ;;  %2861 = vmatpush3.bf16.msra.mxu1 %v3007_v10  ;;  %v3062_v63 = vld [vmem:[%s3295_s8 + $0x158] sm:$0xff]   ;;  %v3064_v1 = vld [vmem:[%s3295_s8 + $0x160] sm:$0xff]   ;;  %v3066_v3 = vld [vmem:[%s3295_s8 + $0x168] sm:$0xff]  }
  0x50   : > { %2894 = vmatprep.subr.bf16.mxu0 %v931_v5  ;;  %2936 = vmatprep.subr.bf16.mxu1 %v931_v5  ;;  %v3063_v0 = vld [vmem:[%s3295_s8 + $0x1d8] sm:$0xff]   ;;  %v3065_v2 = vld [vmem:[%s3295_s8 + $0x1e0] sm:$0xff]  }
  0x51   : > { %v3070_v7 = vld [vmem:[%s3295_s8 + $0x178] sm:$0xff]  }
  0x52   : > { %2821 = vmatmul.mubr.msk.bf16.vlgmr.msra.gmra.mxu0 %vm877_vm2, %v3010_v11  ;;  %2863 = vmatmul.mubr.msk.bf16.vlgmr.msra.gmra.mxu1 %vm877_vm2, %v3011_v12  ;;  %v3071_v8 = vld [vmem:[%s3295_s8 + $0x1f8] sm:$0xff]  }
  0x53   : > { %2895 = vmatpush3.bf16.msra.mxu0 %v931_v5  ;;  %2937 = vmatpush3.bf16.msra.mxu1 %v931_v5  ;;  %v3068_v5 = vld [vmem:[%s3295_s8 + $0x170] sm:$0xff]  }
  0x54   : > { %2824 = vmatprep.mubr.msk.bf16.mxu0 %vm877_vm2, %v3012_v13  ;;  %2866 = vmatprep.mubr.msk.bf16.mxu1 %vm877_vm2, %v3013_v14 }
  0x55   : > { %2896 = vmatprep.subr.bf16.mxu0 %v3004_v4  ;;  %2938 = vmatprep.subr.bf16.mxu1 %v3004_v4 }
  0x57   : > { %2897 = vmatpush3.bf16.msra.mxu0 %v3004_v4  ;;  %2939 = vmatpush3.bf16.msra.mxu1 %v3004_v4  ;;  %v3067_v4 = vld [vmem:[%s3295_s8 + $0x1e8] sm:$0xff]  }
  0x58   : > { %2898 = vmatprep.subr.bf16.mxu0 %v3005_v6  ;;  %2940 = vmatprep.subr.bf16.mxu1 %v3005_v6 }
  0x5a   : > { %2825 = vmatmul.mubr.msk.bf16.gmra.mxu0 %vm877_vm2, %v3014_v15  ;;  %2867 = vmatmul.mubr.msk.bf16.gmra.mxu1 %vm877_vm2, %v3015_v16 }
  0x5b   : > { %2828 = vmatprep.mubr.msk.bf16.mxu0 %vm877_vm2, %v3016_v17  ;;  %2870 = vmatprep.mubr.msk.bf16.mxu1 %vm877_vm2, %v3017_v18 }
  0x5c   : > { %2899 = vmatpush3.bf16.msra.mxu0 %v3005_v6  ;;  %2941 = vmatpush3.bf16.msra.mxu1 %v3005_v6  ;;  %v3069_v6 = vld [vmem:[%s3295_s8 + $0x1f0] sm:$0xff]  }
  0x5d   : > { %2900 = vmatprep.subr.bf16.mxu0 %v3006_v9  ;;  %2942 = vmatprep.subr.bf16.mxu1 %v3006_v9 }
  0x60   : > { %2901 = vmatpush3.bf16.msra.mxu0 %v3006_v9  ;;  %2943 = vmatpush3.bf16.msra.mxu1 %v3006_v9 }
  0x61   : > { %2902 = vmatprep.subr.bf16.mxu0 %v3007_v10  ;;  %2944 = vmatprep.subr.bf16.mxu1 %v3007_v10 }
  0x62   : > { %2829 = vmatmul.mubr.msk.bf16.gmra.mxu0 %vm877_vm2, %v3018_v19  ;;  %2871 = vmatmul.mubr.msk.bf16.gmra.mxu1 %vm877_vm2, %v3019_v20 }
  0x63   : > { %2832 = vmatprep.mubr.msk.bf16.mxu0 %vm877_vm2, %v3020_v21  ;;  %2874 = vmatprep.mubr.msk.bf16.mxu1 %vm877_vm2, %v3021_v22 }
  0x64   : > { %2903 = vmatpush3.bf16.msra.mxu0 %v3007_v10  ;;  %2945 = vmatpush3.bf16.msra.mxu1 %v3007_v10 }
  0x6a   : > { %2833 = vmatmul.mubr.msk.bf16.gmra.mxu0 %vm877_vm2, %v3022_v23  ;;  %2875 = vmatmul.mubr.msk.bf16.gmra.mxu1 %vm877_vm2, %v3023_v24 }
  0x6b   : > { %2836 = vmatprep.mubr.msk.bf16.mxu0 %vm877_vm2, %v3024_v25  ;;  %2878 = vmatprep.mubr.msk.bf16.mxu1 %vm877_vm2, %v3025_v26 }
  0x72   : > { %2837 = vmatmul.mubr.msk.bf16.gmra.mxu0 %vm877_vm2, %v3026_v27  ;;  %2879 = vmatmul.mubr.msk.bf16.gmra.mxu1 %vm877_vm2, %v3027_v28 }
  0x73   : > { %2840 = vmatprep.mubr.msk.bf16.mxu0 %vm877_vm2, %v3028_v29  ;;  %2882 = vmatprep.mubr.msk.bf16.mxu1 %vm877_vm2, %v3029_v30 }
  0x7a   : > { %2841 = vmatmul.mubr.msk.bf16.gmra.mxu0 %vm877_vm2, %v3030_v31  ;;  %2883 = vmatmul.mubr.msk.bf16.gmra.mxu1 %vm877_vm2, %v3031_v32 }
  0x7b   : > { %2844 = vmatprep.mubr.msk.bf16.mxu0 %vm877_vm2, %v3032_v33  ;;  %2886 = vmatprep.mubr.msk.bf16.mxu1 %vm877_vm2, %v3033_v34 }
  0x82   : > { %2845 = vmatmul.mubr.msk.bf16.gmra.mxu0 %vm877_vm2, %v3034_v35  ;;  %2887 = vmatmul.mubr.msk.bf16.gmra.mxu1 %vm877_vm2, %v3035_v36 }
  0x83   : > { %2848 = vmatprep.mubr.msk.bf16.mxu0 %vm877_vm2, %v3036_v37  ;;  %2890 = vmatprep.mubr.msk.bf16.mxu1 %vm877_vm2, %v3037_v38 }
  0x8a   : > { %2849 = vmatmul.mubr.msk.bf16.gmra.mxu0 %vm877_vm2, %v3038_v39  ;;  %2891 = vmatmul.mubr.msk.bf16.gmra.mxu1 %vm877_vm2, %v3039_v40 }
  0x8b   : > { %2904 = vmatprep.mubr.msk.bf16.mxu0 %vm877_vm2, %v3040_v41  ;;  %2946 = vmatprep.mubr.msk.bf16.mxu1 %vm877_vm2, %v3041_v42 }
  0x92   : > { %2905 = vmatmul.mubr.msk.bf16.vlgmr.msra.gmra.mxu0 %vm877_vm2, %v3042_v43  ;;  %2947 = vmatmul.mubr.msk.bf16.vlgmr.msra.gmra.mxu1 %vm877_vm2, %v3043_v44 }
  0x93   : > { %2908 = vmatprep.mubr.msk.bf16.mxu0 %vm877_vm2, %v3044_v45  ;;  %2950 = vmatprep.mubr.msk.bf16.mxu1 %vm877_vm2, %v3045_v46 }
  0x9a   : > { %2909 = vmatmul.mubr.msk.bf16.gmra.mxu0 %vm877_vm2, %v3046_v47  ;;  %2951 = vmatmul.mubr.msk.bf16.gmra.mxu1 %vm877_vm2, %v3047_v48 }
  0x9b   : > { %2912 = vmatprep.mubr.msk.bf16.mxu0 %vm877_vm2, %v3048_v49  ;;  %2954 = vmatprep.mubr.msk.bf16.mxu1 %vm877_vm2, %v3049_v50 }
  0xa2   : > { %2913 = vmatmul.mubr.msk.bf16.gmra.mxu0 %vm877_vm2, %v3050_v51  ;;  %2955 = vmatmul.mubr.msk.bf16.gmra.mxu1 %vm877_vm2, %v3051_v52 }
  0xa3   : > { %2916 = vmatprep.mubr.msk.bf16.mxu0 %vm877_vm2, %v3052_v53  ;;  %2958 = vmatprep.mubr.msk.bf16.mxu1 %vm877_vm2, %v3053_v54 }
  0xaa   : > { %2917 = vmatmul.mubr.msk.bf16.gmra.mxu0 %vm877_vm2, %v3054_v55  ;;  %2959 = vmatmul.mubr.msk.bf16.gmra.mxu1 %vm877_vm2, %v3055_v56 }
  0xab   : > { %2920 = vmatprep.mubr.msk.bf16.mxu0 %vm877_vm2, %v3056_v57  ;;  %2962 = vmatprep.mubr.msk.bf16.mxu1 %vm877_vm2, %v3057_v58 }
  0xb2   : > { %2921 = vmatmul.mubr.msk.bf16.gmra.mxu0 %vm877_vm2, %v3058_v59  ;;  %2963 = vmatmul.mubr.msk.bf16.gmra.mxu1 %vm877_vm2, %v3059_v60 }
  0xb3   : > { %2924 = vmatprep.mubr.msk.bf16.mxu0 %vm877_vm2, %v3060_v61  ;;  %2966 = vmatprep.mubr.msk.bf16.mxu1 %vm877_vm2, %v3061_v62 }
  0xba   : > { %2925 = vmatmul.mubr.msk.bf16.gmra.mxu0 %vm877_vm2, %v3062_v63  ;;  %2967 = vmatmul.mubr.msk.bf16.gmra.mxu1 %vm877_vm2, %v3063_v0 }
  0xbb   : > { %2928 = vmatprep.mubr.msk.bf16.mxu0 %vm877_vm2, %v3064_v1  ;;  %2970 = vmatprep.mubr.msk.bf16.mxu1 %vm877_vm2, %v3065_v2 }
  0xc2   : > { %2929 = vmatmul.mubr.msk.bf16.gmra.mxu0 %vm877_vm2, %v3066_v3  ;;  %2971 = vmatmul.mubr.msk.bf16.gmra.mxu1 %vm877_vm2, %v3067_v4 }
  0xc3   : > { %2932 = vmatprep.mubr.msk.bf16.mxu0 %vm877_vm2, %v3068_v5  ;;  %2974 = vmatprep.mubr.msk.bf16.mxu1 %vm877_vm2, %v3069_v6 }
  0xca   : > { %2933 = vmatmul.mubr.msk.bf16.gmra.mxu0 %vm877_vm2, %v3070_v7  ;;  %2975 = vmatmul.mubr.msk.bf16.gmra.mxu1 %vm877_vm2, %v3071_v8 }
 0x112   : > { %v3431_v9 = vpop.f32.mrf.mxu0  ;;  %v3433_v10 = vpop.f32.mrf.mxu1 }
 0x114   : > { %v3435_v11 = vpop.f32.mrf.mxu0  ;;  %v3437_v12 = vpop.f32.mrf.mxu1 }
 0x116   : > { %v3439_v13 = vpop.f32.mrf.mxu0  ;;  %v3441_v14 = vpop.f32.mrf.mxu1 }
 0x118   : > { %v3443_v15 = vpop.f32.mrf.mxu0  ;;  %v3445_v16 = vpop.f32.mrf.mxu1 }
 0x11a   : > { %v3447_v17 = vpop.f32.mrf.mxu0  ;;  %v3449_v18 = vpop.f32.mrf.mxu1 }
 0x11c   : > { %v3451_v19 = vpop.f32.mrf.mxu0  ;;  %v3453_v20 = vpop.f32.mrf.mxu1 }
 0x11e   : > { %v3455_v21 = vpop.f32.mrf.mxu0  ;;  %v3457_v22 = vpop.f32.mrf.mxu1 }
 0x120   : > { %v3459_v23 = vpop.f32.mrf.mxu0  ;;  %v3461_v24 = vpop.f32.mrf.mxu1 }
 0x122   : > { %v3463_v25 = vpop.f32.mrf.mxu0  ;;  %v3465_v26 = vpop.f32.mrf.mxu1 }
 0x124   : > { %v3467_v27 = vpop.f32.mrf.mxu0  ;;  %v3469_v28 = vpop.f32.mrf.mxu1 }
 0x126   : > { %v3471_v29 = vpop.f32.mrf.mxu0  ;;  %v3473_v30 = vpop.f32.mrf.mxu1 }
 0x128   : > { %v3475_v31 = vpop.f32.mrf.mxu0  ;;  %v3477_v32 = vpop.f32.mrf.mxu1 }
 0x12a   : > { %v3479_v33 = vpop.f32.mrf.mxu0  ;;  %v3481_v34 = vpop.f32.mrf.mxu1 }
 0x12c   : > { %v3483_v35 = vpop.f32.mrf.mxu0  ;;  %v3485_v36 = vpop.f32.mrf.mxu1 }
 0x12e   : > { %v3487_v37 = vpop.f32.mrf.mxu0  ;;  %v3489_v38 = vpop.f32.mrf.mxu1 }
 0x130   : > { %v3491_v39 = vpop.f32.mrf.mxu0  ;;  %v3493_v40 = vpop.f32.mrf.mxu1 }
 0x132   : > { %v3495_v41 = vpop.f32.mrf.mxu0  ;;  %v3497_v42 = vpop.f32.mrf.mxu1 }
 0x134   : > { %v3499_v43 = vpop.f32.mrf.mxu0  ;;  %v3501_v44 = vpop.f32.mrf.mxu1 }
 0x136   : > { %v3503_v45 = vpop.f32.mrf.mxu0  ;;  %v3505_v46 = vpop.f32.mrf.mxu1 }
 0x138   : > { %v3507_v47 = vpop.f32.mrf.mxu0  ;;  %v3509_v48 = vpop.f32.mrf.mxu1 }
 0x13a   : > { %v3511_v49 = vpop.f32.mrf.mxu0  ;;  %v3513_v50 = vpop.f32.mrf.mxu1 }
 0x13c   : > { %v3515_v51 = vpop.f32.mrf.mxu0  ;;  %v3517_v52 = vpop.f32.mrf.mxu1 }
 0x13e   : > { %v3519_v53 = vpop.f32.mrf.mxu0  ;;  %v3521_v54 = vpop.f32.mrf.mxu1 }
 0x140   : > { %v3523_v55 = vpop.f32.mrf.mxu0  ;;  %v3525_v56 = vpop.f32.mrf.mxu1 }
 0x142   : > { %v3527_v57 = vpop.f32.mrf.mxu0  ;;  %v3529_v58 = vpop.f32.mrf.mxu1 }
 0x144   : > { %v3531_v59 = vpop.f32.mrf.mxu0  ;;  %v3533_v60 = vpop.f32.mrf.mxu1 }
 0x146   : > { %v3535_v61 = vpop.f32.mrf.mxu0  ;;  %v3537_v62 = vpop.f32.mrf.mxu1 }
 0x147   : > { %3745 = vst [vmem:[#allocation3_spill] sm:$0xff] %v3535_v61  ;;  %3746 = vst [vmem:[#allocation4_spill] sm:$0xff] %v3537_v62  ;;  %v1417_v62 = vmax.f32 %v3443_v15, %v3445_v16 }
 0x148   : > { %v3539_v63 = vpop.f32.mrf.mxu0  ;;  %v3541_v0 = vpop.f32.mrf.mxu1 }
 0x149   : > { %3747 = vst [vmem:[#allocation5_spill] sm:$0xff] %v3539_v63  ;;  %3748 = vst [vmem:[#allocation6_spill] sm:$0xff] %v3541_v0 }
 0x14a   : > { %v3543_v1 = vpop.f32.mrf.mxu0  ;;  %v3545_v2 = vpop.f32.mrf.mxu1 }
 0x14b   : > { %3749 = vst [vmem:[#allocation7_spill] sm:$0xff] %v3543_v1  ;;  %3750 = vst [vmem:[#allocation8_spill] sm:$0xff] %v3545_v2  ;;  %v1418_v1 = vmax.f32 %v3431_v9, %v3433_v10 }
 0x14c   : > { %v3549_v3 = vpop.f32.mrf.mxu0  ;;  %v3551_v4 = vpop.f32.mrf.mxu1 }
 0x14d   : > { %3751 = vst [vmem:[#allocation9_spill] sm:$0xff] %v3549_v3  ;;  %3752 = vst [vmem:[#allocation10_spill] sm:$0xff] %v3551_v4  ;;  %v1416_v3 = vmax.f32 %v3435_v11, %v3437_v12 }
 0x14e   : > { %v3553_v5 = vpop.f32.mrf.mxu0  ;;  %v3555_v6 = vpop.f32.mrf.mxu1 }
 0x14f   : > { %3753 = vst [vmem:[#allocation11_spill] sm:$0xff] %v3553_v5  ;;  %3754 = vst [vmem:[#allocation12_spill] sm:$0xff] %v3555_v6  ;;  %v3568_v5 = vld [vmem:[%s3743_s2] ss:$0 sm:$0xff] }
 0x150   : > { %v3557_v7 = vpop.f32.mrf.mxu0  ;;  %v3559_v8 = vpop.f32.mrf.mxu1 }
 0x151   : > { %3755 = vst [vmem:[#allocation13_spill] sm:$0xff] %v3557_v7  ;;  %3756 = vst [vmem:[#allocation14_spill] sm:$0xff] %v3559_v8  ;;  %v1419_v7 = vmax.f32 %v3439_v13, %v3441_v14 }
 0x152   : > { %v2906_v2 = vpop.f32.mrf.mxu0  ;;  %v2948_v63 = vpop.f32.mrf.mxu1 }
 0x153   : > { %v1772_v0 = vmax.f32 %v1418_v1, %v2906_v2  ;;  %v1422_v2 = vmax.f32 %v3447_v17, %v3449_v18 }
 0x154   : > { %v1643_v6 = vpop.f32.mrf.mxu0  ;;  %v1997_v4 = vpop.f32.mrf.mxu1 }
 0x155   : > { %v2126_v8 = vmax.f32 %v1772_v0, %v2948_v63  ;;  %v1770_v9 = vmax.f32 %v1416_v3, %v1643_v6  ;;  %v1420_v3 = vmax.f32 %v3451_v19, %v3453_v20 }
 0x156   : > { %v2907_v10 = vpop.f32.mrf.mxu0  ;;  %v2949_v61 = vpop.f32.mrf.mxu1 }
 0x157   : > { %v2165_v11 = vadd.f32 %v3568_v5, %v2126_v8  ;;  %v2124_v12 = vmax.f32 %v1770_v9, %v1997_v4  ;;  %v1773_v1 = vmax.f32 %v1419_v7, %v2907_v10  ;;  %v1423_v9 = vmax.f32 %v3455_v21, %v3457_v22 }
 0x158   : > { %v1646_v13 = vpop.f32.mrf.mxu0  ;;  %v2000_v14 = vpop.f32.mrf.mxu1 }
 0x159   : > { %v2696_v63 = vpack.c.bf16 %v2165_v11, %v2165_v11  ;;  %v2163_v15 = vadd.f32 %v3568_v5, %v2124_v12  ;;  %v2127_v16 = vmax.f32 %v1773_v1, %v2949_v61  ;;  %v1771_v0 = vmax.f32 %v1417_v62, %v1646_v13 }
 0x15a   : > { %v2910_v4 = vpop.f32.mrf.mxu0  ;;  %v2952_v17 = vpop.f32.mrf.mxu1  ;;  %v1421_v12 = vmax.f32 %v3459_v23, %v3461_v24 }
 0x15b   : > { %2326 = vst.msk [vmem:[%s3580_s22 + $0x8] sm:$0xf] %vm2323_vm3, %v2696_v63  ;;  %v2694_v18 = vpack.c.bf16 %v2163_v15, %v2163_v15  ;;  %v2166_v6 = vadd.f32 %v3568_v5, %v2127_v16  ;;  %v2125_v7 = vmax.f32 %v1771_v0, %v2000_v14  ;;  %v1776_v8 = vmax.f32 %v1422_v2, %v2910_v4 }
 0x15c   : > { %v1659_v10 = vpop.f32.mrf.mxu0  ;;  %v2013_v11 = vpop.f32.mrf.mxu1  ;;  %v1426_v63 = vmax.f32 %v3463_v25, %v3465_v26  ;;  %v1424_v4 = vmax.f32 %v3467_v27, %v3469_v28 }
 0x15d   : > { %2324 = vst.msk [vmem:[%s3580_s22] sm:$0xf] %vm2323_vm3, %v2694_v18  ;;  %v2697_v61 = vpack.c.bf16 %v2166_v6, %v2166_v6  ;;  %v2164_v19 = vadd.f32 %v3568_v5, %v2125_v7  ;;  %v2130_v20 = vmax.f32 %v1776_v8, %v2952_v17  ;;  %v1774_v62 = vmax.f32 %v1420_v3, %v1659_v10 }
 0x15e   : > { %v2911_v1 = vpop.f32.mrf.mxu0  ;;  %v2953_v13 = vpop.f32.mrf.mxu1  ;;  %v1427_v8 = vmax.f32 %v3471_v29, %v3473_v30 }
 0x15f   : > { %2327 = vst.msk [vmem:[%s3580_s22 + $0xc] sm:$0xf] %vm2323_vm3, %v2697_v61  ;;  %v2695_v2 = vpack.c.bf16 %v2164_v19, %v2164_v19  ;;  %v2169_v21 = vadd.f32 %v3568_v5, %v2130_v20  ;;  %v2128_v22 = vmax.f32 %v1774_v62, %v2013_v11  ;;  %v1777_v14 = vmax.f32 %v1423_v9, %v2911_v1 }
 0x160   : > { %v1662_v15 = vpop.f32.mrf.mxu0  ;;  %v2016_v16 = vpop.f32.mrf.mxu1  ;;  %v1425_v19 = vmax.f32 %v3475_v31, %v3477_v32 }
 0x161   : > { %2325 = vst.msk [vmem:[%s3580_s22 + $0x4] sm:$0xf] %vm2323_vm3, %v2695_v2  ;;  %v2700_v0 = vpack.c.bf16 %v2169_v21, %v2169_v21  ;;  %v2167_v23 = vadd.f32 %v3568_v5, %v2128_v22  ;;  %v2131_v24 = vmax.f32 %v1777_v14, %v2953_v13  ;;  %v1775_v3 = vmax.f32 %v1421_v12, %v1662_v15 }
 0x162   : > { %v2914_v17 = vpop.f32.mrf.mxu0  ;;  %v2956_v18 = vpop.f32.mrf.mxu1  ;;  %v1430_v13 = vmax.f32 %v3479_v33, %v3481_v34 }
 0x163   : > { %2330 = vst.msk [vmem:[%s3580_s22 + $0x18] sm:$0xf] %vm2323_vm3, %v2700_v0  ;;  %v2698_v6 = vpack.c.bf16 %v2167_v23, %v2167_v23  ;;  %v2170_v25 = vadd.f32 %v3568_v5, %v2131_v24  ;;  %v2129_v26 = vmax.f32 %v1775_v3, %v2016_v16  ;;  %v1780_v7 = vmax.f32 %v1426_v63, %v2914_v17 }
 0x164   : > { %v1675_v9 = vpop.f32.mrf.mxu0  ;;  %v2029_v10 = vpop.f32.mrf.mxu1  ;;  %v1428_v63 = vmax.f32 %v3483_v35, %v3485_v36  ;;  %v1431_v24 = vmax.f32 %v3487_v37, %v3489_v38 }
 0x165   : > { %2328 = vst.msk [vmem:[%s3580_s22 + $0x10] sm:$0xf] %vm2323_vm3, %v2698_v6  ;;  %v2701_v11 = vpack.c.bf16 %v2170_v25, %v2170_v25  ;;  %v2168_v27 = vadd.f32 %v3568_v5, %v2129_v26  ;;  %v2134_v28 = vmax.f32 %v1780_v7, %v2956_v18  ;;  %v1778_v61 = vmax.f32 %v1424_v4, %v1675_v9 }
 0x166   : > { %v2915_v20 = vpop.f32.mrf.mxu0  ;;  %v2957_v62 = vpop.f32.mrf.mxu1  ;;  %v1429_v6 = vmax.f32 %v3491_v39, %v3493_v40  ;;  %v1434_v9 = vmax.f32 %v3495_v41, %v3497_v42 }
 0x167   : > { %2331 = vst.msk [vmem:[%s3580_s22 + $0x1c] sm:$0xf] %vm2323_vm3, %v2701_v11  ;;  %v2699_v12 = vpack.c.bf16 %v2168_v27, %v2168_v27  ;;  %v2173_v29 = vadd.f32 %v3568_v5, %v2134_v28  ;;  %v2132_v30 = vmax.f32 %v1778_v61, %v2029_v10  ;;  %v1781_v1 = vmax.f32 %v1427_v8, %v2915_v20 }
 0x168   : > { %v1678_v2 = vpop.f32.mrf.mxu0  ;;  %v2032_v21 = vpop.f32.mrf.mxu1  ;;  %v1432_v61 = vmax.f32 %v3499_v43, %v3501_v44 }
 0x169   : > { %2329 = vst.msk [vmem:[%s3580_s22 + $0x14] sm:$0xf] %vm2323_vm3, %v2699_v12  ;;  %v2704_v22 = vpack.c.bf16 %v2173_v29, %v2173_v29  ;;  %v2171_v31 = vadd.f32 %v3568_v5, %v2132_v30  ;;  %v2135_v32 = vmax.f32 %v1781_v1, %v2957_v62  ;;  %v1779_v14 = vmax.f32 %v1425_v19, %v1678_v2 }
 0x16a   : > { %v2918_v15 = vpop.f32.mrf.mxu0  ;;  %v2960_v16 = vpop.f32.mrf.mxu1  ;;  %v1435_v29 = vmax.f32 %v3503_v45, %v3505_v46 }
 0x16b   : > { %2334 = vst.msk [vmem:[%s3580_s22 + $0x28] sm:$0xf] %vm2323_vm3, %v2704_v22  ;;  %v2702_v0 = vpack.c.bf16 %v2171_v31, %v2171_v31  ;;  %v2174_v33 = vadd.f32 %v3568_v5, %v2135_v32  ;;  %v2133_v34 = vmax.f32 %v1779_v14, %v2032_v21  ;;  %v1784_v23 = vmax.f32 %v1430_v13, %v2918_v15 }
 0x16c   : > { %v1691_v3 = vpop.f32.mrf.mxu0  ;;  %v2045_v4 = vpop.f32.mrf.mxu1  ;;  %v1433_v21 = vmax.f32 %v3507_v47, %v3509_v48 }
 0x16d   : > { %2332 = vst.msk [vmem:[%s3580_s22 + $0x20] sm:$0xf] %vm2323_vm3, %v2702_v0  ;;  %v2705_v17 = vpack.c.bf16 %v2174_v33, %v2174_v33  ;;  %v2172_v35 = vadd.f32 %v3568_v5, %v2133_v34  ;;  %v2138_v36 = vmax.f32 %v1784_v23, %v2960_v16  ;;  %v1782_v18 = vmax.f32 %v1428_v63, %v1691_v3 }
 0x16e   : > { %v2919_v25 = vpop.f32.mrf.mxu0  ;;  %v2961_v26 = vpop.f32.mrf.mxu1  ;;  %v1438_v63 = vmax.f32 %v3511_v49, %v3513_v50  ;;  %v1436_v34 = vmax.f32 %v3515_v51, %v3517_v52 }
 0x16f   : > { %2335 = vst.msk [vmem:[%s3580_s22 + $0x2c] sm:$0xf] %vm2323_vm3, %v2705_v17  ;;  %v2703_v7 = vpack.c.bf16 %v2172_v35, %v2172_v35  ;;  %v2177_v37 = vadd.f32 %v3568_v5, %v2138_v36  ;;  %v2136_v38 = vmax.f32 %v1782_v18, %v2045_v4  ;;  %v1785_v8 = vmax.f32 %v1431_v24, %v2919_v25 }
 0x170   : > { %v1694_v10 = vpop.f32.mrf.mxu0  ;;  %v2048_v11 = vpop.f32.mrf.mxu1  ;;  %v1439_v17 = vmax.f32 %v3519_v53, %v3521_v54  ;;  %v1437_v25 = vmax.f32 %v3523_v55, %v3525_v56 }
 0x171   : > { %2333 = vst.msk [vmem:[%s3580_s22 + $0x24] sm:$0xf] %vm2323_vm3, %v2703_v7  ;;  %v2708_v27 = vpack.c.bf16 %v2177_v37, %v2177_v37  ;;  %v2175_v39 = vadd.f32 %v3568_v5, %v2136_v38  ;;  %v2139_v40 = vmax.f32 %v1785_v8, %v2961_v26  ;;  %v1783_v28 = vmax.f32 %v1429_v6, %v1694_v10 }
 0x172   : > { %v2922_v19 = vpop.f32.mrf.mxu0  ;;  %v2964_v20 = vpop.f32.mrf.mxu1  ;;  %v1442_v8 = vmax.f32 %v3527_v57, %v3529_v58 }
 0x173   : > { %2338 = vst.msk [vmem:[%s3580_s22 + $0x38] sm:$0xf] %vm2323_vm3, %v2708_v27  ;;  %v2706_v62 = vpack.c.bf16 %v2175_v39, %v2175_v39  ;;  %v2178_v41 = vadd.f32 %v3568_v5, %v2139_v40  ;;  %v2137_v42 = vmax.f32 %v1783_v28, %v2048_v11  ;;  %v1788_v12 = vmax.f32 %v1434_v9, %v2922_v19 }
 0x174   : > { %v1707_v30 = vpop.f32.mrf.mxu0  ;;  %v2061_v1 = vpop.f32.mrf.mxu1  ;;  %v1440_v39 = vmax.f32 %v3531_v59, %v3533_v60 }
 0x175   : > { %2336 = vst.msk [vmem:[%s3580_s22 + $0x30] sm:$0xf] %vm2323_vm3, %v2706_v62  ;;  %v2709_v13 = vpack.c.bf16 %v2178_v41, %v2178_v41  ;;  %v2176_v43 = vadd.f32 %v3568_v5, %v2137_v42  ;;  %v2142_v44 = vmax.f32 %v1788_v12, %v2964_v20  ;;  %v1786_v2 = vmax.f32 %v1432_v61, %v1707_v30  ;;  %v3757_v20 = vld [vmem:[#allocation4_spill] sm:$0xff]  ;;  %v3758_v62 = vld [vmem:[#allocation3_spill] sm:$0xff] }
 0x176   : > { %v2923_v22 = vpop.f32.mrf.mxu0  ;;  %v2965_v31 = vpop.f32.mrf.mxu1  ;;  %v1443_v41 = vmax.f32 %v3758_v62, %v3757_v20 }
 0x177   : > { %2339 = vst.msk [vmem:[%s3580_s22 + $0x3c] sm:$0xf] %vm2323_vm3, %v2709_v13  ;;  %v2707_v32 = vpack.c.bf16 %v2176_v43, %v2176_v43  ;;  %v2181_v45 = vadd.f32 %v3568_v5, %v2142_v44  ;;  %v2140_v46 = vmax.f32 %v1786_v2, %v2061_v1  ;;  %v1789_v14 = vmax.f32 %v1435_v29, %v2923_v22  ;;  %v3759_v1 = vld [vmem:[#allocation6_spill] sm:$0xff]  ;;  %v3760_v13 = vld [vmem:[#allocation5_spill] sm:$0xff] }
 0x178   : > { %v1710_v15 = vpop.f32.mrf.mxu0  ;;  %v2064_v16 = vpop.f32.mrf.mxu1  ;;  %v1441_v43 = vmax.f32 %v3760_v13, %v3759_v1 }
 0x179   : > { %2337 = vst.msk [vmem:[%s3580_s22 + $0x34] sm:$0xf] %vm2323_vm3, %v2707_v32  ;;  %v2712_v0 = vpack.c.bf16 %v2181_v45, %v2181_v45  ;;  %v2179_v47 = vadd.f32 %v3568_v5, %v2140_v46  ;;  %v2143_v48 = vmax.f32 %v1789_v14, %v2965_v31  ;;  %v1787_v33 = vmax.f32 %v1433_v21, %v1710_v15  ;;  %v3761_v45 = vld [vmem:[#allocation8_spill] sm:$0xff]  ;;  %v3762_v46 = vld [vmem:[#allocation7_spill] sm:$0xff] }
 0x17a   : > { %v2926_v23 = vpop.f32.mrf.mxu0  ;;  %v2968_v24 = vpop.f32.mrf.mxu1  ;;  %v1446_v14 = vmax.f32 %v3762_v46, %v3761_v45 }
 0x17b   : > { %2342 = vst.msk [vmem:[%s3580_s22 + $0x48] sm:$0xf] %vm2323_vm3, %v2712_v0  ;;  %v2710_v3 = vpack.c.bf16 %v2179_v47, %v2179_v47  ;;  %v2182_v49 = vadd.f32 %v3568_v5, %v2143_v48  ;;  %v2141_v50 = vmax.f32 %v1787_v33, %v2064_v16  ;;  %v1792_v4 = vmax.f32 %v1438_v63, %v2926_v23  ;;  %v3763_v33 = vld [vmem:[#allocation10_spill] sm:$0xff] }
 0x17c   : > { %v1723_v35 = vpop.f32.mrf.mxu0  ;;  %v2077_v36 = vpop.f32.mrf.mxu1 }
 0x17d   : > { %2340 = vst.msk [vmem:[%s3580_s22 + $0x40] sm:$0xf] %vm2323_vm3, %v2710_v3  ;;  %v2713_v18 = vpack.c.bf16 %v2182_v49, %v2182_v49  ;;  %v2180_v51 = vadd.f32 %v3568_v5, %v2141_v50  ;;  %v2146_v52 = vmax.f32 %v1792_v4, %v2968_v24  ;;  %v1790_v6 = vmax.f32 %v1436_v34, %v1723_v35  ;;  %v3764_v34 = vld [vmem:[#allocation9_spill] sm:$0xff]  ;;  %v3765_v35 = vld [vmem:[#allocation12_spill] sm:$0xff] }
 0x17e   : > { %v2927_v26 = vpop.f32.mrf.mxu0  ;;  %v2969_v7 = vpop.f32.mrf.mxu1  ;;  %v1444_v23 = vmax.f32 %v3764_v34, %v3763_v33 }
 0x17f   : > { %2343 = vst.msk [vmem:[%s3580_s22 + $0x4c] sm:$0xf] %vm2323_vm3, %v2713_v18  ;;  %v2711_v37 = vpack.c.bf16 %v2180_v51, %v2180_v51  ;;  %v2185_v53 = vadd.f32 %v3568_v5, %v2146_v52  ;;  %v2144_v54 = vmax.f32 %v1790_v6, %v2077_v36  ;;  %v1793_v38 = vmax.f32 %v1439_v17, %v2927_v26  ;;  %v3766_v36 = vld [vmem:[#allocation11_spill] sm:$0xff] }
 0x180   : > { %v1726_v9 = vpop.f32.mrf.mxu0  ;;  %v2080_v10 = vpop.f32.mrf.mxu1  ;;  %v1447_v18 = vmax.f32 %v3766_v36, %v3765_v35 }
 0x181   : > { %2341 = vst.msk [vmem:[%s3580_s22 + $0x44] sm:$0xf] %vm2323_vm3, %v2711_v37  ;;  %v2716_v11 = vpack.c.bf16 %v2185_v53, %v2185_v53  ;;  %v2183_v55 = vadd.f32 %v3568_v5, %v2144_v54  ;;  %v2147_v56 = vmax.f32 %v1793_v38, %v2969_v7  ;;  %v1791_v27 = vmax.f32 %v1437_v25, %v1726_v9  ;;  %v3767_v37 = vld [vmem:[#allocation14_spill] sm:$0xff]  ;;  %v3768_v53 = vld [vmem:[#allocation13_spill] sm:$0xff] }
 0x182   : > { %v2930_v40 = vpop.f32.mrf.mxu0  ;;  %v2972_v28 = vpop.f32.mrf.mxu1  ;;  %v1445_v54 = vmax.f32 %v3768_v53, %v3767_v37 }
 0x183   : > { %2346 = vst.msk [vmem:[%s3580_s22 + $0x58] sm:$0xf] %vm2323_vm3, %v2716_v11  ;;  %v2714_v61 = vpack.c.bf16 %v2183_v55, %v2183_v55  ;;  %v2186_v57 = vadd.f32 %v3568_v5, %v2147_v56  ;;  %v2145_v58 = vmax.f32 %v1791_v27, %v2080_v10  ;;  %v1796_v19 = vmax.f32 %v1442_v8, %v2930_v40 }
 0x184   : > { %v1739_v42 = vpop.f32.mrf.mxu0  ;;  %v2093_v12 = vpop.f32.mrf.mxu1 }
 0x185   : > { %2344 = vst.msk [vmem:[%s3580_s22 + $0x50] sm:$0xf] %vm2323_vm3, %v2714_v61  ;;  %v2717_v29 = vpack.c.bf16 %v2186_v57, %v2186_v57  ;;  %v2184_v59 = vadd.f32 %v3568_v5, %v2145_v58  ;;  %v2150_v60 = vmax.f32 %v1796_v19, %v2972_v28  ;;  %v1794_v30 = vmax.f32 %v1440_v39, %v1739_v42 }
 0x186   : > { %v2931_v44 = vpop.f32.mrf.mxu0  ;;  %v2973_v2 = vpop.f32.mrf.mxu1 }
 0x187   : > { %2347 = vst.msk [vmem:[%s3580_s22 + $0x5c] sm:$0xf] %vm2323_vm3, %v2717_v29  ;;  %v2715_v21 = vpack.c.bf16 %v2184_v59, %v2184_v59  ;;  %v2189_v22 = vadd.f32 %v3568_v5, %v2150_v60  ;;  %v2148_v31 = vmax.f32 %v1794_v30, %v2093_v12  ;;  %v1797_v32 = vmax.f32 %v1443_v41, %v2931_v44 }
 0x188   : > { %v1742_v63 = vpop.f32.mrf.mxu0  ;;  %v2096_v15 = vpop.f32.mrf.mxu1 }
 0x189   : > { %2345 = vst.msk [vmem:[%s3580_s22 + $0x54] sm:$0xf] %vm2323_vm3, %v2715_v21  ;;  %v2720_v16 = vpack.c.bf16 %v2189_v22, %v2189_v22  ;;  %v2187_v0 = vadd.f32 %v3568_v5, %v2148_v31  ;;  %v2151_v47 = vmax.f32 %v1797_v32, %v2973_v2  ;;  %v1795_v48 = vmax.f32 %v1441_v43, %v1742_v63 }
 0x18a   : > { %v2934_v24 = vpop.f32.mrf.mxu0  ;;  %v2976_v3 = vpop.f32.mrf.mxu1 }
 0x18b   : > { %2350 = vst.msk [vmem:[%s3580_s22 + $0x68] sm:$0xf] %vm2323_vm3, %v2720_v16  ;;  %v2718_v49 = vpack.c.bf16 %v2187_v0, %v2187_v0  ;;  %v2190_v50 = vadd.f32 %v3568_v5, %v2151_v47  ;;  %v2149_v4 = vmax.f32 %v1795_v48, %v2096_v15  ;;  %v1800_v17 = vmax.f32 %v1446_v14, %v2934_v24 }
 0x18c   : > { %v1755_v51 = vpop.f32.mrf.mxu0  ;;  %v2109_v52 = vpop.f32.mrf.mxu1 }
 0x18d   : > { %2348 = vst.msk [vmem:[%s3580_s22 + $0x60] sm:$0xf] %vm2323_vm3, %v2718_v49  ;;  %v2721_v6 = vpack.c.bf16 %v2190_v50, %v2190_v50  ;;  %v2188_v25 = vadd.f32 %v3568_v5, %v2149_v4  ;;  %v2154_v26 = vmax.f32 %v1800_v17, %v2976_v3  ;;  %v1798_v7 = vmax.f32 %v1444_v23, %v1755_v51 }
 0x18e   : > { %v2935_v38 = vpop.f32.mrf.mxu0  ;;  %v2977_v8 = vpop.f32.mrf.mxu1 }
 0x18f   : > { %2351 = vst.msk [vmem:[%s3580_s22 + $0x6c] sm:$0xf] %vm2323_vm3, %v2721_v6  ;;  %v2719_v9 = vpack.c.bf16 %v2188_v25, %v2188_v25  ;;  %v2193_v10 = vadd.f32 %v3568_v5, %v2154_v26  ;;  %v2152_v11 = vmax.f32 %v1798_v7, %v2109_v52  ;;  %v1801_v55 = vmax.f32 %v1447_v18, %v2935_v38 }
 0x190   : > { %v1758_v56 = vpop.f32.mrf.mxu0  ;;  %v2112_v61 = vpop.f32.mrf.mxu1 }
 0x191   : > { %2349 = vst.msk [vmem:[%s3580_s22 + $0x64] sm:$0xf] %vm2323_vm3, %v2719_v9  ;;  %v2724_v27 = vpack.c.bf16 %v2193_v10, %v2193_v10  ;;  %v2191_v39 = vadd.f32 %v3568_v5, %v2152_v11  ;;  %v2155_v40 = vmax.f32 %v1801_v55, %v2977_v8  ;;  %v1799_v28 = vmax.f32 %v1445_v54, %v1758_v56 }
 0x193   : > { %2354 = vst.msk [vmem:[%s3580_s22 + $0x78] sm:$0xf] %vm2323_vm3, %v2724_v27  ;;  %v2722_v57 = vpack.c.bf16 %v2191_v39, %v2191_v39  ;;  %v2194_v58 = vadd.f32 %v3568_v5, %v2155_v40  ;;  %v2153_v19 = vmax.f32 %v1799_v28, %v2112_v61 }
 0x195   : > { %2352 = vst.msk [vmem:[%s3580_s22 + $0x70] sm:$0xf] %vm2323_vm3, %v2722_v57  ;;  %v2725_v20 = vpack.c.bf16 %v2194_v58, %v2194_v58  ;;  %v2192_v62 = vadd.f32 %v3568_v5, %v2153_v19 }
 0x197   : > { %2355 = vst.msk [vmem:[%s3580_s22 + $0x7c] sm:$0xf] %vm2323_vm3, %v2725_v20  ;;  %v2723_v41 = vpack.c.bf16 %v2192_v62, %v2192_v62 }
 0x199   : > { %2353 = vst.msk [vmem:[%s3580_s22 + $0x74] sm:$0xf] %vm2323_vm3, %v2723_v41 }
 0x19a PF: > { %p10_p9 = scmp.ge.s32.totalorder %s3134_s16, 4   ;;  %s3769_s12 = smov %s3090_s13 }
 0x19b   : > { %s3770_s13 = smov %s3143_s19  ;;  %s3771_s14 = smov %s3134_s16 }
 0x19c   :  { %12 = sbr.rel (!%p10_p9) target bundleno = 2 (0x2), region = 111 }

// kernel: net_forward.5
= control target key start
LH: loop header
LB: loop body
LE: loop exit
PB: predicated region body
PF: predicated region fallthrough
CT: control target
= control target key end

     0   :  { %s4037_s12 = smov 0   ;;  %s4039_s13 = smov 0   ;;  %s5203_s0 = inlined_call_operand.vmem [shape: bf16[4,128,800], index: 0, kind: input, shape index: {}]   ;;  %s5204_s1 = inlined_call_operand.vmem [shape: bf16[800,32], index: 1, kind: input, shape index: {}]   ;;  %s5205_s2 = inlined_call_operand.vmem [shape: f32[1,32], index: 2, kind: input, shape index: {}]   ;;  %s5206_s3 = inlined_call_operand.vmem [shape: bf16[128,32], index: 3, kind: output, shape index: {}]  }
   0x1   :  { %s4041_s14 = smov 0  }
   0x2 LB: > { %s2785_s15 = sadd.s32 4294967295, %s4015_s14   ;;  %s4054_s16 = sadd.s32 1, %s4015_s14   ;;  %s4015_s14 = sphi %s4041_s14, %s5209_s14   ;;  %s4011_s13 = sphi %s4039_s13, %s5208_s13   ;;  %s4007_s12 = sphi %s4037_s12, %s5207_s12  }
   0x3   : > { %s17_s17 = ssub.s32 %s4015_s14, %s4054_s16  ;;  %s20_s18 = sadd.s32 1, %s4011_s13 }
   0x4   : > { %p18_p0 = scmp.eq.s32.totalorder %s17_s17, 0  ;;  %p27_p1 = scmp.ne.s32.totalorder %s4011_s13, %s4007_s12 }
   0x5   : > { %p28_p2 = scmp.eq.s32.totalorder %s4015_s14, 0  ;;  %p2788_p4 = scmp.ge.s32.totalorder %s4015_s14, 2 }
   0x6   : > { %s4063_s19 = scalar_select %p18_p0, %s4011_s13, %s20_s18  }
   0x7   : > { %p29_p3 = por %p28_p2, %p27_p1  ;;  %127 = sbr.rel (%p2788_p4) target bundleno = 86 (0x56), region = 24 }
   0xc   : > { %130 = sbr.rel (!%p29_p3) target bundleno = 86 (0x56), region = 28  ;;  %s132_s20 = sand.u32 (%p29_p3), 1, %s4011_s13  }
   0xd   : > { %s3721_s21 = smul.u32 (%p29_p3), 224, %s4015_s14 }
   0xe   : > { %s3720_s22 = smul.u32 (%p29_p3), 896, %s132_s20 }
   0xf   : > { %s4071_s25 = scalar_lea.vmem (%p29_p3), %s5203_s0, %s3721_s21 }
  0x10   : > { %v153_v0 = vld [vmem:[%s4071_s25] sm:$0xff] (%p29_p3)  ;;  %v155_v1 = vld [vmem:[%s4071_s25 + $0x8] sm:$0xff] (%p29_p3)  ;;  %v157_v2 = vld [vmem:[%s4071_s25 + $0x10] sm:$0xff] (%p29_p3)  ;;  %s4076_s26 = scalar_lea.vmem (%p29_p3), [#allocation2], %s3720_s22 }
  0x11   : > { %154 = vst [vmem:[%s4076_s26] sm:$0xff] %v153_v0  ;;  %156 = vst [vmem:[%s4076_s26 + $0x8] sm:$0xff] %v155_v1  ;;  %v159_v3 = vld [vmem:[%s4071_s25 + $0x1c] sm:$0xff]  ;;  %v161_v4 = vld [vmem:[%s4071_s25 + $0x24] sm:$0xff] }
  0x12   : > { %158 = vst [vmem:[%s4076_s26 + $0x10] sm:$0xff] %v157_v2  ;;  %v163_v5 = vld [vmem:[%s4071_s25 + $0x2c] sm:$0xff]  ;;  %160 = vst [vmem:[%s4076_s26 + $0x1c] sm:$0xff] %v159_v3  ;;  %v165_v6 = vld [vmem:[%s4071_s25 + $0x38] sm:$0xff] }
  0x13   : > { %162 = vst [vmem:[%s4076_s26 + $0x24] sm:$0xff] %v161_v4  ;;  %164 = vst [vmem:[%s4076_s26 + $0x2c] sm:$0xff] %v163_v5  ;;  %v167_v7 = vld [vmem:[%s4071_s25 + $0x40] sm:$0xff]  ;;  %v169_v8 = vld [vmem:[%s4071_s25 + $0x48] sm:$0xff] }
  0x14   : > { %166 = vst [vmem:[%s4076_s26 + $0x38] sm:$0xff] %v165_v6  ;;  %168 = vst [vmem:[%s4076_s26 + $0x40] sm:$0xff] %v167_v7  ;;  %v171_v9 = vld [vmem:[%s4071_s25 + $0x54] sm:$0xff]  ;;  %v173_v10 = vld [vmem:[%s4071_s25 + $0x5c] sm:$0xff] }
  0x15   : > { %170 = vst [vmem:[%s4076_s26 + $0x48] sm:$0xff] %v169_v8  ;;  %v175_v11 = vld [vmem:[%s4071_s25 + $0x64] sm:$0xff]  ;;  %172 = vst [vmem:[%s4076_s26 + $0x54] sm:$0xff] %v171_v9  ;;  %v177_v12 = vld [vmem:[%s4071_s25 + $0x70] sm:$0xff] }
  0x16   : > { %174 = vst [vmem:[%s4076_s26 + $0x5c] sm:$0xff] %v173_v10  ;;  %176 = vst [vmem:[%s4076_s26 + $0x64] sm:$0xff] %v175_v11  ;;  %v179_v13 = vld [vmem:[%s4071_s25 + $0x78] sm:$0xff]  ;;  %v181_v14 = vld [vmem:[%s4071_s25 + $0x80] sm:$0xff] }
  0x17   : > { %178 = vst [vmem:[%s4076_s26 + $0x70] sm:$0xff] %v177_v12  ;;  %180 = vst [vmem:[%s4076_s26 + $0x78] sm:$0xff] %v179_v13  ;;  %v183_v15 = vld [vmem:[%s4071_s25 + $0x8c] sm:$0xff]  ;;  %v185_v16 = vld [vmem:[%s4071_s25 + $0x94] sm:$0xff] }
  0x18   : > { %182 = vst [vmem:[%s4076_s26 + $0x80] sm:$0xff] %v181_v14  ;;  %v187_v17 = vld [vmem:[%s4071_s25 + $0x9c] sm:$0xff]  ;;  %184 = vst [vmem:[%s4076_s26 + $0x8c] sm:$0xff] %v183_v15  ;;  %v189_v18 = vld [vmem:[%s4071_s25 + $0xa8] sm:$0xff] }
  0x19   : > { %186 = vst [vmem:[%s4076_s26 + $0x94] sm:$0xff] %v185_v16  ;;  %188 = vst [vmem:[%s4076_s26 + $0x9c] sm:$0xff] %v187_v17  ;;  %v191_v19 = vld [vmem:[%s4071_s25 + $0xb0] sm:$0xff]  ;;  %v193_v20 = vld [vmem:[%s4071_s25 + $0xb8] sm:$0xff] }
  0x1a   : > { %190 = vst [vmem:[%s4076_s26 + $0xa8] sm:$0xff] %v189_v18  ;;  %192 = vst [vmem:[%s4076_s26 + $0xb0] sm:$0xff] %v191_v19  ;;  %v195_v21 = vld [vmem:[%s4071_s25 + $0xc4] sm:$0xff]  ;;  %v197_v22 = vld [vmem:[%s4071_s25 + $0xcc] sm:$0xff] }
  0x1b   : > { %194 = vst [vmem:[%s4076_s26 + $0xb8] sm:$0xff] %v193_v20  ;;  %v199_v23 = vld [vmem:[%s4071_s25 + $0xd4] sm:$0xff]  ;;  %196 = vst [vmem:[%s4076_s26 + $0xc4] sm:$0xff] %v195_v21  ;;  %v201_v24 = vld [vmem:[%s4071_s25 + $0x1c0] sm:$0xff] }
  0x1c   : > { %198 = vst [vmem:[%s4076_s26 + $0xcc] sm:$0xff] %v197_v22  ;;  %200 = vst [vmem:[%s4076_s26 + $0xd4] sm:$0xff] %v199_v23  ;;  %v203_v25 = vld [vmem:[%s4071_s25 + $0x1c8] sm:$0xff]  ;;  %v205_v26 = vld [vmem:[%s4071_s25 + $0x1d0] sm:$0xff] }
  0x1d   : > { %202 = vst [vmem:[%s4076_s26 + $0xe0] sm:$0xff] %v201_v24  ;;  %204 = vst [vmem:[%s4076_s26 + $0xe8] sm:$0xff] %v203_v25  ;;  %v207_v27 = vld [vmem:[%s4071_s25 + $0x1dc] sm:$0xff]  ;;  %v209_v28 = vld [vmem:[%s4071_s25 + $0x1e4] sm:$0xff] }
  0x1e   : > { %206 = vst [vmem:[%s4076_s26 + $0xf0] sm:$0xff] %v205_v26  ;;  %v211_v29 = vld [vmem:[%s4071_s25 + $0x1ec] sm:$0xff]  ;;  %208 = vst [vmem:[%s4076_s26 + $0xfc] sm:$0xff] %v207_v27  ;;  %v213_v30 = vld [vmem:[%s4071_s25 + $0x1f8] sm:$0xff] }
  0x1f   : > { %210 = vst [vmem:[%s4076_s26 + $0x104] sm:$0xff] %v209_v28  ;;  %212 = vst [vmem:[%s4076_s26 + $0x10c] sm:$0xff] %v211_v29  ;;  %v215_v31 = vld [vmem:[%s4071_s25 + $0x200] sm:$0xff]  ;;  %v217_v32 = vld [vmem:[%s4071_s25 + $0x208] sm:$0xff] }
  0x20   : > { %214 = vst [vmem:[%s4076_s26 + $0x118] sm:$0xff] %v213_v30  ;;  %216 = vst [vmem:[%s4076_s26 + $0x120] sm:$0xff] %v215_v31  ;;  %v219_v33 = vld [vmem:[%s4071_s25 + $0x214] sm:$0xff]  ;;  %v221_v34 = vld [vmem:[%s4071_s25 + $0x21c] sm:$0xff] }
  0x21   : > { %218 = vst [vmem:[%s4076_s26 + $0x128] sm:$0xff] %v217_v32  ;;  %v223_v35 = vld [vmem:[%s4071_s25 + $0x224] sm:$0xff]  ;;  %220 = vst [vmem:[%s4076_s26 + $0x134] sm:$0xff] %v219_v33  ;;  %v225_v36 = vld [vmem:[%s4071_s25 + $0x230] sm:$0xff] }
  0x22   : > { %222 = vst [vmem:[%s4076_s26 + $0x13c] sm:$0xff] %v221_v34  ;;  %224 = vst [vmem:[%s4076_s26 + $0x144] sm:$0xff] %v223_v35  ;;  %v227_v37 = vld [vmem:[%s4071_s25 + $0x238] sm:$0xff]  ;;  %v229_v38 = vld [vmem:[%s4071_s25 + $0x240] sm:$0xff] }
  0x23   : > { %226 = vst [vmem:[%s4076_s26 + $0x150] sm:$0xff] %v225_v36  ;;  %228 = vst [vmem:[%s4076_s26 + $0x158] sm:$0xff] %v227_v37  ;;  %v231_v39 = vld [vmem:[%s4071_s25 + $0x24c] sm:$0xff]  ;;  %v233_v40 = vld [vmem:[%s4071_s25 + $0x254] sm:$0xff] }
  0x24   : > { %230 = vst [vmem:[%s4076_s26 + $0x160] sm:$0xff] %v229_v38  ;;  %v235_v41 = vld [vmem:[%s4071_s25 + $0x25c] sm:$0xff]  ;;  %232 = vst [vmem:[%s4076_s26 + $0x16c] sm:$0xff] %v231_v39  ;;  %v237_v42 = vld [vmem:[%s4071_s25 + $0x268] sm:$0xff] }
  0x25   : > { %234 = vst [vmem:[%s4076_s26 + $0x174] sm:$0xff] %v233_v40  ;;  %236 = vst [vmem:[%s4076_s26 + $0x17c] sm:$0xff] %v235_v41  ;;  %v239_v43 = vld [vmem:[%s4071_s25 + $0x270] sm:$0xff]  ;;  %v241_v44 = vld [vmem:[%s4071_s25 + $0x278] sm:$0xff] }
  0x26   : > { %238 = vst [vmem:[%s4076_s26 + $0x188] sm:$0xff] %v237_v42  ;;  %240 = vst [vmem:[%s4076_s26 + $0x190] sm:$0xff] %v239_v43  ;;  %v243_v45 = vld [vmem:[%s4071_s25 + $0x284] sm:$0xff]  ;;  %v245_v46 = vld [vmem:[%s4071_s25 + $0x28c] sm:$0xff] }
  0x27   : > { %242 = vst [vmem:[%s4076_s26 + $0x198] sm:$0xff] %v241_v44  ;;  %v247_v47 = vld [vmem:[%s4071_s25 + $0x294] sm:$0xff]  ;;  %244 = vst [vmem:[%s4076_s26 + $0x1a4] sm:$0xff] %v243_v45  ;;  %v249_v48 = vld [vmem:[%s4071_s25 + $0x380] sm:$0xff] }
  0x28   : > { %246 = vst [vmem:[%s4076_s26 + $0x1ac] sm:$0xff] %v245_v46  ;;  %248 = vst [vmem:[%s4076_s26 + $0x1b4] sm:$0xff] %v247_v47  ;;  %v251_v49 = vld [vmem:[%s4071_s25 + $0x388] sm:$0xff]  ;;  %v253_v50 = vld [vmem:[%s4071_s25 + $0x390] sm:$0xff] }
  0x29   : > { %250 = vst [vmem:[%s4076_s26 + $0x1c0] sm:$0xff] %v249_v48  ;;  %252 = vst [vmem:[%s4076_s26 + $0x1c8] sm:$0xff] %v251_v49  ;;  %v255_v51 = vld [vmem:[%s4071_s25 + $0x39c] sm:$0xff]  ;;  %v257_v52 = vld [vmem:[%s4071_s25 + $0x3a4] sm:$0xff] }
  0x2a   : > { %254 = vst [vmem:[%s4076_s26 + $0x1d0] sm:$0xff] %v253_v50  ;;  %v259_v53 = vld [vmem:[%s4071_s25 + $0x3ac] sm:$0xff]  ;;  %256 = vst [vmem:[%s4076_s26 + $0x1dc] sm:$0xff] %v255_v51  ;;  %v261_v54 = vld [vmem:[%s4071_s25 + $0x3b8] sm:$0xff] }
  0x2b   : > { %258 = vst [vmem:[%s4076_s26 + $0x1e4] sm:$0xff] %v257_v52  ;;  %260 = vst [vmem:[%s4076_s26 + $0x1ec] sm:$0xff] %v259_v53  ;;  %v263_v55 = vld [vmem:[%s4071_s25 + $0x3c0] sm:$0xff]  ;;  %v265_v56 = vld [vmem:[%s4071_s25 + $0x3c8] sm:$0xff] }
  0x2c   : > { %262 = vst [vmem:[%s4076_s26 + $0x1f8] sm:$0xff] %v261_v54  ;;  %264 = vst [vmem:[%s4076_s26 + $0x200] sm:$0xff] %v263_v55  ;;  %v267_v57 = vld [vmem:[%s4071_s25 + $0x3d4] sm:$0xff]  ;;  %v269_v58 = vld [vmem:[%s4071_s25 + $0x3dc] sm:$0xff] }
  0x2d   : > { %266 = vst [vmem:[%s4076_s26 + $0x208] sm:$0xff] %v265_v56  ;;  %v271_v59 = vld [vmem:[%s4071_s25 + $0x3e4] sm:$0xff]  ;;  %268 = vst [vmem:[%s4076_s26 + $0x214] sm:$0xff] %v267_v57  ;;  %v273_v60 = vld [vmem:[%s4071_s25 + $0x3f0] sm:$0xff] }
  0x2e   : > { %270 = vst [vmem:[%s4076_s26 + $0x21c] sm:$0xff] %v269_v58  ;;  %272 = vst [vmem:[%s4076_s26 + $0x224] sm:$0xff] %v271_v59  ;;  %v275_v61 = vld [vmem:[%s4071_s25 + $0x3f8] sm:$0xff]  ;;  %v277_v62 = vld [vmem:[%s4071_s25 + $0x400] sm:$0xff] }
  0x2f   : > { %274 = vst [vmem:[%s4076_s26 + $0x230] sm:$0xff] %v273_v60  ;;  %276 = vst [vmem:[%s4076_s26 + $0x238] sm:$0xff] %v275_v61  ;;  %v279_v63 = vld [vmem:[%s4071_s25 + $0x40c] sm:$0xff]  ;;  %v281_v0 = vld [vmem:[%s4071_s25 + $0x414] sm:$0xff] }
  0x30   : > { %278 = vst [vmem:[%s4076_s26 + $0x240] sm:$0xff] %v277_v62  ;;  %v283_v1 = vld [vmem:[%s4071_s25 + $0x41c] sm:$0xff]  ;;  %280 = vst [vmem:[%s4076_s26 + $0x24c] sm:$0xff] %v279_v63  ;;  %v285_v2 = vld [vmem:[%s4071_s25 + $0x428] sm:$0xff] }
  0x31   : > { %282 = vst [vmem:[%s4076_s26 + $0x254] sm:$0xff] %v281_v0  ;;  %284 = vst [vmem:[%s4076_s26 + $0x25c] sm:$0xff] %v283_v1  ;;  %v287_v3 = vld [vmem:[%s4071_s25 + $0x430] sm:$0xff]  ;;  %v289_v4 = vld [vmem:[%s4071_s25 + $0x438] sm:$0xff] }
  0x32   : > { %286 = vst [vmem:[%s4076_s26 + $0x268] sm:$0xff] %v285_v2  ;;  %288 = vst [vmem:[%s4076_s26 + $0x270] sm:$0xff] %v287_v3  ;;  %v291_v5 = vld [vmem:[%s4071_s25 + $0x444] sm:$0xff]  ;;  %v293_v6 = vld [vmem:[%s4071_s25 + $0x44c] sm:$0xff] }
  0x33   : > { %290 = vst [vmem:[%s4076_s26 + $0x278] sm:$0xff] %v289_v4  ;;  %v295_v7 = vld [vmem:[%s4071_s25 + $0x454] sm:$0xff]  ;;  %292 = vst [vmem:[%s4076_s26 + $0x284] sm:$0xff] %v291_v5  ;;  %v297_v8 = vld [vmem:[%s4071_s25 + $0x540] sm:$0xff] }
  0x34   : > { %294 = vst [vmem:[%s4076_s26 + $0x28c] sm:$0xff] %v293_v6  ;;  %296 = vst [vmem:[%s4076_s26 + $0x294] sm:$0xff] %v295_v7  ;;  %v299_v9 = vld [vmem:[%s4071_s25 + $0x548] sm:$0xff]  ;;  %v301_v10 = vld [vmem:[%s4071_s25 + $0x550] sm:$0xff] }
  0x35   : > { %298 = vst [vmem:[%s4076_s26 + $0x2a0] sm:$0xff] %v297_v8  ;;  %300 = vst [vmem:[%s4076_s26 + $0x2a8] sm:$0xff] %v299_v9  ;;  %v303_v11 = vld [vmem:[%s4071_s25 + $0x55c] sm:$0xff]  ;;  %v305_v12 = vld [vmem:[%s4071_s25 + $0x564] sm:$0xff] }
  0x36   : > { %302 = vst [vmem:[%s4076_s26 + $0x2b0] sm:$0xff] %v301_v10  ;;  %v307_v13 = vld [vmem:[%s4071_s25 + $0x56c] sm:$0xff]  ;;  %304 = vst [vmem:[%s4076_s26 + $0x2bc] sm:$0xff] %v303_v11  ;;  %v309_v14 = vld [vmem:[%s4071_s25 + $0x578] sm:$0xff] }
  0x37   : > { %306 = vst [vmem:[%s4076_s26 + $0x2c4] sm:$0xff] %v305_v12  ;;  %308 = vst [vmem:[%s4076_s26 + $0x2cc] sm:$0xff] %v307_v13  ;;  %v311_v15 = vld [vmem:[%s4071_s25 + $0x580] sm:$0xff]  ;;  %v313_v16 = vld [vmem:[%s4071_s25 + $0x588] sm:$0xff] }
  0x38   : > { %310 = vst [vmem:[%s4076_s26 + $0x2d8] sm:$0xff] %v309_v14  ;;  %312 = vst [vmem:[%s4076_s26 + $0x2e0] sm:$0xff] %v311_v15  ;;  %v315_v17 = vld [vmem:[%s4071_s25 + $0x594] sm:$0xff]  ;;  %v317_v18 = vld [vmem:[%s4071_s25 + $0x59c] sm:$0xff] }
  0x39   : > { %314 = vst [vmem:[%s4076_s26 + $0x2e8] sm:$0xff] %v313_v16  ;;  %v319_v19 = vld [vmem:[%s4071_s25 + $0x5a4] sm:$0xff]  ;;  %316 = vst [vmem:[%s4076_s26 + $0x2f4] sm:$0xff] %v315_v17  ;;  %v321_v20 = vld [vmem:[%s4071_s25 + $0x5b0] sm:$0xff] }
  0x3a   : > { %318 = vst [vmem:[%s4076_s26 + $0x2fc] sm:$0xff] %v317_v18  ;;  %320 = vst [vmem:[%s4076_s26 + $0x304] sm:$0xff] %v319_v19  ;;  %v323_v21 = vld [vmem:[%s4071_s25 + $0x5b8] sm:$0xff]  ;;  %v325_v22 = vld [vmem:[%s4071_s25 + $0x5c0] sm:$0xff] }
  0x3b   : > { %322 = vst [vmem:[%s4076_s26 + $0x310] sm:$0xff] %v321_v20  ;;  %324 = vst [vmem:[%s4076_s26 + $0x318] sm:$0xff] %v323_v21  ;;  %v327_v23 = vld [vmem:[%s4071_s25 + $0x5cc] sm:$0xff]  ;;  %v329_v24 = vld [vmem:[%s4071_s25 + $0x5d4] sm:$0xff] }
  0x3c   : > { %326 = vst [vmem:[%s4076_s26 + $0x320] sm:$0xff] %v325_v22  ;;  %v331_v25 = vld [vmem:[%s4071_s25 + $0x5dc] sm:$0xff]  ;;  %328 = vst [vmem:[%s4076_s26 + $0x32c] sm:$0xff] %v327_v23  ;;  %v333_v26 = vld [vmem:[%s4071_s25 + $0x5e8] sm:$0xff] }
  0x3d   : > { %330 = vst [vmem:[%s4076_s26 + $0x334] sm:$0xff] %v329_v24  ;;  %332 = vst [vmem:[%s4076_s26 + $0x33c] sm:$0xff] %v331_v25  ;;  %v335_v27 = vld [vmem:[%s4071_s25 + $0x5f0] sm:$0xff]  ;;  %v337_v28 = vld [vmem:[%s4071_s25 + $0x5f8] sm:$0xff] }
  0x3e   : > { %334 = vst [vmem:[%s4076_s26 + $0x348] sm:$0xff] %v333_v26  ;;  %336 = vst [vmem:[%s4076_s26 + $0x350] sm:$0xff] %v335_v27  ;;  %v339_v29 = vld [vmem:[%s4071_s25 + $0x604] sm:$0xff]  ;;  %v341_v30 = vld [vmem:[%s4071_s25 + $0x60c] sm:$0xff] }
  0x3f   : > { %338 = vst [vmem:[%s4076_s26 + $0x358] sm:$0xff] %v337_v28  ;;  %v343_v31 = vld [vmem:[%s4071_s25 + $0x614] sm:$0xff]  ;;  %340 = vst [vmem:[%s4076_s26 + $0x364] sm:$0xff] %v339_v29  ;;  %v2796_v34 = vld [vmem:[%s4071_s25 + $0x50] sm:$0xf] }
  0x40   : > { %342 = vst [vmem:[%s4076_s26 + $0x36c] sm:$0xff] %v341_v30  ;;  %344 = vst [vmem:[%s4076_s26 + $0x374] sm:$0xff] %v343_v31  ;;  %v2792_v32 = vld [vmem:[%s4071_s25 + $0x18] sm:$0xf]  ;;  %v2794_v33 = vld [vmem:[%s4071_s25 + $0x34] sm:$0xf] }
  0x41   : > { %2793 = vst [vmem:[%s4076_s26 + $0x18] sm:$0xf] %v2792_v32  ;;  %2795 = vst [vmem:[%s4076_s26 + $0x34] sm:$0xf] %v2794_v33  ;;  %v2798_v35 = vld [vmem:[%s4071_s25 + $0x6c] sm:$0xf] }
  0x42   : > { %2797 = vst [vmem:[%s4076_s26 + $0x50] sm:$0xf] %v2796_v34  ;;  %v2800_v36 = vld [vmem:[%s4071_s25 + $0x88] sm:$0xf]  ;;  %v2802_v37 = vld [vmem:[%s4071_s25 + $0xa4] sm:$0xf] }
  0x43   : > { %2799 = vst [vmem:[%s4076_s26 + $0x6c] sm:$0xf] %v2798_v35  ;;  %2801 = vst [vmem:[%s4076_s26 + $0x88] sm:$0xf] %v2800_v36  ;;  %v2804_v38 = vld [vmem:[%s4071_s25 + $0xc0] sm:$0xf] }
  0x44   : > { %2803 = vst [vmem:[%s4076_s26 + $0xa4] sm:$0xf] %v2802_v37  ;;  %v2806_v39 = vld [vmem:[%s4071_s25 + $0xdc] sm:$0xf]  ;;  %v2808_v40 = vld [vmem:[%s4071_s25 + $0x1d8] sm:$0xf] }
  0x45   : > { %2805 = vst [vmem:[%s4076_s26 + $0xc0] sm:$0xf] %v2804_v38  ;;  %2807 = vst [vmem:[%s4076_s26 + $0xdc] sm:$0xf] %v2806_v39  ;;  %v2810_v41 = vld [vmem:[%s4071_s25 + $0x1f4] sm:$0xf] }
  0x46   : > { %2809 = vst [vmem:[%s4076_s26 + $0xf8] sm:$0xf] %v2808_v40  ;;  %v2812_v42 = vld [vmem:[%s4071_s25 + $0x210] sm:$0xf]  ;;  %v2814_v43 = vld [vmem:[%s4071_s25 + $0x22c] sm:$0xf] }
  0x47   : > { %2811 = vst [vmem:[%s4076_s26 + $0x114] sm:$0xf] %v2810_v41  ;;  %2813 = vst [vmem:[%s4076_s26 + $0x130] sm:$0xf] %v2812_v42  ;;  %v2816_v44 = vld [vmem:[%s4071_s25 + $0x248] sm:$0xf] }
  0x48   : > { %2815 = vst [vmem:[%s4076_s26 + $0x14c] sm:$0xf] %v2814_v43  ;;  %v2818_v45 = vld [vmem:[%s4071_s25 + $0x264] sm:$0xf]  ;;  %v2820_v46 = vld [vmem:[%s4071_s25 + $0x280] sm:$0xf] }
  0x49   : > { %2817 = vst [vmem:[%s4076_s26 + $0x168] sm:$0xf] %v2816_v44  ;;  %2819 = vst [vmem:[%s4076_s26 + $0x184] sm:$0xf] %v2818_v45  ;;  %v2822_v47 = vld [vmem:[%s4071_s25 + $0x29c] sm:$0xf] }
  0x4a   : > { %2821 = vst [vmem:[%s4076_s26 + $0x1a0] sm:$0xf] %v2820_v46  ;;  %v2824_v48 = vld [vmem:[%s4071_s25 + $0x398] sm:$0xf]  ;;  %v2826_v49 = vld [vmem:[%s4071_s25 + $0x3b4] sm:$0xf] }
  0x4b   : > { %2823 = vst [vmem:[%s4076_s26 + $0x1bc] sm:$0xf] %v2822_v47  ;;  %2825 = vst [vmem:[%s4076_s26 + $0x1d8] sm:$0xf] %v2824_v48  ;;  %v2828_v50 = vld [vmem:[%s4071_s25 + $0x3d0] sm:$0xf] }
  0x4c   : > { %2827 = vst [vmem:[%s4076_s26 + $0x1f4] sm:$0xf] %v2826_v49  ;;  %v2830_v51 = vld [vmem:[%s4071_s25 + $0x3ec] sm:$0xf]  ;;  %v2832_v52 = vld [vmem:[%s4071_s25 + $0x408] sm:$0xf] }
  0x4d   : > { %2829 = vst [vmem:[%s4076_s26 + $0x210] sm:$0xf] %v2828_v50  ;;  %2831 = vst [vmem:[%s4076_s26 + $0x22c] sm:$0xf] %v2830_v51  ;;  %v2834_v53 = vld [vmem:[%s4071_s25 + $0x424] sm:$0xf] }
  0x4e   : > { %2833 = vst [vmem:[%s4076_s26 + $0x248] sm:$0xf] %v2832_v52  ;;  %v2836_v54 = vld [vmem:[%s4071_s25 + $0x440] sm:$0xf]  ;;  %v2838_v55 = vld [vmem:[%s4071_s25 + $0x45c] sm:$0xf] }
  0x4f   : > { %2835 = vst [vmem:[%s4076_s26 + $0x264] sm:$0xf] %v2834_v53  ;;  %2837 = vst [vmem:[%s4076_s26 + $0x280] sm:$0xf] %v2836_v54  ;;  %v2840_v56 = vld [vmem:[%s4071_s25 + $0x558] sm:$0xf] }
  0x50   : > { %2839 = vst [vmem:[%s4076_s26 + $0x29c] sm:$0xf] %v2838_v55  ;;  %v2842_v57 = vld [vmem:[%s4071_s25 + $0x574] sm:$0xf]  ;;  %v2844_v58 = vld [vmem:[%s4071_s25 + $0x590] sm:$0xf] }
  0x51   : > { %2841 = vst [vmem:[%s4076_s26 + $0x2b8] sm:$0xf] %v2840_v56  ;;  %2843 = vst [vmem:[%s4076_s26 + $0x2d4] sm:$0xf] %v2842_v57  ;;  %v2846_v59 = vld [vmem:[%s4071_s25 + $0x5ac] sm:$0xf] }
  0x52   : > { %2845 = vst [vmem:[%s4076_s26 + $0x2f0] sm:$0xf] %v2844_v58  ;;  %v2848_v60 = vld [vmem:[%s4071_s25 + $0x5c8] sm:$0xf]  ;;  %v2850_v61 = vld [vmem:[%s4071_s25 + $0x5e4] sm:$0xf] }
  0x53   : > { %2847 = vst [vmem:[%s4076_s26 + $0x30c] sm:$0xf] %v2846_v59  ;;  %2849 = vst [vmem:[%s4076_s26 + $0x328] sm:$0xf] %v2848_v60  ;;  %v2852_v62 = vld [vmem:[%s4071_s25 + $0x600] sm:$0xf] }
  0x54   : > { %2851 = vst [vmem:[%s4076_s26 + $0x344] sm:$0xf] %v2850_v61  ;;  %v2854_v63 = vld [vmem:[%s4071_s25 + $0x61c] sm:$0xf]  ;;  %2853 = vst [vmem:[%s4076_s26 + $0x360] sm:$0xf] %v2852_v62 }
  0x55   : > { %2855 = vst [vmem:[%s4076_s26 + $0x37c] sm:$0xf] %v2854_v63 }
  0x56 PF: > { %p2856_p5 = scmp.ge.s32.totalorder %s4015_s14, 1  ;;  %p421_p6 = scmp.lt.s32.totalorder %s4015_s14, 3 }
  0x58   : > { %p422_p7 = pnand %p2856_p5, %p421_p6 }
  0x59   : > { %s428_s4 = sand.u32 (!%p422_p7), 1, %s4007_s12  }
  0x5a   : > { %425 = sbr.rel (%p422_p7) target bundleno = 581 (0x245), region = 54 }
  0x5b   : > { %s3722_s12 = smul.u32 (!%p422_p7), 896, %s428_s4 }
  0x5d   : > { %s4525_s29 = scalar_lea.vmem (!%p422_p7), [#allocation2], %s3722_s12 }
  0x5f   : > { %v4336_v0 = vld [vmem:[%s5204_s1 + $0x78] sm:$0xff]   ;;  %v4359_v4 = vld [vmem:[%s5204_s1 + $0x70] sm:$0xff]   ;;  %v4383_v8 = vld [vmem:[%s5204_s1 + $0x68] sm:$0xff]   ;;  %vm1031_vm0 = vcmask 261120   ;;  %vm2710_vm1 = vcmask 257024  }
  0x60   : > { %v4341_v1 = vld [vmem:[%s5204_s1 + $0xf8] sm:$0xff]   ;;  %3152 = vmatprep.subr.bf16.mxu0 %v4336_v0  ;;  %v4365_v5 = vld [vmem:[%s5204_s1 + $0xf0] sm:$0xff]   ;;  %v4389_v9 = vld [vmem:[%s5204_s1 + $0xe8] sm:$0xff]  }
  0x61   : > { %v4347_v2 = vld [vmem:[%s5204_s1 + $0x38] sm:$0xff]   ;;  %3192 = vmatprep.subr.bf16.mxu1 %v4341_v1  ;;  %v4371_v6 = vld [vmem:[%s5204_s1 + $0x30] sm:$0xff]   ;;  %v4395_v10 = vld [vmem:[%s5204_s1 + $0x28] sm:$0xff]  }
  0x62   : > { %v4353_v3 = vld [vmem:[%s5204_s1 + $0xb8] sm:$0xff]   ;;  %3153 = vmatpush3.bf16.msra.mxu0 %v4347_v2  ;;  %v4377_v7 = vld [vmem:[%s5204_s1 + $0xb0] sm:$0xff]   ;;  %v4401_v11 = vld [vmem:[%s5204_s1 + $0xa8] sm:$0xff]  }
  0x63   : > { %3193 = vmatpush3.bf16.msra.mxu1 %v4353_v3  ;;  %3154 = vmatprep.subr.bf16.mxu0 %v4359_v4  ;;  %v4407_v12 = vld [vmem:[%s5204_s1 + $0x60] sm:$0xff]   ;;  %v4431_v16 = vld [vmem:[%s5204_s1 + $0x58] sm:$0xff]   ;;  %v4455_v20 = vld [vmem:[%s5204_s1 + $0x50] sm:$0xff]  }
  0x64   : > { %3194 = vmatprep.subr.bf16.mxu1 %v4365_v5  ;;  %v4413_v13 = vld [vmem:[%s5204_s1 + $0xe0] sm:$0xff]   ;;  %v4437_v17 = vld [vmem:[%s5204_s1 + $0xd8] sm:$0xff]   ;;  %v4461_v21 = vld [vmem:[%s5204_s1 + $0xd0] sm:$0xff]  }
  0x65   : > { %v4419_v14 = vld [vmem:[%s5204_s1 + $0x20] sm:$0xff]   ;;  %v4443_v18 = vld [vmem:[%s5204_s1 + $0x18] sm:$0xff]   ;;  %v4467_v22 = vld [vmem:[%s5204_s1 + $0x10] sm:$0xff]  }
  0x66   : > { %3155 = vmatpush3.bf16.msra.mxu0 %v4371_v6  ;;  %v4425_v15 = vld [vmem:[%s5204_s1 + $0xa0] sm:$0xff]   ;;  %v4449_v19 = vld [vmem:[%s5204_s1 + $0x98] sm:$0xff]   ;;  %v4474_v23 = vld [vmem:[%s5204_s1 + $0x90] sm:$0xff]  }
  0x67   : > { %3195 = vmatpush3.bf16.msra.mxu1 %v4377_v7  ;;  %3156 = vmatprep.subr.bf16.mxu0 %v4383_v8  ;;  %v4480_v24 = vld [vmem:[%s5204_s1 + $0x48] sm:$0xff]   ;;  %v4504_v28 = vld [vmem:[%s5204_s1 + $0x40] sm:$0xff]   ;;  %v4535_v36 = vld [vmem:[%s5204_s1 + $0x178] sm:$0xff]  }
  0x68   : > { %3196 = vmatprep.subr.bf16.mxu1 %v4389_v9  ;;  %v4486_v25 = vld [vmem:[%s5204_s1 + $0xc8] sm:$0xff]   ;;  %v4510_v29 = vld [vmem:[%s5204_s1 + $0xc0] sm:$0xff]   ;;  %v4540_v37 = vld [vmem:[%s5204_s1 + $0x138] sm:$0xff]  }
  0x69   : > { %v4492_v26 = vld [vmem:[%s5204_s1 + $0x8] sm:$0xff]   ;;  %v4516_v30 = vld [vmem:[%s5204_s1] sm:$0xff]   ;;  %v4546_v38 = vld [vmem:[%s5204_s1 + $0x170] sm:$0xff]  }
  0x6a   : > { %3157 = vmatpush3.bf16.msra.mxu0 %v4395_v10  ;;  %v4498_v27 = vld [vmem:[%s5204_s1 + $0x88] sm:$0xff]   ;;  %v4522_v31 = vld [vmem:[%s5204_s1 + $0x80] sm:$0xff]   ;;  %v4552_v39 = vld [vmem:[%s5204_s1 + $0x130] sm:$0xff]  }
  0x6b   : > { %3197 = vmatpush3.bf16.msra.mxu1 %v4401_v11  ;;  %3158 = vmatprep.subr.bf16.mxu0 %v4407_v12  ;;  %v3779_v32 = vld [vmem:[%s4525_s29] ss:$28 sps:$4 sm:$0xff]   ;;  %v3782_v34 = vld [vmem:[%s4525_s29 + $0x8] ss:$28 sps:$4 sm:$0xff]   ;;  %v3794_v43 = vld [vmem:[%s4525_s29 + $0x38] ss:$28 sps:$4 sm:$0xff]  }
  0x6c   : > { %3198 = vmatprep.subr.bf16.mxu1 %v4413_v13  ;;  %v3781_v33 = vld [vmem:[%s4525_s29 + $0x4] ss:$28 sps:$4 sm:$0xff]   ;;  %v3784_v35 = vld [vmem:[%s4525_s29 + $0xc] ss:$28 sps:$4 sm:$0xff]   ;;  %v3789_v40 = vld [vmem:[%s4525_s29 + $0x3c] ss:$28 sps:$4 sm:$0xff]  }
  0x6d   : > { %1076 = vmatprep.mubr.bf16.mxu0 %v3781_v33  ;;  %1141 = vmatprep.mubr.bf16.mxu1 %v3784_v35  ;;  %v3791_v41 = vld [vmem:[%s4525_s29 + $0x44] ss:$28 sps:$4 sm:$0xff]   ;;  %v4560_v42 = vld [vmem:[%s5204_s1 + $0x188] sm:$0xff]   ;;  %v3800_v49 = vld [vmem:[%s4525_s29 + $0x74] ss:$28 sps:$4 sm:$0xff]  }
  0x6e   : > { %3159 = vmatpush3.bf16.msra.mxu0 %v4419_v14  ;;  %v3795_v44 = vld [vmem:[%s4525_s29 + $0x40] ss:$28 sps:$4 sm:$0xff]   ;;  %v4569_v45 = vld [vmem:[%s5204_s1 + $0x168] sm:$0xff]   ;;  %v3805_v52 = vld [vmem:[%s4525_s29 + $0x78] ss:$28 sps:$4 sm:$0xff]  }
  0x6f   : > { %3199 = vmatpush3.bf16.msra.mxu1 %v4425_v15  ;;  %3160 = vmatprep.subr.bf16.mxu0 %v4431_v16  ;;  %v4575_v46 = vld [vmem:[%s5204_s1 + $0x128] sm:$0xff]   ;;  %v4581_v47 = vld [vmem:[%s5204_s1 + $0x160] sm:$0xff]   ;;  %v3802_v50 = vld [vmem:[%s4525_s29 + $0x7c] ss:$28 sps:$4 sm:$0xff]  }
  0x70   : > { %3200 = vmatprep.subr.bf16.mxu1 %v4437_v17  ;;  %v4587_v48 = vld [vmem:[%s5204_s1 + $0x120] sm:$0xff]   ;;  %v3804_v51 = vld [vmem:[%s4525_s29 + $0x70] ss:$28 sps:$4 sm:$0xff]   ;;  %v4597_v53 = vld [vmem:[%s5204_s1 + $0x158] sm:$0xff]  }
  0x71   : > { %v4603_v54 = vld [vmem:[%s5204_s1 + $0x118] sm:$0xff]   ;;  %v4609_v55 = vld [vmem:[%s5204_s1 + $0x150] sm:$0xff]   ;;  %v3810_v57 = vld [vmem:[%s4525_s29 + $0xac] ss:$28 sps:$4 sm:$0xff]  }
  0x72   : > { %3161 = vmatpush3.bf16.msra.mxu0 %v4443_v18  ;;  %v4614_v56 = vld [vmem:[%s5204_s1 + $0x110] sm:$0xff]   ;;  %v4623_v59 = vld [vmem:[%s5204_s1 + $0x180] sm:$0xff]   ;;  %v4631_v62 = vld [vmem:[%s5204_s1 + $0x148] sm:$0xff]  }
  0x73   : > { %3201 = vmatpush3.bf16.msra.mxu1 %v4449_v19  ;;  %3162 = vmatprep.subr.bf16.mxu0 %v4455_v20  ;;  %v3812_v58 = vld [vmem:[%s4525_s29 + $0xb4] ss:$28 sps:$4 sm:$0xff]   ;;  %v3815_v60 = vld [vmem:[%s4525_s29 + $0xa8] ss:$28 sps:$4 sm:$0xff]  }
  0x74   : > { %3202 = vmatprep.subr.bf16.mxu1 %v4461_v21  ;;  %v3816_v61 = vld [vmem:[%s4525_s29 + $0xb0] ss:$28 sps:$4 sm:$0xff]   ;;  %v4650_v33 = vld [vmem:[%s5204_s1 + $0x100] sm:$0xff]   ;;  %v3824_v35 = vld [vmem:[%s4525_s29 + $0x18] ss:$28 sps:$4 sm:$0xff]  }
  0x75   : > { %v4638_v63 = vld [vmem:[%s5204_s1 + $0x108] sm:$0xff]  }
  0x76   : > { %3163 = vmatpush3.bf16.msra.mxu0 %v4467_v22 }
  0x77   : > { %3203 = vmatpush3.bf16.msra.mxu1 %v4474_v23  ;;  %3164 = vmatprep.subr.bf16.mxu0 %v4480_v24 }
  0x78   : > { %3204 = vmatprep.subr.bf16.mxu1 %v4486_v25 }
  0x7a   : > { %3165 = vmatpush3.bf16.msra.mxu0 %v4492_v26 }
  0x7b   : > { %3205 = vmatpush3.bf16.msra.mxu1 %v4498_v27  ;;  %3166 = vmatprep.subr.bf16.mxu0 %v4504_v28 }
  0x7c   : > { %3206 = vmatprep.subr.bf16.mxu1 %v4510_v29 }
  0x7e   : > { %3167 = vmatpush3.bf16.msra.mxu0 %v4516_v30 }
  0x7f   : > { %3207 = vmatpush3.bf16.msra.mxu1 %v4522_v31  ;;  %3232 = vmatprep.subr.bf16.mxu0 %v4535_v36 }
  0x80   : > { %3656 = vmatprep.subr.bf16.mxu1 %v4560_v42 }
  0x81   : > { %1077 = vmatmul.mubr.bf16.vlgmr.msra.gmra.mxu0 %v3779_v32  ;;  %v4644_v32 = vld [vmem:[%s5204_s1 + $0x140] sm:$0xff]  }
  0x82   : > { %1142 = vmatmul.mubr.bf16.vlgmr.msra.gmra.mxu1 %v3782_v34  ;;  %3233 = vmatpush3.bf16.msra.mxu0 %v4540_v37  ;;  %v3823_v34 = vld [vmem:[%s4525_s29 + $0x14] ss:$28 sps:$4 sm:$0xff]  }
  0x83   : > { %3234 = vmatprep.subr.bf16.mxu0 %v4546_v38  ;;  %1084 = vmatprep.mubr.bf16.mxu0 %v3789_v40  ;;  %v3821_v40 = vld [vmem:[%s4525_s29 + $0x10] ss:$28 sps:$4 sm:$0xff]  }
  0x84   : > { %1149 = vmatprep.mubr.bf16.mxu1 %v3791_v41  ;;  %3657 = vmatpush3.bf16.msra.mxu1 %v4560_v42  ;;  %v3825_v41 = vld [vmem:[%s4525_s29 + $0x50] ss:$28 sps:$4 sm:$0xff]  }
  0x85   : > { %3658 = vmatprep.subr.bf16.mxu1 %v4623_v59 }
  0x86   : > { %3235 = vmatpush3.bf16.msra.mxu0 %v4552_v39 }
  0x87   : > { %3236 = vmatprep.subr.bf16.mxu0 %v4569_v45 }
  0x88   : > { %3659 = vmatpush3.bf16.msra.mxu1 %v4623_v59 }
  0x89   : > { %1085 = vmatmul.mubr.bf16.gmra.mxu0 %v3794_v43  ;;  %3318 = vmatprep.subr.bf16.mxu1 %v4341_v1  ;;  %v3826_v43 = vld [vmem:[%s4525_s29 + $0x4c] ss:$28 sps:$4 sm:$0xff]  }
  0x8a   : > { %1150 = vmatmul.mubr.bf16.gmra.mxu1 %v3795_v44  ;;  %3237 = vmatpush3.bf16.msra.mxu0 %v4575_v46  ;;  %v3832_v44 = vld [vmem:[%s4525_s29 + $0x88] ss:$28 sps:$4 sm:$0xff]  }
  0x8b   : > { %3238 = vmatprep.subr.bf16.mxu0 %v4581_v47  ;;  %1092 = vmatprep.mubr.bf16.mxu0 %v3800_v49  ;;  %v3828_v49 = vld [vmem:[%s4525_s29 + $0x48] ss:$28 sps:$4 sm:$0xff]  }
  0x8c   : > { %1157 = vmatprep.mubr.bf16.mxu1 %v3802_v50  ;;  %v3833_v50 = vld [vmem:[%s4525_s29 + $0xc0] ss:$28 sps:$4 sm:$0xff]  }
  0x8e   : > { %3239 = vmatpush3.bf16.msra.mxu0 %v4587_v48 }
  0x8f   : > { %3240 = vmatprep.subr.bf16.mxu0 %v4597_v53 }
  0x91   : > { %1093 = vmatmul.mubr.bf16.gmra.mxu0 %v3804_v51  ;;  %v3829_v51 = vld [vmem:[%s4525_s29 + $0x84] ss:$28 sps:$4 sm:$0xff]  }
  0x92   : > { %1158 = vmatmul.mubr.bf16.gmra.mxu1 %v3805_v52  ;;  %3241 = vmatpush3.bf16.msra.mxu0 %v4603_v54  ;;  %v3839_v52 = vld [vmem:[%s4525_s29 + $0xec] ss:$28 sps:$4 sm:$0xff]  }
  0x93   : > { %3242 = vmatprep.subr.bf16.mxu0 %v4609_v55  ;;  %1100 = vmatprep.mubr.bf16.mxu0 %v3810_v57  ;;  %v3831_v57 = vld [vmem:[%s4525_s29 + $0x80] ss:$28 sps:$4 sm:$0xff]  }
  0x94   : > { %1165 = vmatprep.mubr.bf16.mxu1 %v3812_v58  ;;  %v3834_v58 = vld [vmem:[%s4525_s29 + $0xbc] ss:$28 sps:$4 sm:$0xff]  }
  0x96   : > { %3243 = vmatpush3.bf16.msra.mxu0 %v4614_v56 }
  0x97   : > { %3244 = vmatprep.subr.bf16.mxu0 %v4631_v62 }
  0x99   : > { %1101 = vmatmul.mubr.bf16.gmra.mxu0 %v3815_v60  ;;  %v3836_v60 = vld [vmem:[%s4525_s29 + $0xb8] ss:$28 sps:$4 sm:$0xff]  }
  0x9a   : > { %1166 = vmatmul.mubr.bf16.gmra.mxu1 %v3816_v61  ;;  %3245 = vmatpush3.bf16.msra.mxu0 %v4638_v63  ;;  %v3842_v61 = vld [vmem:[%s4525_s29 + $0xe4] ss:$28 sps:$4 sm:$0xff]  }
  0x9b   : > { %3246 = vmatprep.subr.bf16.mxu0 %v4644_v32  ;;  %1206 = vmatprep.mubr.bf16.mxu0 %v3823_v34  ;;  %v3837_v34 = vld [vmem:[%s4525_s29 + $0xe8] ss:$28 sps:$4 sm:$0xff]  }
  0x9c   : > { %3660 = vmatprep.mubr.msk.bf16.mxu1 %vm1031_vm0, %v3824_v35  ;;  %v3840_v35 = vld [vmem:[%s4525_s29 + $0xe0] ss:$28 sps:$4 sm:$0xff]  }
  0x9e   : > { %3247 = vmatpush3.bf16.msra.mxu0 %v4650_v33 }
  0x9f   : > { %3278 = vmatprep.subr.bf16.mxu0 %v4336_v0 }
  0xa1   : > { %1207 = vmatmul.mubr.bf16.vlgmr.msra.gmra.mxu0 %v3821_v40  ;;  %v3843_v40 = vld [vmem:[%s4525_s29 + $0x124] ss:$28 sps:$4 sm:$0xff]  }
  0xa2   : > { %3661 = vmatmul.mubr.msk.bf16.vlgmr.msra.gmra.mxu1 %vm1031_vm0, %v3825_v41  ;;  %3279 = vmatpush3.bf16.msra.mxu0 %v4347_v2  ;;  %v3845_v41 = vld [vmem:[%s4525_s29 + $0x11c] ss:$28 sps:$4 sm:$0xff]  }
  0xa3   : > { %3319 = vmatpush3.bf16.msra.mxu1 %v4353_v3  ;;  %3280 = vmatprep.subr.bf16.mxu0 %v4359_v4 }
  0xa4   : > { %3320 = vmatprep.subr.bf16.mxu1 %v4365_v5  ;;  %1214 = vmatprep.mubr.bf16.mxu0 %v3826_v43  ;;  %v3847_v43 = vld [vmem:[%s4525_s29 + $0x120] ss:$28 sps:$4 sm:$0xff]  }
  0xa5   : > { %3664 = vmatprep.mubr.msk.bf16.mxu1 %vm1031_vm0, %v3832_v44  ;;  %v3848_v44 = vld [vmem:[%s4525_s29 + $0x118] ss:$28 sps:$4 sm:$0xff]  }
  0xa6   : > { %3281 = vmatpush3.bf16.msra.mxu0 %v4371_v6 }
  0xa7   : > { %3321 = vmatpush3.bf16.msra.mxu1 %v4377_v7  ;;  %3282 = vmatprep.subr.bf16.mxu0 %v4383_v8 }
  0xa8   : > { %3322 = vmatprep.subr.bf16.mxu1 %v4389_v9 }
  0xa9   : > { %1215 = vmatmul.mubr.bf16.gmra.mxu0 %v3828_v49  ;;  %v3849_v49 = vld [vmem:[%s4525_s29 + $0x15c] ss:$28 sps:$4 sm:$0xff]  }
  0xaa   : > { %3665 = vmatmul.mubr.msk.bf16.gmra.mxu1 %vm1031_vm0, %v3833_v50  ;;  %3283 = vmatpush3.bf16.msra.mxu0 %v4395_v10  ;;  %v3851_v50 = vld [vmem:[%s4525_s29 + $0x154] ss:$28 sps:$4 sm:$0xff]  }
  0xab   : > { %3323 = vmatpush3.bf16.msra.mxu1 %v4401_v11  ;;  %3284 = vmatprep.subr.bf16.mxu0 %v4407_v12 }
  0xac   : > { %3324 = vmatprep.subr.bf16.mxu1 %v4413_v13  ;;  %1222 = vmatprep.mubr.bf16.mxu0 %v3829_v51  ;;  %v3853_v51 = vld [vmem:[%s4525_s29 + $0x158] ss:$28 sps:$4 sm:$0xff]  }
  0xad   : > { %1586 = vmatprep.mubr.bf16.mxu1 %v3839_v52  ;;  %v3854_v52 = vld [vmem:[%s4525_s29 + $0x150] ss:$28 sps:$4 sm:$0xff]  }
  0xae   : > { %3285 = vmatpush3.bf16.msra.mxu0 %v4419_v14 }
  0xaf   : > { %3325 = vmatpush3.bf16.msra.mxu1 %v4425_v15  ;;  %3286 = vmatprep.subr.bf16.mxu0 %v4431_v16 }
  0xb0   : > { %3326 = vmatprep.subr.bf16.mxu1 %v4437_v17 }
  0xb1   : > { %1223 = vmatmul.mubr.bf16.gmra.mxu0 %v3831_v57  ;;  %v3855_v57 = vld [vmem:[%s4525_s29 + $0x194] ss:$28 sps:$4 sm:$0xff]  }
  0xb2   : > { %3287 = vmatpush3.bf16.msra.mxu0 %v4443_v18  ;;  %1230 = vmatprep.mubr.bf16.mxu0 %v3834_v58  ;;  %v3857_v58 = vld [vmem:[%s4525_s29 + $0x18c] ss:$28 sps:$4 sm:$0xff]  }
  0xb3   : > { %3327 = vmatpush3.bf16.msra.mxu1 %v4449_v19  ;;  %3288 = vmatprep.subr.bf16.mxu0 %v4455_v20 }
  0xb4   : > { %3328 = vmatprep.subr.bf16.mxu1 %v4461_v21 }
  0xb6   : > { %3289 = vmatpush3.bf16.msra.mxu0 %v4467_v22 }
  0xb7   : > { %3329 = vmatpush3.bf16.msra.mxu1 %v4474_v23  ;;  %3290 = vmatprep.subr.bf16.mxu0 %v4480_v24 }
  0xb8   : > { %3330 = vmatprep.subr.bf16.mxu1 %v4486_v25 }
  0xb9   : > { %1231 = vmatmul.mubr.bf16.gmra.mxu0 %v3836_v60  ;;  %v3860_v60 = vld [vmem:[%s4525_s29 + $0x188] ss:$28 sps:$4 sm:$0xff]  }
  0xba   : > { %3291 = vmatpush3.bf16.msra.mxu0 %v4492_v26  ;;  %1521 = vmatprep.mubr.bf16.mxu0 %v3842_v61  ;;  %v3861_v61 = vld [vmem:[%s4525_s29 + $0xf8] ss:$28 sps:$4 sm:$0xff]  }
  0xbb   : > { %3331 = vmatpush3.bf16.msra.mxu1 %v4498_v27  ;;  %3292 = vmatprep.subr.bf16.mxu0 %v4504_v28 }
  0xbc   : > { %3332 = vmatprep.subr.bf16.mxu1 %v4510_v29 }
  0xbe   : > { %3293 = vmatpush3.bf16.msra.mxu0 %v4516_v30 }
  0xbf   : > { %3333 = vmatpush3.bf16.msra.mxu1 %v4522_v31  ;;  %3358 = vmatprep.subr.bf16.mxu0 %v4535_v36 }
  0xc0   : > { %3668 = vmatprep.subr.bf16.mxu1 %v4560_v42 }
  0xc1   : > { %1522 = vmatmul.mubr.bf16.vlgmr.msra.gmra.mxu0 %v3840_v35  ;;  %v3862_v35 = vld [vmem:[%s4525_s29 + $0xf0] ss:$28 sps:$4 sm:$0xff]  }
  0xc2   : > { %1587 = vmatmul.mubr.bf16.vlgmr.msra.gmra.mxu1 %v3837_v34  ;;  %3359 = vmatpush3.bf16.msra.mxu0 %v4540_v37  ;;  %v3864_v34 = vld [vmem:[%s4525_s29 + $0xf4] ss:$28 sps:$4 sm:$0xff]  }
  0xc3   : > { %1594 = vmatprep.mubr.bf16.mxu1 %v3843_v40  ;;  %3360 = vmatprep.subr.bf16.mxu0 %v4546_v38  ;;  %v3865_v40 = vld [vmem:[%s4525_s29 + $0x130] ss:$28 sps:$4 sm:$0xff]  }
  0xc4   : > { %1529 = vmatprep.mubr.bf16.mxu0 %v3845_v41  ;;  %3669 = vmatpush3.bf16.msra.mxu1 %v4560_v42  ;;  %v3866_v41 = vld [vmem:[%s4525_s29 + $0x12c] ss:$28 sps:$4 sm:$0xff]  }
  0xc5   : > { %3670 = vmatprep.subr.bf16.mxu1 %v4623_v59 }
  0xc6   : > { %3361 = vmatpush3.bf16.msra.mxu0 %v4552_v39 }
  0xc7   : > { %3362 = vmatprep.subr.bf16.mxu0 %v4569_v45 }
  0xc8   : > { %3671 = vmatpush3.bf16.msra.mxu1 %v4623_v59 }
  0xc9   : > { %1530 = vmatmul.mubr.bf16.gmra.mxu0 %v3848_v44  ;;  %3444 = vmatprep.subr.bf16.mxu1 %v4341_v1  ;;  %v3859_v1 = vld [vmem:[%s4525_s29 + $0x190] ss:$28 sps:$4 sm:$0xff]   ;;  %v3868_v44 = vld [vmem:[%s4525_s29 + $0x128] ss:$28 sps:$4 sm:$0xff]  }
  0xca   : > { %1595 = vmatmul.mubr.bf16.gmra.mxu1 %v3847_v43  ;;  %3363 = vmatpush3.bf16.msra.mxu0 %v4575_v46  ;;  %v3872_v43 = vld [vmem:[%s4525_s29 + $0x168] ss:$28 sps:$4 sm:$0xff]  }
  0xcb   : > { %1602 = vmatprep.mubr.bf16.mxu1 %v3849_v49  ;;  %3364 = vmatprep.subr.bf16.mxu0 %v4581_v47  ;;  %v3913_v49 = vld [vmem:[%s4525_s29 + $0x280] ss:$28 sps:$4 sm:$0xff]  }
  0xcc   : > { %1537 = vmatprep.mubr.bf16.mxu0 %v3851_v50  ;;  %v3963_v50 = vld [vmem:[%s5204_s1 + $0xb0] sm:$0xff]  }
  0xce   : > { %3365 = vmatpush3.bf16.msra.mxu0 %v4587_v48 }
  0xcf   : > { %3366 = vmatprep.subr.bf16.mxu0 %v4597_v53 }
  0xd1   : > { %1538 = vmatmul.mubr.bf16.gmra.mxu0 %v3854_v52  ;;  %v3965_v52 = vld [vmem:[%s5204_s1 + $0xe8] sm:$0xff]  }
  0xd2   : > { %1603 = vmatmul.mubr.bf16.gmra.mxu1 %v3853_v51  ;;  %3367 = vmatpush3.bf16.msra.mxu0 %v4603_v54  ;;  %v3964_v51 = vld [vmem:[%s5204_s1 + $0x30] sm:$0xff]  }
  0xd3   : > { %1610 = vmatprep.mubr.bf16.mxu1 %v3855_v57  ;;  %3368 = vmatprep.subr.bf16.mxu0 %v4609_v55  ;;  %v3966_v57 = vld [vmem:[%s5204_s1 + $0x68] sm:$0xff]  }
  0xd4   : > { %1545 = vmatprep.mubr.bf16.mxu0 %v3857_v58  ;;  %v3909_v58 = vld [vmem:[%s4525_s29 + $0x244] ss:$28 sps:$4 sm:$0xff]  }
  0xd6   : > { %3369 = vmatpush3.bf16.msra.mxu0 %v4614_v56 }
  0xd7   : > { %3370 = vmatprep.subr.bf16.mxu0 %v4631_v62 }
  0xd9   : > { %1546 = vmatmul.mubr.bf16.gmra.mxu0 %v3860_v60  ;;  %v3967_v60 = vld [vmem:[%s5204_s1 + $0xa8] sm:$0xff]  }
  0xda   : > { %1611 = vmatmul.mubr.bf16.gmra.mxu1 %v3859_v1  ;;  %3371 = vmatpush3.bf16.msra.mxu0 %v4638_v63  ;;  %v3919_v1 = vld [vmem:[%s4525_s29 + $0x2ac] ss:$28 sps:$4 sm:$0xff]  }
  0xdb   : > { %3672 = vmatprep.mubr.msk.bf16.mxu1 %vm1031_vm0, %v3861_v61  ;;  %3372 = vmatprep.subr.bf16.mxu0 %v4644_v32  ;;  %v3968_v61 = vld [vmem:[%s5204_s1 + $0x28] sm:$0xff]  }
  0xdc   : > { %1651 = vmatprep.mubr.bf16.mxu0 %v3864_v34  ;;  %v3969_v34 = vld [vmem:[%s5204_s1 + $0xe0] sm:$0xff]  }
  0xde   : > { %3373 = vmatpush3.bf16.msra.mxu0 %v4650_v33 }
  0xdf   : > { %3404 = vmatprep.subr.bf16.mxu0 %v4336_v0  ;;  %v3873_v0 = vld [vmem:[%s4525_s29 + $0x1a0] ss:$28 sps:$4 sm:$0xff]  }
  0xe1   : > { %1652 = vmatmul.mubr.bf16.vlgmr.msra.gmra.mxu0 %v3862_v35  ;;  %v3970_v35 = vld [vmem:[%s5204_s1 + $0x60] sm:$0xff]  }
  0xe2   : > { %3673 = vmatmul.mubr.msk.bf16.vlgmr.msra.gmra.mxu1 %vm1031_vm0, %v3865_v40  ;;  %3405 = vmatpush3.bf16.msra.mxu0 %v4347_v2  ;;  %v3869_v2 = vld [vmem:[%s4525_s29 + $0x164] ss:$28 sps:$4 sm:$0xff]  }
  0xe3   : > { %3445 = vmatpush3.bf16.msra.mxu1 %v4353_v3  ;;  %3406 = vmatprep.subr.bf16.mxu0 %v4359_v4  ;;  %v3879_v3 = vld [vmem:[%s4525_s29 + $0x1cc] ss:$28 sps:$4 sm:$0xff]   ;;  %v3871_v4 = vld [vmem:[%s4525_s29 + $0x160] ss:$28 sps:$4 sm:$0xff]  }
  0xe4   : > { %3446 = vmatprep.subr.bf16.mxu1 %v4365_v5  ;;  %1659 = vmatprep.mubr.bf16.mxu0 %v3866_v41  ;;  %v3874_v5 = vld [vmem:[%s4525_s29 + $0x19c] ss:$28 sps:$4 sm:$0xff]   ;;  %v3971_v41 = vld [vmem:[%s5204_s1 + $0xa0] sm:$0xff]  }
  0xe5   : > { %3676 = vmatprep.mubr.msk.bf16.mxu1 %vm1031_vm0, %v3872_v43  ;;  %v3911_v40 = vld [vmem:[%s4525_s29 + $0x240] ss:$28 sps:$4 sm:$0xff]  }
  0xe6   : > { %3407 = vmatpush3.bf16.msra.mxu0 %v4371_v6  ;;  %v3876_v6 = vld [vmem:[%s4525_s29 + $0x198] ss:$28 sps:$4 sm:$0xff]   ;;  %v3972_v43 = vld [vmem:[%s5204_s1 + $0x20] sm:$0xff]  }
  0xe7   : > { %3447 = vmatpush3.bf16.msra.mxu1 %v4377_v7  ;;  %3408 = vmatprep.subr.bf16.mxu0 %v4383_v8  ;;  %v3882_v7 = vld [vmem:[%s4525_s29 + $0x1c4] ss:$28 sps:$4 sm:$0xff]  }
  0xe8   : > { %3448 = vmatprep.subr.bf16.mxu1 %v4389_v9  ;;  %v3877_v8 = vld [vmem:[%s4525_s29 + $0x1c8] ss:$28 sps:$4 sm:$0xff]   ;;  %v3880_v9 = vld [vmem:[%s4525_s29 + $0x1c0] ss:$28 sps:$4 sm:$0xff]  }
  0xe9   : > { %1660 = vmatmul.mubr.bf16.gmra.mxu0 %v3868_v44  ;;  %v3973_v44 = vld [vmem:[%s5204_s1 + $0xd8] sm:$0xff]  }
  0xea   : > { %3677 = vmatmul.mubr.msk.bf16.gmra.mxu1 %vm1031_vm0, %v3873_v0  ;;  %3409 = vmatpush3.bf16.msra.mxu0 %v4395_v10  ;;  %v3883_v10 = vld [vmem:[%s4525_s29 + $0x204] ss:$28 sps:$4 sm:$0xff]   ;;  %v3974_v0 = vld [vmem:[%s5204_s1 + $0x58] sm:$0xff]  }
  0xeb   : > { %3449 = vmatpush3.bf16.msra.mxu1 %v4401_v11  ;;  %3410 = vmatprep.subr.bf16.mxu0 %v4407_v12  ;;  %v3886_v11 = vld [vmem:[%s4525_s29 + $0x1fc] ss:$28 sps:$4 sm:$0xff]  }
  0xec   : > { %3450 = vmatprep.subr.bf16.mxu1 %v4413_v13  ;;  %1667 = vmatprep.mubr.bf16.mxu0 %v3869_v2  ;;  %v3885_v12 = vld [vmem:[%s4525_s29 + $0x200] ss:$28 sps:$4 sm:$0xff]   ;;  %v3888_v13 = vld [vmem:[%s4525_s29 + $0x1f8] ss:$28 sps:$4 sm:$0xff]  }
  0xed   : > { %2039 = vmatprep.mubr.bf16.mxu1 %v3879_v3  ;;  %v3914_v2 = vld [vmem:[%s4525_s29 + $0x27c] ss:$28 sps:$4 sm:$0xff]  }
  0xee   : > { %3411 = vmatpush3.bf16.msra.mxu0 %v4419_v14  ;;  %v3889_v14 = vld [vmem:[%s4525_s29 + $0x23c] ss:$28 sps:$4 sm:$0xff]  }
  0xef   : > { %3451 = vmatpush3.bf16.msra.mxu1 %v4425_v15  ;;  %3412 = vmatprep.subr.bf16.mxu0 %v4431_v16  ;;  %v3892_v15 = vld [vmem:[%s4525_s29 + $0x234] ss:$28 sps:$4 sm:$0xff]   ;;  %v3957_v16 = vld [vmem:[%s5204_s1 + $0xf8] sm:$0xff]  }
  0xf0   : > { %3452 = vmatprep.subr.bf16.mxu1 %v4437_v17  ;;  %v3891_v17 = vld [vmem:[%s4525_s29 + $0x238] ss:$28 sps:$4 sm:$0xff]  }
  0xf1   : > { %1668 = vmatmul.mubr.bf16.gmra.mxu0 %v3871_v4  ;;  %v3975_v3 = vld [vmem:[%s5204_s1 + $0x98] sm:$0xff]  }
  0xf2   : > { %3413 = vmatpush3.bf16.msra.mxu0 %v4443_v18  ;;  %1675 = vmatprep.mubr.bf16.mxu0 %v3874_v5  ;;  %v3894_v18 = vld [vmem:[%s4525_s29 + $0x230] ss:$28 sps:$4 sm:$0xff]   ;;  %v3976_v4 = vld [vmem:[%s5204_s1 + $0x18] sm:$0xff]  }
  0xf3   : > { %3453 = vmatpush3.bf16.msra.mxu1 %v4449_v19  ;;  %3414 = vmatprep.subr.bf16.mxu0 %v4455_v20  ;;  %v3895_v19 = vld [vmem:[%s4525_s29 + $0x274] ss:$28 sps:$4 sm:$0xff]   ;;  %v3898_v20 = vld [vmem:[%s4525_s29 + $0x26c] ss:$28 sps:$4 sm:$0xff]  }
  0xf4   : > { %3454 = vmatprep.subr.bf16.mxu1 %v4461_v21  ;;  %v3897_v21 = vld [vmem:[%s4525_s29 + $0x270] ss:$28 sps:$4 sm:$0xff]  }
  0xf5   : > { %v3977_v5 = vld [vmem:[%s5204_s1 + $0xd0] sm:$0xff]  }
  0xf6   : > { %3415 = vmatpush3.bf16.msra.mxu0 %v4467_v22  ;;  %v3900_v22 = vld [vmem:[%s4525_s29 + $0x268] ss:$28 sps:$4 sm:$0xff]  }
  0xf7   : > { %3455 = vmatpush3.bf16.msra.mxu1 %v4474_v23  ;;  %3416 = vmatprep.subr.bf16.mxu0 %v4480_v24  ;;  %v3901_v23 = vld [vmem:[%s4525_s29 + $0x1d8] ss:$28 sps:$4 sm:$0xff]  }
  0xf8   : > { %3456 = vmatprep.subr.bf16.mxu1 %v4486_v25  ;;  %v3905_v24 = vld [vmem:[%s4525_s29 + $0x1d4] ss:$28 sps:$4 sm:$0xff]  }
  0xf9   : > { %1676 = vmatmul.mubr.bf16.gmra.mxu0 %v3876_v6  ;;  %v3902_v25 = vld [vmem:[%s4525_s29 + $0x210] ss:$28 sps:$4 sm:$0xff]  }
  0xfa   : > { %3417 = vmatpush3.bf16.msra.mxu0 %v4492_v26  ;;  %1974 = vmatprep.mubr.bf16.mxu0 %v3882_v7  ;;  %v3903_v26 = vld [vmem:[%s4525_s29 + $0x1d0] ss:$28 sps:$4 sm:$0xff]   ;;  %v3916_v7 = vld [vmem:[%s4525_s29 + $0x278] ss:$28 sps:$4 sm:$0xff]  }
  0xfb   : > { %3457 = vmatpush3.bf16.msra.mxu1 %v4498_v27  ;;  %3418 = vmatprep.subr.bf16.mxu0 %v4504_v28  ;;  %v3958_v27 = vld [vmem:[%s5204_s1 + $0x78] sm:$0xff]   ;;  %v3906_v28 = vld [vmem:[%s4525_s29 + $0x20c] ss:$28 sps:$4 sm:$0xff]   ;;  %v3978_v6 = vld [vmem:[%s5204_s1 + $0x50] sm:$0xff]  }
  0xfc   : > { %3458 = vmatprep.subr.bf16.mxu1 %v4510_v29  ;;  %v3912_v29 = vld [vmem:[%s4525_s29 + $0x248] ss:$28 sps:$4 sm:$0xff]  }
  0xfe   : > { %3419 = vmatpush3.bf16.msra.mxu0 %v4516_v30  ;;  %v3959_v30 = vld [vmem:[%s5204_s1 + $0xb8] sm:$0xff]  }
  0xff   : > { %3459 = vmatpush3.bf16.msra.mxu1 %v4522_v31  ;;  %3484 = vmatprep.subr.bf16.mxu0 %v4535_v36  ;;  %v3960_v31 = vld [vmem:[%s5204_s1 + $0x38] sm:$0xff]  }
 0x100   : > { %3680 = vmatprep.subr.bf16.mxu1 %v4560_v42 }
 0x101   : > { %1975 = vmatmul.mubr.bf16.vlgmr.msra.gmra.mxu0 %v3880_v9  ;;  %v3980_v9 = vld [vmem:[%s5204_s1 + $0x10] sm:$0xff]  }
 0x102   : > { %2040 = vmatmul.mubr.bf16.vlgmr.msra.gmra.mxu1 %v3877_v8  ;;  %3485 = vmatpush3.bf16.msra.mxu0 %v4540_v37  ;;  %v3979_v8 = vld [vmem:[%s5204_s1 + $0x90] sm:$0xff]  }
 0x103   : > { %2047 = vmatprep.mubr.bf16.mxu1 %v3883_v10  ;;  %3486 = vmatprep.subr.bf16.mxu0 %v4546_v38  ;;  %v3981_v10 = vld [vmem:[%s5204_s1 + $0xc8] sm:$0xff]  }
 0x104   : > { %3681 = vmatpush3.bf16.msra.mxu1 %v4560_v42  ;;  %1982 = vmatprep.mubr.bf16.mxu0 %v3886_v11  ;;  %v3961_v42 = vld [vmem:[%s5204_s1 + $0xf0] sm:$0xff]   ;;  %v3982_v11 = vld [vmem:[%s5204_s1 + $0x48] sm:$0xff]  }
 0x105   : > { %3682 = vmatprep.subr.bf16.mxu1 %v4623_v59 }
 0x106   : > { %3487 = vmatpush3.bf16.msra.mxu0 %v4552_v39 }
 0x107   : > { %3488 = vmatprep.subr.bf16.mxu0 %v4569_v45 }
 0x108   : > { %3683 = vmatpush3.bf16.msra.mxu1 %v4623_v59  ;;  %v3908_v59 = vld [vmem:[%s4525_s29 + $0x208] ss:$28 sps:$4 sm:$0xff]  }
 0x109   : > { %3570 = vmatprep.subr.bf16.mxu1 %v3957_v16  ;;  %1983 = vmatmul.mubr.bf16.gmra.mxu0 %v3888_v13  ;;  %v3983_v13 = vld [vmem:[%s5204_s1 + $0x88] sm:$0xff]   ;;  %v3986_v16 = vld [vmem:[%s5204_s1 + $0x40] sm:$0xff]  }
 0x10a   : > { %2048 = vmatmul.mubr.bf16.gmra.mxu1 %v3885_v12  ;;  %3489 = vmatpush3.bf16.msra.mxu0 %v4575_v46  ;;  %v3922_v12 = vld [vmem:[%s4525_s29 + $0x2a4] ss:$28 sps:$4 sm:$0xff]  }
 0x10b   : > { %2055 = vmatprep.mubr.bf16.mxu1 %v3889_v14  ;;  %3490 = vmatprep.subr.bf16.mxu0 %v4581_v47  ;;  %v3984_v14 = vld [vmem:[%s5204_s1 + $0x8] sm:$0xff]  }
 0x10c   : > { %1990 = vmatprep.mubr.bf16.mxu0 %v3892_v15  ;;  %v3985_v15 = vld [vmem:[%s5204_s1 + $0xc0] sm:$0xff]  }
 0x10e   : > { %3491 = vmatpush3.bf16.msra.mxu0 %v4587_v48 }
 0x10f   : > { %3492 = vmatprep.subr.bf16.mxu0 %v4597_v53 }
 0x111   : > { %1991 = vmatmul.mubr.bf16.gmra.mxu0 %v3894_v18  ;;  %v3920_v18 = vld [vmem:[%s4525_s29 + $0x2a0] ss:$28 sps:$4 sm:$0xff]  }
 0x112   : > { %2056 = vmatmul.mubr.bf16.gmra.mxu1 %v3891_v17  ;;  %3493 = vmatpush3.bf16.msra.mxu0 %v4603_v54  ;;  %v3917_v17 = vld [vmem:[%s4525_s29 + $0x2a8] ss:$28 sps:$4 sm:$0xff]  }
 0x113   : > { %2063 = vmatprep.mubr.bf16.mxu1 %v3895_v19  ;;  %3494 = vmatprep.subr.bf16.mxu0 %v4609_v55  ;;  %v3987_v19 = vld [vmem:[%s5204_s1 + $0x80] sm:$0xff]  }
 0x114   : > { %1998 = vmatprep.mubr.bf16.mxu0 %v3898_v20  ;;  %v3988_v20 = vld [vmem:[%s5204_s1] sm:$0xff]  }
 0x116   : > { %3495 = vmatpush3.bf16.msra.mxu0 %v4614_v56  ;;  %v3962_v56 = vld [vmem:[%s5204_s1 + $0x70] sm:$0xff]  }
 0x117   : > { %3496 = vmatprep.subr.bf16.mxu0 %v4631_v62 }
 0x119   : > { %1999 = vmatmul.mubr.bf16.gmra.mxu0 %v3900_v22 }
 0x11a   : > { %2064 = vmatmul.mubr.bf16.gmra.mxu1 %v3897_v21  ;;  %3497 = vmatpush3.bf16.msra.mxu0 %v4638_v63  ;;  %v3923_v21 = vld [vmem:[%s4525_s29 + $0x2e4] ss:$28 sps:$4 sm:$0xff]  }
 0x11b   : > { %3684 = vmatprep.mubr.msk.bf16.mxu1 %vm1031_vm0, %v3901_v23  ;;  %3498 = vmatprep.subr.bf16.mxu0 %v4644_v32  ;;  %v3926_v23 = vld [vmem:[%s4525_s29 + $0x2dc] ss:$28 sps:$4 sm:$0xff]  }
 0x11c   : > { %2104 = vmatprep.mubr.bf16.mxu0 %v3905_v24 }
 0x11e   : > { %3499 = vmatpush3.bf16.msra.mxu0 %v4650_v33 }
 0x11f   : > { %3530 = vmatprep.subr.bf16.mxu0 %v3958_v27 }
 0x121   : > { %2105 = vmatmul.mubr.bf16.vlgmr.msra.gmra.mxu0 %v3903_v26 }
 0x122   : > { %3685 = vmatmul.mubr.msk.bf16.vlgmr.msra.gmra.mxu1 %vm1031_vm0, %v3902_v25  ;;  %3531 = vmatpush3.bf16.msra.mxu0 %v3960_v31  ;;  %v3928_v31 = vld [vmem:[%s4525_s29 + $0x2d8] ss:$28 sps:$4 sm:$0xff]  }
 0x123   : > { %3571 = vmatpush3.bf16.msra.mxu1 %v3959_v30  ;;  %3532 = vmatprep.subr.bf16.mxu0 %v3962_v56  ;;  %v3925_v30 = vld [vmem:[%s4525_s29 + $0x2e0] ss:$28 sps:$4 sm:$0xff]  }
 0x124   : > { %3572 = vmatprep.subr.bf16.mxu1 %v3961_v42  ;;  %2112 = vmatprep.mubr.bf16.mxu0 %v3906_v28 }
 0x125   : > { %3688 = vmatprep.mubr.msk.bf16.mxu1 %vm1031_vm0, %v3912_v29 }
 0x126   : > { %3533 = vmatpush3.bf16.msra.mxu0 %v3964_v51 }
 0x127   : > { %3573 = vmatpush3.bf16.msra.mxu1 %v3963_v50  ;;  %3534 = vmatprep.subr.bf16.mxu0 %v3966_v57 }
 0x128   : > { %3574 = vmatprep.subr.bf16.mxu1 %v3965_v52  ;;  %v3932_v52 = vld [vmem:[%s4525_s29 + $0x314] ss:$28 sps:$4 sm:$0xff]  }
 0x129   : > { %2113 = vmatmul.mubr.bf16.gmra.mxu0 %v3908_v59 }
 0x12a   : > { %3689 = vmatmul.mubr.msk.bf16.gmra.mxu1 %vm1031_vm0, %v3913_v49  ;;  %3535 = vmatpush3.bf16.msra.mxu0 %v3968_v61 }
 0x12b   : > { %3575 = vmatpush3.bf16.msra.mxu1 %v3967_v60  ;;  %3536 = vmatprep.subr.bf16.mxu0 %v3970_v35  ;;  %v3931_v35 = vld [vmem:[%s4525_s29 + $0x318] ss:$28 sps:$4 sm:$0xff]  }
 0x12c   : > { %3576 = vmatprep.subr.bf16.mxu1 %v3969_v34  ;;  %2120 = vmatprep.mubr.bf16.mxu0 %v3909_v58 }
 0x12d   : > { %2492 = vmatprep.mubr.bf16.mxu1 %v3919_v1 }
 0x12e   : > { %3537 = vmatpush3.bf16.msra.mxu0 %v3972_v43 }
 0x12f   : > { %3577 = vmatpush3.bf16.msra.mxu1 %v3971_v41  ;;  %3538 = vmatprep.subr.bf16.mxu0 %v3974_v0  ;;  %v3935_v0 = vld [vmem:[%s4525_s29 + $0x354] ss:$28 sps:$4 sm:$0xff]  }
 0x130   : > { %3578 = vmatprep.subr.bf16.mxu1 %v3973_v44 }
 0x131   : > { %2121 = vmatmul.mubr.bf16.gmra.mxu0 %v3911_v40  ;;  %v3934_v40 = vld [vmem:[%s4525_s29 + $0x310] ss:$28 sps:$4 sm:$0xff]  }
 0x132   : > { %3539 = vmatpush3.bf16.msra.mxu0 %v3976_v4  ;;  %2128 = vmatprep.mubr.bf16.mxu0 %v3914_v2 }
 0x133   : > { %3579 = vmatpush3.bf16.msra.mxu1 %v3975_v3  ;;  %3540 = vmatprep.subr.bf16.mxu0 %v3978_v6  ;;  %v3938_v3 = vld [vmem:[%s4525_s29 + $0x34c] ss:$28 sps:$4 sm:$0xff]  }
 0x134   : > { %3580 = vmatprep.subr.bf16.mxu1 %v3977_v5 }
 0x136   : > { %3541 = vmatpush3.bf16.msra.mxu0 %v3980_v9 }
 0x137   : > { %3581 = vmatpush3.bf16.msra.mxu1 %v3979_v8  ;;  %3542 = vmatprep.subr.bf16.mxu0 %v3982_v11  ;;  %v3940_v11 = vld [vmem:[%s4525_s29 + $0x348] ss:$28 sps:$4 sm:$0xff]  }
 0x138   : > { %3582 = vmatprep.subr.bf16.mxu1 %v3981_v10  ;;  %v3937_v10 = vld [vmem:[%s4525_s29 + $0x350] ss:$28 sps:$4 sm:$0xff]  }
 0x139   : > { %2129 = vmatmul.mubr.bf16.gmra.mxu0 %v3916_v7 }
 0x13a   : > { %3543 = vmatpush3.bf16.msra.mxu0 %v3984_v14  ;;  %2427 = vmatprep.mubr.bf16.mxu0 %v3922_v12 }
 0x13b   : > { %3583 = vmatpush3.bf16.msra.mxu1 %v3983_v13  ;;  %3544 = vmatprep.subr.bf16.mxu0 %v3986_v16 }
 0x13c   : > { %3584 = vmatprep.subr.bf16.mxu1 %v3985_v15 }
 0x13e   : > { %3545 = vmatpush3.bf16.msra.mxu0 %v3988_v20 }
 0x13f   : > { %3585 = vmatpush3.bf16.msra.mxu1 %v3987_v19  ;;  %3610 = vmatprep.subr.bf16.mxu0 %v4535_v36 }
 0x140   : > { %3704 = vmatprep.subr.bf16.mxu1 %v4535_v36 }
 0x141   : > { %v3168_v22 = vpop.f32.mrf.mxu0  ;;  %2428 = vmatmul.mubr.bf16.vlgmr.msra.gmra.mxu0 %v3920_v18  ;;  %v3946_v18 = vld [vmem:[%s4525_s29 + $0x2b4] ss:$28 sps:$4 sm:$0xff]  }
 0x142   : > { %2493 = vmatmul.mubr.bf16.vlgmr.msra.gmra.mxu1 %v3917_v17  ;;  %v3208_v24 = vpop.f32.mrf.mxu1  ;;  %3611 = vmatpush3.bf16.msra.mxu0 %v4540_v37  ;;  %v3943_v17 = vld [vmem:[%s4525_s29 + $0x35c] ss:$28 sps:$4 sm:$0xff]  }
 0x143   : > { %3712 = vmatpush3.bf16.msra.mxu1 %v4540_v37  ;;  %v3169_v25 = vpop.f32.mrf.mxu0  ;;  %2500 = vmatprep.mubr.bf16.mxu1 %v3923_v21  ;;  %v3989_v37 = vld [vmem:[%s5204_s1 + $0x130] sm:$0xff]  }
 0x144   : > { %3705 = vmatprep.subr.bf16.mxu1 %v4546_v38  ;;  %v3170_v26 = vadd.f32 %v3169_v25, %v3168_v22  ;;  %v3209_v27 = vpop.f32.mrf.mxu1  ;;  %3612 = vmatprep.subr.bf16.mxu0 %v4546_v38  ;;  %v3929_v38 = vld [vmem:[%s4525_s29 + $0x31c] ss:$28 sps:$4 sm:$0xff]  }
 0x145   : > { %v3210_v28 = vadd.f32 %v3209_v27, %v3208_v24  ;;  %v3171_v36 = vpop.f32.mrf.mxu0  ;;  %2435 = vmatprep.mubr.bf16.mxu0 %v3926_v23  ;;  %v3944_v27 = vld [vmem:[%s4525_s29 + $0x2b0] ss:$28 sps:$4 sm:$0xff]  }
 0x146   : > { %v3211_v29 = vpop.f32.mrf.mxu1  ;;  %3613 = vmatpush3.bf16.msra.mxu0 %v3989_v37 }
 0x147   : > { %v4948_v42 = vadd.f32 %v3210_v28, %v3170_v26  ;;  %3713 = vmatpush3.bf16.msra.mxu1 %v4552_v39  ;;  %v3172_v56 = vpop.f32.mrf.mxu0  ;;  %3614 = vmatprep.subr.bf16.mxu0 %v4569_v45  ;;  %v3941_v26 = vld [vmem:[%s4525_s29 + $0x358] ss:$28 sps:$4 sm:$0xff]  }
 0x148   : > { %3706 = vmatprep.subr.bf16.mxu1 %v4569_v45  ;;  %v3173_v59 = vadd.f32 %v3172_v56, %v3171_v36  ;;  %v3212_v49 = vpop.f32.mrf.mxu1  ;;  %v3947_v36 = vld [vmem:[%s4525_s29 + $0x2b8] ss:$28 sps:$4 sm:$0xff]  }
 0x149   : > { %v3213_v50 = vadd.f32 %v3212_v49, %v3211_v29  ;;  %v3174_v51 = vpop.f32.mrf.mxu0  ;;  %2436 = vmatmul.mubr.bf16.gmra.mxu0 %v3928_v31  ;;  %v3951_v31 = vld [vmem:[%s4525_s29 + $0x2ec] ss:$28 sps:$4 sm:$0xff]   ;;  %v3992_v49 = vld [vmem:[%s5204_s1 + $0x180] sm:$0xff]  }
 0x14a   : > { %2501 = vmatmul.mubr.bf16.gmra.mxu1 %v3925_v30  ;;  %v3214_v57 = vpop.f32.mrf.mxu1  ;;  %3615 = vmatpush3.bf16.msra.mxu0 %v4575_v46 }
 0x14b   : > { %v4958_v39 = vadd.f32 %v3213_v50, %v3173_v59  ;;  %3714 = vmatpush3.bf16.msra.mxu1 %v4575_v46  ;;  %v3175_v58 = vpop.f32.mrf.mxu0  ;;  %2508 = vmatprep.mubr.bf16.mxu1 %v3929_v38 }
 0x14c   : > { %3707 = vmatprep.subr.bf16.mxu1 %v4581_v47  ;;  %v3176_v1 = vadd.f32 %v3175_v58, %v3174_v51  ;;  %v3215_v45 = vpop.f32.mrf.mxu1  ;;  %3616 = vmatprep.subr.bf16.mxu0 %v4581_v47  ;;  %v3949_v58 = vld [vmem:[%s4525_s29 + $0x2e8] ss:$28 sps:$4 sm:$0xff]  }
 0x14d   : > { %v3216_v60 = vadd.f32 %v3215_v45, %v3214_v57  ;;  %v3177_v61 = vpop.f32.mrf.mxu0  ;;  %2443 = vmatprep.mubr.bf16.mxu0 %v3932_v52  ;;  %v3948_v57 = vld [vmem:[%s4525_s29 + $0x2f0] ss:$28 sps:$4 sm:$0xff]   ;;  %v3952_v45 = vld [vmem:[%s4525_s29 + $0x328] ss:$28 sps:$4 sm:$0xff]  }
 0x14e   : > { %v3217_v34 = vpop.f32.mrf.mxu1  ;;  %3617 = vmatpush3.bf16.msra.mxu0 %v4587_v48 }
 0x14f   : > { %v4966_v41 = vadd.f32 %v3216_v60, %v3176_v1  ;;  %3715 = vmatpush3.bf16.msra.mxu1 %v4587_v48  ;;  %v3178_v46 = vpop.f32.mrf.mxu0  ;;  %3618 = vmatprep.subr.bf16.mxu0 %v4597_v53  ;;  %v3956_v60 = vld [vmem:[%s4525_s29 + $0x324] ss:$28 sps:$4 sm:$0xff]  }
 0x150   : > { %3708 = vmatprep.subr.bf16.mxu1 %v4597_v53  ;;  %v3179_v43 = vadd.f32 %v3178_v46, %v3177_v61  ;;  %v3218_v44 = vpop.f32.mrf.mxu1 }
 0x151   : > { %v3219_v47 = vadd.f32 %v3218_v44, %v3217_v34  ;;  %v3180_v2 = vpop.f32.mrf.mxu0  ;;  %2444 = vmatmul.mubr.bf16.gmra.mxu0 %v3934_v40 }
 0x152   : > { %2509 = vmatmul.mubr.bf16.gmra.mxu1 %v3931_v35  ;;  %v3220_v4 = vpop.f32.mrf.mxu1  ;;  %3619 = vmatpush3.bf16.msra.mxu0 %v4603_v54 }
 0x153   : > { %v4974_v5 = vadd.f32 %v3219_v47, %v3179_v43  ;;  %3716 = vmatpush3.bf16.msra.mxu1 %v4603_v54  ;;  %v3181_v48 = vpop.f32.mrf.mxu0  ;;  %2516 = vmatprep.mubr.bf16.mxu1 %v3935_v0  ;;  %v3990_v54 = vld [vmem:[%s5204_s1 + $0x110] sm:$0xff]  }
 0x154   : > { %3709 = vmatprep.subr.bf16.mxu1 %v4609_v55  ;;  %v3182_v6 = vadd.f32 %v3181_v48, %v3180_v2  ;;  %v3221_v53 = vpop.f32.mrf.mxu1  ;;  %3620 = vmatprep.subr.bf16.mxu0 %v4609_v55 }
 0x155   : > { %v3222_v7 = vadd.f32 %v3221_v53, %v3220_v4  ;;  %v3183_v8 = vpop.f32.mrf.mxu0  ;;  %2451 = vmatprep.mubr.bf16.mxu0 %v3938_v3  ;;  %v3953_v3 = vld [vmem:[%s4525_s29 + $0x360] ss:$28 sps:$4 sm:$0xff]  }
 0x156   : > { %v3223_v9 = vpop.f32.mrf.mxu1  ;;  %3621 = vmatpush3.bf16.msra.mxu0 %v3990_v54  ;;  %v3954_v4 = vld [vmem:[%s4525_s29 + $0x320] ss:$28 sps:$4 sm:$0xff]   ;;  %s2857_s29 = sshll.u32 %s2785_s15, 3 }
 0x157   : > { %v4982_v12 = vadd.f32 %v3222_v7, %v3182_v6  ;;  %3717 = vmatpush3.bf16.msra.mxu1 %v3990_v54  ;;  %v3184_v13 = vpop.f32.mrf.mxu0  ;;  %3622 = vmatprep.subr.bf16.mxu0 %v4631_v62  ;;  %p453_p8 = scmp.lt.s32.totalorder %s2857_s29, 15 }
 0x158   : > { %3710 = vmatprep.subr.bf16.mxu1 %v4631_v62  ;;  %v3185_v14 = vadd.f32 %v3184_v13, %v3183_v8  ;;  %v3224_v15 = vpop.f32.mrf.mxu1 }
 0x159   : > { %v3225_v55 = vadd.f32 %v3224_v15, %v3223_v9  ;;  %v3186_v16 = vpop.f32.mrf.mxu0  ;;  %2452 = vmatmul.mubr.bf16.gmra.mxu0 %v3940_v11  ;;  %s5211_s29 = smov (!%p453_p8, %s2857_s29), 15 }
 0x15a   : > { %2517 = vmatmul.mubr.bf16.gmra.mxu1 %v3937_v10  ;;  %v3226_v19 = vpop.f32.mrf.mxu1  ;;  %3623 = vmatpush3.bf16.msra.mxu0 %v4638_v63  ;;  %s2858_s6 = sshll.u32 %s5211_s29, 2 }
 0x15b   : > { %v4991_v20 = vadd.f32 %v3225_v55, %v3185_v14  ;;  %3718 = vmatpush3.bf16.msra.mxu1 %v4638_v63  ;;  %v3187_v21 = vpop.f32.mrf.mxu0  ;;  %3624 = vmatprep.subr.bf16.mxu0 %v4644_v32  ;;  %s5157_s9 = scalar_lea.vmem %s5206_s3, %s2858_s6 }
 0x15c   : > { %3711 = vmatprep.subr.bf16.mxu1 %v4644_v32  ;;  %v3188_v62 = vadd.f32 %v3187_v21, %v3186_v16  ;;  %v3227_v22 = vpop.f32.mrf.mxu1  ;;  %2581 = vmatprep.mubr.bf16.mxu1 %v3943_v17  ;;  %v3991_v32 = vld [vmem:[%s5204_s1 + $0x188] sm:$0xff]  }
 0x15d   : > { %v3228_v23 = vadd.f32 %v3227_v22, %v3226_v19  ;;  %v3189_v24 = vpop.f32.mrf.mxu0  ;;  %2557 = vmatprep.mubr.bf16.mxu0 %v3946_v18 }
 0x15e   : > { %v3229_v25 = vpop.f32.mrf.mxu1  ;;  %3625 = vmatpush3.bf16.msra.mxu0 %v4650_v33 }
 0x15f   : > { %v4999_v28 = vadd.f32 %v3228_v23, %v3188_v62  ;;  %3719 = vmatpush3.bf16.msra.mxu1 %v4650_v33  ;;  %v3190_v63 = vpop.f32.mrf.mxu0 }
 0x160   : > { %3692 = vmatprep.subr.bf16.mxu1 %v3991_v32  ;;  %v3191_v29 = vadd.f32 %v3190_v63, %v3189_v24  ;;  %v3230_v30 = vpop.f32.mrf.mxu1 }
 0x161   : > { %v3231_v37 = vadd.f32 %v3230_v30, %v3229_v25  ;;  %v3248_v56 = vpop.f32.mrf.mxu0  ;;  %2558 = vmatmul.mubr.bf16.vlgmr.msra.gmra.mxu0 %v3944_v27 }
 0x162   : > { %2582 = vmatmul.mubr.bf16.vlgmr.msra.gmra.mxu1 %v3941_v26  ;;  %v3662_v59 = vpop.f32.mrf.mxu1  ;;  %2565 = vmatprep.mubr.bf16.mxu0 %v3951_v31 }
 0x163   : > { %v5008_v33 = vadd.f32 %v3231_v37, %v3191_v29  ;;  %3693 = vmatpush3.bf16.msra.mxu1 %v3991_v32  ;;  %3696 = vmatprep.mubr.msk.bf16.mxu1 %vm1031_vm0, %v3947_v36  ;;  %v3249_v38 = vpop.f32.mrf.mxu0 }
 0x164   : > { %3694 = vmatprep.subr.bf16.mxu1 %v3992_v49  ;;  %v1273_v50 = vpop.f32.mrf.mxu1  ;;  %v3250_v51 = vadd.f32 %v3249_v38, %v3248_v56 }
 0x165   : > { %v3251_v52 = vpop.f32.mrf.mxu0 }
 0x166   : > { %v1209_v1 = vadd.f32 %v3250_v51, %v4948_v42  ;;  %v3663_v61 = vpop.f32.mrf.mxu1 }
 0x167   : > { %3695 = vmatpush3.bf16.msra.mxu1 %v3992_v49  ;;  %v3252_v34 = vpop.f32.mrf.mxu0 }
 0x168   : > { %v5019_v35 = vadd.f32 %v1273_v50, %v1209_v1  ;;  %v3253_v40 = vadd.f32 %v3252_v34, %v3251_v52  ;;  %v1276_v44 = vpop.f32.mrf.mxu1 }
 0x169   : > { %v3254_v46 = vpop.f32.mrf.mxu0  ;;  %2566 = vmatmul.mubr.bf16.gmra.mxu0 %v3949_v58 }
 0x16a   : > { %3697 = vmatmul.mubr.msk.bf16.vlgmr.msra.gmra.mxu1 %vm1031_vm0, %v3948_v57  ;;  %v1212_v43 = vadd.f32 %v3253_v40, %v4958_v39  ;;  %2573 = vmatprep.mubr.bf16.mxu0 %v3956_v60  ;;  %v3666_v48 = vpop.f32.mrf.mxu1 }
 0x16b   : > { %3700 = vmatprep.mubr.msk.bf16.mxu1 %vm1031_vm0, %v3952_v45  ;;  %v3255_v42 = vpop.f32.mrf.mxu0 }
 0x16c   : > { %v5024_v0 = vadd.f32 %v1276_v44, %v1212_v43  ;;  %v3256_v47 = vadd.f32 %v3255_v42, %v3254_v46  ;;  %v1289_v9 = vpop.f32.mrf.mxu1 }
 0x16d   : > { %v3257_v2 = vpop.f32.mrf.mxu0 }
 0x16e   : > { %v1217_v6 = vadd.f32 %v3256_v47, %v4966_v41  ;;  %v3667_v15 = vpop.f32.mrf.mxu1 }
 0x16f   : > { %v3258_v53 = vpop.f32.mrf.mxu0 }
 0x170   : > { %v5029_v7 = vadd.f32 %v3662_v59, %v1217_v6  ;;  %v3259_v8 = vadd.f32 %v3258_v53, %v3257_v2  ;;  %v1292_v19 = vpop.f32.mrf.mxu1 }
 0x171   : > { %v3260_v39 = vpop.f32.mrf.mxu0  ;;  %2574 = vmatmul.mubr.bf16.gmra.mxu0 %v3954_v4 }
 0x172   : > { %3701 = vmatmul.mubr.msk.bf16.gmra.mxu1 %vm1031_vm0, %v3953_v3  ;;  %v1220_v10 = vadd.f32 %v3259_v8, %v4974_v5 }
 0x173   : > { %v3261_v11 = vpop.f32.mrf.mxu0 }
 0x174   : > { %v5033_v54 = vadd.f32 %v3663_v61, %v1220_v10  ;;  %v3262_v13 = vadd.f32 %v3261_v11, %v3260_v39 }
 0x175   : > { %v3263_v14 = vpop.f32.mrf.mxu0 }
 0x176   : > { %v1225_v55 = vadd.f32 %v3262_v13, %v4982_v12 }
 0x177   : > { %v3264_v41 = vpop.f32.mrf.mxu0 }
 0x178   : > { %v3265_v16 = vadd.f32 %v3264_v41, %v3263_v14  ;;  %v5036_v17 = vadd.f32 %v1289_v9, %v1225_v55 }
 0x179   : > { %v3266_v18 = vpop.f32.mrf.mxu0 }
 0x17a   : > { %v1228_v21 = vadd.f32 %v3265_v16, %v4991_v20 }
 0x17b   : > { %v3267_v62 = vpop.f32.mrf.mxu0 }
 0x17c   : > { %v3268_v22 = vadd.f32 %v3267_v62, %v3266_v18  ;;  %v5039_v23 = vadd.f32 %v1292_v19, %v1228_v21 }
 0x17d   : > { %v3269_v5 = vpop.f32.mrf.mxu0 }
 0x17e   : > { %v1233_v24 = vadd.f32 %v3268_v22, %v4999_v28 }
 0x17f   : > { %v3270_v25 = vpop.f32.mrf.mxu0 }
 0x180   : > { %v5042_v26 = vadd.f32 %v3666_v48, %v1233_v24  ;;  %v3271_v27 = vadd.f32 %v3270_v25, %v3269_v5 }
 0x181   : > { %v3294_v12 = vpop.f32.mrf.mxu0 }
 0x182   : > { %v3334_v63 = vpop.f32.mrf.mxu1  ;;  %v1236_v36 = vadd.f32 %v3271_v27, %v5008_v33 }
 0x183   : > { %v3295_v32 = vpop.f32.mrf.mxu0 }
 0x184   : > { %v3335_v29 = vpop.f32.mrf.mxu1  ;;  %v5045_v30 = vadd.f32 %v3667_v15, %v1236_v36  ;;  %v3296_v20 = vadd.f32 %v3295_v32, %v3294_v12 }
 0x185   : > { %v3336_v31 = vadd.f32 %v3335_v29, %v3334_v63  ;;  %v3297_v37 = vpop.f32.mrf.mxu0 }
 0x186   : > { %v3337_v56 = vpop.f32.mrf.mxu1 }
 0x187   : > { %v1589_v59 = vadd.f32 %v3336_v31, %v3296_v20  ;;  %v3298_v49 = vpop.f32.mrf.mxu0 }
 0x188   : > { %v3338_v38 = vpop.f32.mrf.mxu1  ;;  %v3299_v28 = vadd.f32 %v3298_v49, %v3297_v37 }
 0x189   : > { %v3339_v50 = vadd.f32 %v3338_v38, %v3337_v56  ;;  %v3300_v51 = vpop.f32.mrf.mxu0 }
 0x18a   : > { %v3340_v52 = vpop.f32.mrf.mxu1 }
 0x18b   : > { %v1592_v57 = vadd.f32 %v3339_v50, %v3299_v28  ;;  %v3301_v58 = vpop.f32.mrf.mxu0 }
 0x18c   : > { %v3341_v1 = vpop.f32.mrf.mxu1  ;;  %v3302_v45 = vadd.f32 %v3301_v58, %v3300_v51 }
 0x18d   : > { %v3342_v33 = vadd.f32 %v3341_v1, %v3340_v52  ;;  %v3303_v60 = vpop.f32.mrf.mxu0 }
 0x18e   : > { %v3343_v61 = vpop.f32.mrf.mxu1 }
 0x18f   : > { %v1597_v34 = vadd.f32 %v3342_v33, %v3302_v45  ;;  %v3304_v40 = vpop.f32.mrf.mxu0 }
 0x190   : > { %v3344_v46 = vpop.f32.mrf.mxu1  ;;  %v3305_v43 = vadd.f32 %v3304_v40, %v3303_v60 }
 0x191   : > { %v3345_v44 = vadd.f32 %v3344_v46, %v3343_v61  ;;  %v3306_v42 = vpop.f32.mrf.mxu0 }
 0x192   : > { %v3346_v47 = vpop.f32.mrf.mxu1 }
 0x193   : > { %v1600_v2 = vadd.f32 %v3345_v44, %v3305_v43  ;;  %v3307_v3 = vpop.f32.mrf.mxu0 }
 0x194   : > { %v3347_v4 = vpop.f32.mrf.mxu1  ;;  %v3308_v48 = vadd.f32 %v3307_v3, %v3306_v42 }
 0x195   : > { %v3348_v6 = vadd.f32 %v3347_v4, %v3346_v47  ;;  %v3309_v53 = vpop.f32.mrf.mxu0 }
 0x196   : > { %v3349_v8 = vpop.f32.mrf.mxu1 }
 0x197   : > { %v1605_v39 = vadd.f32 %v3348_v6, %v3308_v48  ;;  %v3310_v9 = vpop.f32.mrf.mxu0 }
 0x198   : > { %v3350_v10 = vpop.f32.mrf.mxu1  ;;  %v3311_v11 = vadd.f32 %v3310_v9, %v3309_v53 }
 0x199   : > { %v3351_v13 = vadd.f32 %v3350_v10, %v3349_v8  ;;  %v3312_v14 = vpop.f32.mrf.mxu0 }
 0x19a   : > { %v3352_v15 = vpop.f32.mrf.mxu1 }
 0x19b   : > { %v1608_v55 = vadd.f32 %v3351_v13, %v3311_v11  ;;  %v3313_v41 = vpop.f32.mrf.mxu0 }
 0x19c   : > { %v3353_v16 = vpop.f32.mrf.mxu1  ;;  %v3314_v18 = vadd.f32 %v3313_v41, %v3312_v14 }
 0x19d   : > { %v3354_v19 = vadd.f32 %v3353_v16, %v3352_v15  ;;  %v3315_v21 = vpop.f32.mrf.mxu0 }
 0x19e   : > { %v3355_v62 = vpop.f32.mrf.mxu1 }
 0x19f   : > { %v1613_v22 = vadd.f32 %v3354_v19, %v3314_v18  ;;  %v3316_v5 = vpop.f32.mrf.mxu0 }
 0x1a0   : > { %v3356_v24 = vpop.f32.mrf.mxu1  ;;  %v3317_v25 = vadd.f32 %v3316_v5, %v3315_v21 }
 0x1a1   : > { %v3357_v27 = vadd.f32 %v3356_v24, %v3355_v62  ;;  %v3374_v12 = vpop.f32.mrf.mxu0 }
 0x1a2   : > { %v3674_v63 = vpop.f32.mrf.mxu1 }
 0x1a3   : > { %v1616_v36 = vadd.f32 %v3357_v27, %v3317_v25  ;;  %v3375_v32 = vpop.f32.mrf.mxu0 }
 0x1a4   : > { %v1718_v29 = vpop.f32.mrf.mxu1  ;;  %v3376_v20 = vadd.f32 %v3375_v32, %v3374_v12 }
 0x1a5   : > { %v3377_v31 = vpop.f32.mrf.mxu0 }
 0x1a6   : > { %v1654_v37 = vadd.f32 %v3376_v20, %v1589_v59  ;;  %v3675_v56 = vpop.f32.mrf.mxu1 }
 0x1a7   : > { %v3378_v49 = vpop.f32.mrf.mxu0 }
 0x1a8   : > { %v5047_v38 = vadd.f32 %v1718_v29, %v1654_v37  ;;  %v3379_v28 = vadd.f32 %v3378_v49, %v3377_v31  ;;  %v1721_v58 = vpop.f32.mrf.mxu1 }
 0x1a9   : > { %v3380_v50 = vpop.f32.mrf.mxu0 }
 0x1aa   : > { %v1749_v51 = vmax.f32 %v5019_v35, %v5047_v38  ;;  %v1657_v52 = vadd.f32 %v3379_v28, %v1592_v57  ;;  %v3678_v61 = vpop.f32.mrf.mxu1 }
 0x1ab   : > { %v3381_v1 = vpop.f32.mrf.mxu0 }
 0x1ac   : > { %v5051_v45 = vadd.f32 %v1721_v58, %v1657_v52  ;;  %v3382_v33 = vadd.f32 %v3381_v1, %v3380_v50  ;;  %v1734_v47 = vpop.f32.mrf.mxu1 }
 0x1ad   : > { %v3383_v60 = vpop.f32.mrf.mxu0 }
 0x1ae   : > { %v1750_v59 = vmax.f32 %v5024_v0, %v5051_v45  ;;  %v1662_v40 = vadd.f32 %v3382_v33, %v1597_v34  ;;  %v3679_v8 = vpop.f32.mrf.mxu1 }
 0x1af   : > { %v3384_v46 = vpop.f32.mrf.mxu0 }
 0x1b0   : > { %v5055_v43 = vadd.f32 %v3674_v63, %v1662_v40  ;;  %v3385_v44 = vadd.f32 %v3384_v46, %v3383_v60  ;;  %v1737_v15 = vpop.f32.mrf.mxu1 }
 0x1b1   : > { %v3386_v42 = vpop.f32.mrf.mxu0 }
 0x1b2   : > { %v1751_v57 = vmax.f32 %v5029_v7, %v5055_v43  ;;  %v1665_v3 = vadd.f32 %v3385_v44, %v1600_v2 }
 0x1b3   : > { %v3387_v4 = vpop.f32.mrf.mxu0 }
 0x1b4   : > { %v5059_v48 = vadd.f32 %v3675_v56, %v1665_v3  ;;  %v3388_v6 = vadd.f32 %v3387_v4, %v3386_v42 }
 0x1b5   : > { %v3389_v53 = vpop.f32.mrf.mxu0 }
 0x1b6   : > { %v1752_v9 = vmax.f32 %v5033_v54, %v5059_v48  ;;  %v1670_v34 = vadd.f32 %v3388_v6, %v1605_v39 }
 0x1b7   : > { %v3390_v10 = vpop.f32.mrf.mxu0 }
 0x1b8   : > { %v3391_v11 = vadd.f32 %v3390_v10, %v3389_v53  ;;  %v5063_v13 = vadd.f32 %v1734_v47, %v1670_v34 }
 0x1b9   : > { %v3392_v14 = vpop.f32.mrf.mxu0 }
 0x1ba   : > { %v1753_v41 = vmax.f32 %v5036_v17, %v5063_v13  ;;  %v1673_v2 = vadd.f32 %v3391_v11, %v1608_v55 }
 0x1bb   : > { %v3393_v16 = vpop.f32.mrf.mxu0 }
 0x1bc   : > { %v3394_v18 = vadd.f32 %v3393_v16, %v3392_v14  ;;  %v5067_v19 = vadd.f32 %v1737_v15, %v1673_v2 }
 0x1bd   : > { %v3395_v21 = vpop.f32.mrf.mxu0 }
 0x1be   : > { %v1678_v62 = vadd.f32 %v3394_v18, %v1613_v22  ;;  %v1754_v5 = vmax.f32 %v5039_v23, %v5067_v19 }
 0x1bf   : > { %v3396_v39 = vpop.f32.mrf.mxu0 }
 0x1c0   : > { %v5071_v24 = vadd.f32 %v3678_v61, %v1678_v62  ;;  %v3397_v25 = vadd.f32 %v3396_v39, %v3395_v21 }
 0x1c1   : > { %v3420_v12 = vpop.f32.mrf.mxu0 }
 0x1c2   : > { %v3460_v27 = vpop.f32.mrf.mxu1  ;;  %v1681_v63 = vadd.f32 %v3397_v25, %v1616_v36  ;;  %v1755_v32 = vmax.f32 %v5042_v26, %v5071_v24 }
 0x1c3   : > { %v3421_v29 = vpop.f32.mrf.mxu0 }
 0x1c4   : > { %v3461_v55 = vpop.f32.mrf.mxu1  ;;  %v5075_v20 = vadd.f32 %v3679_v8, %v1681_v63  ;;  %v3422_v37 = vadd.f32 %v3421_v29, %v3420_v12 }
 0x1c5   : > { %v3462_v31 = vadd.f32 %v3461_v55, %v3460_v27  ;;  %v3423_v56 = vpop.f32.mrf.mxu0 }
 0x1c6   : > { %v3463_v22 = vpop.f32.mrf.mxu1  ;;  %v1756_v28 = vmax.f32 %v5045_v30, %v5075_v20 }
 0x1c7   : > { %v2042_v49 = vadd.f32 %v3462_v31, %v3422_v37  ;;  %v3424_v52 = vpop.f32.mrf.mxu0 }
 0x1c8   : > { %v3464_v50 = vpop.f32.mrf.mxu1  ;;  %v3425_v1 = vadd.f32 %v3424_v52, %v3423_v56 }
 0x1c9   : > { %v3465_v58 = vadd.f32 %v3464_v50, %v3463_v22  ;;  %v3426_v33 = vpop.f32.mrf.mxu0 }
 0x1ca   : > { %v3466_v36 = vpop.f32.mrf.mxu1 }
 0x1cb   : > { %v2045_v60 = vadd.f32 %v3465_v58, %v3425_v1  ;;  %v3427_v40 = vpop.f32.mrf.mxu0 }
 0x1cc   : > { %v3467_v61 = vpop.f32.mrf.mxu1  ;;  %v3428_v44 = vadd.f32 %v3427_v40, %v3426_v33 }
 0x1cd   : > { %v3468_v46 = vadd.f32 %v3467_v61, %v3466_v36  ;;  %v3429_v47 = vpop.f32.mrf.mxu0 }
 0x1ce   : > { %v3469_v42 = vpop.f32.mrf.mxu1 }
 0x1cf   : > { %v2050_v3 = vadd.f32 %v3468_v46, %v3428_v44  ;;  %v3430_v6 = vpop.f32.mrf.mxu0 }
 0x1d0   : > { %v3470_v4 = vpop.f32.mrf.mxu1  ;;  %v3431_v8 = vadd.f32 %v3430_v6, %v3429_v47 }
 0x1d1   : > { %v3471_v53 = vadd.f32 %v3470_v4, %v3469_v42  ;;  %v3432_v10 = vpop.f32.mrf.mxu0 }
 0x1d2   : > { %v3472_v34 = vpop.f32.mrf.mxu1 }
 0x1d3   : > { %v2053_v11 = vadd.f32 %v3471_v53, %v3431_v8  ;;  %v3433_v15 = vpop.f32.mrf.mxu0 }
 0x1d4   : > { %v3473_v14 = vpop.f32.mrf.mxu1  ;;  %v3434_v16 = vadd.f32 %v3433_v15, %v3432_v10 }
 0x1d5   : > { %v3474_v2 = vadd.f32 %v3473_v14, %v3472_v34  ;;  %v3435_v21 = vpop.f32.mrf.mxu0 }
 0x1d6   : > { %v3475_v18 = vpop.f32.mrf.mxu1 }
 0x1d7   : > { %v2058_v62 = vadd.f32 %v3474_v2, %v3434_v16  ;;  %v3436_v25 = vpop.f32.mrf.mxu0 }
 0x1d8   : > { %v3476_v39 = vpop.f32.mrf.mxu1  ;;  %v3437_v12 = vadd.f32 %v3436_v25, %v3435_v21 }
 0x1d9   : > { %v3477_v27 = vadd.f32 %v3476_v39, %v3475_v18  ;;  %v3438_v55 = vpop.f32.mrf.mxu0 }
 0x1da   : > { %v3478_v63 = vpop.f32.mrf.mxu1 }
 0x1db   : > { %v2061_v29 = vadd.f32 %v3477_v27, %v3437_v12  ;;  %v3439_v37 = vpop.f32.mrf.mxu0 }
 0x1dc   : > { %v3479_v31 = vpop.f32.mrf.mxu1  ;;  %v3440_v56 = vadd.f32 %v3439_v37, %v3438_v55 }
 0x1dd   : > { %v3480_v22 = vadd.f32 %v3479_v31, %v3478_v63  ;;  %v3441_v52 = vpop.f32.mrf.mxu0 }
 0x1de   : > { %v3481_v50 = vpop.f32.mrf.mxu1 }
 0x1df   : > { %v2066_v58 = vadd.f32 %v3480_v22, %v3440_v56  ;;  %v3442_v36 = vpop.f32.mrf.mxu0 }
 0x1e0   : > { %v3482_v1 = vpop.f32.mrf.mxu1  ;;  %v3443_v61 = vadd.f32 %v3442_v36, %v3441_v52 }
 0x1e1   : > { %v3483_v33 = vadd.f32 %v3482_v1, %v3481_v50  ;;  %v3500_v46 = vpop.f32.mrf.mxu0 }
 0x1e2   : > { %v3686_v40 = vpop.f32.mrf.mxu1 }
 0x1e3   : > { %v2069_v44 = vadd.f32 %v3483_v33, %v3443_v61  ;;  %v3501_v47 = vpop.f32.mrf.mxu0 }
 0x1e4   : > { %v2171_v42 = vpop.f32.mrf.mxu1  ;;  %v3502_v4 = vadd.f32 %v3501_v47, %v3500_v46 }
 0x1e5   : > { %v3503_v6 = vpop.f32.mrf.mxu0 }
 0x1e6   : > { %v2107_v53 = vadd.f32 %v3502_v4, %v2042_v49  ;;  %v3687_v8 = vpop.f32.mrf.mxu1 }
 0x1e7   : > { %v3504_v34 = vpop.f32.mrf.mxu0 }
 0x1e8   : > { %v2172_v10 = vadd.f32 %v2171_v42, %v2107_v53  ;;  %v3505_v14 = vadd.f32 %v3504_v34, %v3503_v6  ;;  %v2174_v18 = vpop.f32.mrf.mxu1 }
 0x1e9   : > { %v3506_v15 = vpop.f32.mrf.mxu0 }
 0x1ea   : > { %v2110_v2 = vadd.f32 %v3505_v14, %v2045_v60  ;;  %v5082_v16 = vmax.f32 %v1749_v51, %v2172_v10  ;;  %v3690_v12 = vpop.f32.mrf.mxu1 }
 0x1eb   : > { %v3507_v21 = vpop.f32.mrf.mxu0 }
 0x1ec   : > { %v2175_v39 = vadd.f32 %v2174_v18, %v2110_v2  ;;  %v3508_v25 = vadd.f32 %v3507_v21, %v3506_v15  ;;  %v2187_v22 = vpop.f32.mrf.mxu1 }
 0x1ed   : > { %v3509_v27 = vpop.f32.mrf.mxu0 }
 0x1ee   : > { %v2115_v63 = vadd.f32 %v3508_v25, %v2050_v3  ;;  %v5087_v49 = vmax.f32 %v1750_v59, %v2175_v39  ;;  %v3691_v52 = vpop.f32.mrf.mxu1 }
 0x1ef   : > { %v3510_v55 = vpop.f32.mrf.mxu0 }
 0x1f0   : > { %v2180_v31 = vadd.f32 %v3686_v40, %v2115_v63  ;;  %v3511_v60 = vadd.f32 %v3510_v55, %v3509_v27  ;;  %v2190_v61 = vpop.f32.mrf.mxu1 }
 0x1f1   : > { %v3512_v37 = vpop.f32.mrf.mxu0 }
 0x1f2   : > { %v5092_v35 = vmax.f32 %v1751_v57, %v2180_v31  ;;  %v2118_v38 = vadd.f32 %v3511_v60, %v2053_v11 }
 0x1f3   : > { %v3513_v51 = vpop.f32.mrf.mxu0 }
 0x1f4   : > { %v2183_v56 = vadd.f32 %v3687_v8, %v2118_v38  ;;  %v3514_v50 = vadd.f32 %v3513_v51, %v3512_v37 }
 0x1f5   : > { %v3515_v3 = vpop.f32.mrf.mxu0 }
 0x1f6   : > { %v5097_v0 = vmax.f32 %v1752_v9, %v2183_v56  ;;  %v2123_v45 = vadd.f32 %v3514_v50, %v2058_v62 }
 0x1f7   : > { %v3516_v59 = vpop.f32.mrf.mxu0 }
 0x1f8   : > { %v3517_v1 = vadd.f32 %v3516_v59, %v3515_v3  ;;  %v2188_v36 = vadd.f32 %v2187_v22, %v2123_v45 }
 0x1f9   : > { %v3518_v33 = vpop.f32.mrf.mxu0 }
 0x1fa   : > { %v5102_v7 = vmax.f32 %v1753_v41, %v2188_v36  ;;  %v2126_v43 = vadd.f32 %v3517_v1, %v2061_v29 }
 0x1fb   : > { %v3519_v57 = vpop.f32.mrf.mxu0 }
 0x1fc   : > { %v3520_v11 = vadd.f32 %v3519_v57, %v3518_v33  ;;  %v2191_v40 = vadd.f32 %v2190_v61, %v2126_v43 }
 0x1fd   : > { %v3521_v46 = vpop.f32.mrf.mxu0 }
 0x1fe   : > { %v2131_v42 = vadd.f32 %v3520_v11, %v2066_v58  ;;  %v5107_v54 = vmax.f32 %v1754_v5, %v2191_v40 }
 0x1ff   : > { %v3522_v48 = vpop.f32.mrf.mxu0 }
 0x200   : > { %v2196_v9 = vadd.f32 %v3690_v12, %v2131_v42  ;;  %v3523_v62 = vadd.f32 %v3522_v48, %v3521_v46 }
 0x201   : > { %v3546_v4 = vpop.f32.mrf.mxu0 }
 0x202   : > { %v3586_v47 = vpop.f32.mrf.mxu1  ;;  %v2134_v6 = vadd.f32 %v3523_v62, %v2069_v44  ;;  %v5112_v17 = vmax.f32 %v1755_v32, %v2196_v9 }
 0x203   : > { %v3547_v41 = vpop.f32.mrf.mxu0 }
 0x204   : > { %v3587_v13 = vpop.f32.mrf.mxu1  ;;  %v2199_v29 = vadd.f32 %v3691_v52, %v2134_v6  ;;  %v3548_v56 = vadd.f32 %v3547_v41, %v3546_v4 }
 0x205   : > { %v3549_v53 = vpop.f32.mrf.mxu0  ;;  %v3588_v51 = vadd.f32 %v3587_v13, %v3586_v47 }
 0x206   : > { %v3589_v58 = vpop.f32.mrf.mxu1  ;;  %v5117_v23 = vmax.f32 %v1756_v28, %v2199_v29 }
 0x207   : > { %v3550_v5 = vpop.f32.mrf.mxu0  ;;  %v2495_v1 = vadd.f32 %v3588_v51, %v3548_v56 }
 0x208   : > { %v3590_v19 = vpop.f32.mrf.mxu1  ;;  %v3551_v36 = vadd.f32 %v3550_v5, %v3549_v53 }
 0x209   : > { %v3552_v34 = vpop.f32.mrf.mxu0  ;;  %v3591_v33 = vadd.f32 %v3590_v19, %v3589_v58 }
 0x20a   : > { %v3592_v8 = vpop.f32.mrf.mxu1 }
 0x20b   : > { %v3553_v10 = vpop.f32.mrf.mxu0  ;;  %v2498_v47 = vadd.f32 %v3591_v33, %v3551_v36 }
 0x20c   : > { %v3593_v44 = vpop.f32.mrf.mxu1  ;;  %v3554_v11 = vadd.f32 %v3553_v10, %v3552_v34  ;;  %v5144_v34 = vld [vmem:[%s5205_s2] ss:$0 sm:$0xff] }
 0x20d   : > { %v3555_v26 = vpop.f32.mrf.mxu0  ;;  %v3594_v57 = vadd.f32 %v3593_v44, %v3592_v8 }
 0x20e   : > { %v5119_v14 = vpop.f32.mrf.mxu1 }
 0x20f   : > { %v3556_v32 = vpop.f32.mrf.mxu0  ;;  %v2503_v41 = vadd.f32 %v3594_v57, %v3554_v11 }
 0x210   : > { %v3596_v24 = vpop.f32.mrf.mxu1  ;;  %v3557_v19 = vadd.f32 %v3556_v32, %v3555_v26 }
 0x211   : > { %v5123_v2 = vpop.f32.mrf.mxu0 }
 0x212   : > { %v5121_v15 = vpop.f32.mrf.mxu1 }
 0x213   : > { %v5127_v30 = vpop.f32.mrf.mxu0 }
 0x214   : > { %v5125_v18 = vpop.f32.mrf.mxu1 }
 0x215   : > { %v5131_v28 = vpop.f32.mrf.mxu0 }
 0x216   : > { %v5129_v20 = vpop.f32.mrf.mxu1 }
 0x217   : > { %v5135_v39 = vpop.f32.mrf.mxu0 }
 0x218   : > { %v5133_v21 = vpop.f32.mrf.mxu1 }
 0x219   : > { %v3564_v27 = vpop.f32.mrf.mxu0 }
 0x21a   : > { %v3604_v25 = vpop.f32.mrf.mxu1 }
 0x21b   : > { %v3565_v63 = vpop.f32.mrf.mxu0 }
 0x21c   : > { %v3605_v12 = vpop.f32.mrf.mxu1  ;;  %v3566_v48 = vadd.f32 %v3565_v63, %v3564_v27 }
 0x21d   : > { %v3567_v31 = vpop.f32.mrf.mxu0  ;;  %v3606_v42 = vadd.f32 %v3605_v12, %v3604_v25  ;;  %v3597_v12 = vadd.f32 %v3596_v24, %v5119_v14 }
 0x21e   : > { %v3607_v55 = vpop.f32.mrf.mxu1 }
 0x21f   : > { %v3568_v37 = vpop.f32.mrf.mxu0  ;;  %v2519_v5 = vadd.f32 %v3606_v42, %v3566_v48 }
 0x220   : > { %v3608_v60 = vpop.f32.mrf.mxu1  ;;  %v3569_v8 = vadd.f32 %v3568_v37, %v3567_v31 }
 0x221   : > { %v3626_v38 = vpop.f32.mrf.mxu0  ;;  %v3609_v63 = vadd.f32 %v3608_v60, %v3607_v55 }
 0x222   : > { %v3644_v22 = vpop.f32.mrf.mxu1 }
 0x223   : > { %v3627_v3 = vpop.f32.mrf.mxu0 }
 0x224   : > { %v3645_v50 = vpop.f32.mrf.mxu1  ;;  %v3628_v52 = vadd.f32 %v3627_v3, %v3626_v38  ;;  %v3600_v3 = vadd.f32 %v5125_v18, %v5121_v15  ;;  %v3563_v15 = vadd.f32 %v5135_v39, %v5131_v28 }
 0x225   : > { %v3629_v59 = vpop.f32.mrf.mxu0  ;;  %v3646_v4 = vadd.f32 %v3645_v50, %v3644_v22  ;;  %v2506_v50 = vadd.f32 %v3597_v12, %v3557_v19 }
 0x226   : > { %v3647_v45 = vpop.f32.mrf.mxu1  ;;  %v2560_v46 = vadd.f32 %v3628_v52, %v2495_v1  ;;  %v2522_v52 = vadd.f32 %v3609_v63, %v3569_v8 }
 0x227   : > { %v3630_v43 = vpop.f32.mrf.mxu0  ;;  %v2584_v26 = vadd.f32 %v3646_v4, %v2519_v5 }
 0x228   : > { %v3648_v61 = vpop.f32.mrf.mxu1  ;;  %v3631_v40 = vadd.f32 %v3630_v43, %v3629_v59  ;;  %v3603_v43 = vadd.f32 %v5133_v21, %v5129_v20 }
 0x229   : > { %v3632_v62 = vpop.f32.mrf.mxu0  ;;  %v3649_v22 = vadd.f32 %v3648_v61, %v3647_v45 }
 0x22a   : > { %v3698_v9 = vpop.f32.mrf.mxu1  ;;  %v2563_v53 = vadd.f32 %v3631_v40, %v2498_v47 }
 0x22b   : > { %v3633_v13 = vpop.f32.mrf.mxu0 }
 0x22c   : > { %v2624_v6 = vpop.f32.mrf.mxu1  ;;  %v3634_v58 = vadd.f32 %v3633_v13, %v3632_v62 }
 0x22d   : > { %v2625_v29 = vadd.f32 %v2624_v6, %v2560_v46  ;;  %v3635_v10 = vpop.f32.mrf.mxu0 }
 0x22e   : > { %v3699_v44 = vpop.f32.mrf.mxu1  ;;  %v2568_v27 = vadd.f32 %v3634_v58, %v2503_v41 }
 0x22f   : > { %v2655_v25 = vmax.f32 %v5082_v16, %v2625_v29  ;;  %v3636_v32 = vpop.f32.mrf.mxu0  ;;  %v3560_v16 = vadd.f32 %v5127_v30, %v5123_v2  ;;  %v2587_v30 = vadd.f32 %v3649_v22, %v2522_v52 }
 0x230   : > { %v2627_v38 = vpop.f32.mrf.mxu1  ;;  %v2633_v37 = vadd.f32 %v3698_v9, %v2568_v27  ;;  %v3637_v56 = vadd.f32 %v3636_v32, %v3635_v10 }
 0x231   : > { %v2670_v31 = vadd.f32 %v5144_v34, %v2655_v25  ;;  %v2628_v51 = vadd.f32 %v2627_v38, %v2563_v53  ;;  %v3638_v24 = vpop.f32.mrf.mxu0 }
 0x232   : > { %v3702_v14 = vpop.f32.mrf.mxu1  ;;  %v2657_v60 = vmax.f32 %v5092_v35, %v2633_v37  ;;  %v2571_v18 = vadd.f32 %v3637_v56, %v2506_v50 }
 0x233   : > { %v3144_v55 = vpack.c.bf16 %v2670_v31, %v2670_v31  ;;  %v2656_v45 = vmax.f32 %v5087_v49, %v2628_v51  ;;  %v2649_v59 = vadd.f32 %v3702_v14, %v2584_v26  ;;  %v3639_v1 = vpop.f32.mrf.mxu0  ;;  %v2511_v49 = vadd.f32 %v3600_v3, %v3560_v16 }
 0x234   : > { %v2640_v2 = vpop.f32.mrf.mxu1  ;;  %v2672_v36 = vadd.f32 %v5144_v34, %v2657_v60  ;;  %v3640_v35 = vadd.f32 %v3639_v1, %v3638_v24  ;;  %v2636_v28 = vadd.f32 %v3699_v44, %v2571_v18 }
 0x235   : > { %2711 = vst.msk [vmem:[%s5157_s9] sm:$0xf] %vm2710_vm1, %v3144_v55  ;;  %v2671_v33 = vadd.f32 %v5144_v34, %v2656_v45  ;;  %v2661_v61 = vmax.f32 %v5112_v17, %v2649_v59  ;;  %v3641_v57 = vpop.f32.mrf.mxu0  ;;  %v2514_v17 = vadd.f32 %v3603_v43, %v3563_v15 }
 0x236   : > { %v3703_v39 = vpop.f32.mrf.mxu1  ;;  %v3146_v11 = vpack.c.bf16 %v2672_v36, %v2672_v36  ;;  %v2658_v48 = vmax.f32 %v5097_v0, %v2636_v28  ;;  %v2576_v9 = vadd.f32 %v3640_v35, %v2511_v49 }
 0x237   : > { %v3145_v40 = vpack.c.bf16 %v2671_v33, %v2671_v33  ;;  %v2676_v46 = vadd.f32 %v5144_v34, %v2661_v61  ;;  %v2652_v42 = vadd.f32 %v3703_v39, %v2587_v30  ;;  %v3642_v62 = vpop.f32.mrf.mxu0 }
 0x238   : > { %2713 = vst.msk [vmem:[%s5157_s9 + $0x8] sm:$0xf] %vm2710_vm1, %v3146_v11  ;;  %v3643_v47 = vadd.f32 %v3642_v62, %v3641_v57  ;;  %v2673_v4 = vadd.f32 %v5144_v34, %v2658_v48  ;;  %v2641_v6 = vadd.f32 %v2640_v2, %v2576_v9  ;;  %v2643_v58 = vpop.f32.mrf.mxu1 }
 0x239   : > { %2712 = vst.msk [vmem:[%s5157_s9 + $0x4] sm:$0xf] %vm2710_vm1, %v3145_v40  ;;  %v3150_v20 = vpack.c.bf16 %v2676_v46, %v2676_v46  ;;  %v2662_v21 = vmax.f32 %v5117_v23, %v2652_v42 }
 0x23a   : > { %v2579_v13 = vadd.f32 %v3643_v47, %v2514_v17  ;;  %v3147_v41 = vpack.c.bf16 %v2673_v4, %v2673_v4  ;;  %v2659_v29 = vmax.f32 %v5102_v7, %v2641_v6 }
 0x23b   : > { %2717 = vst.msk [vmem:[%s5157_s9 + $0x18] sm:$0xf] %vm2710_vm1, %v3150_v20  ;;  %v2677_v0 = vadd.f32 %v5144_v34, %v2662_v21 }
 0x23c   : > { %v2644_v19 = vadd.f32 %v2643_v58, %v2579_v13  ;;  %2714 = vst.msk [vmem:[%s5157_s9 + $0xc] sm:$0xf] %vm2710_vm1, %v3147_v41  ;;  %v2674_v23 = vadd.f32 %v5144_v34, %v2659_v29 }
 0x23d   : > { %v3151_v53 = vpack.c.bf16 %v2677_v0, %v2677_v0 }
 0x23e   : > { %v2660_v5 = vmax.f32 %v5107_v54, %v2644_v19  ;;  %v3148_v8 = vpack.c.bf16 %v2674_v23, %v2674_v23 }
 0x23f   : > { %2718 = vst.msk [vmem:[%s5157_s9 + $0x1c] sm:$0xf] %vm2710_vm1, %v3151_v53 }
 0x240   : > { %v2675_v44 = vadd.f32 %v5144_v34, %v2660_v5  ;;  %2715 = vst.msk [vmem:[%s5157_s9 + $0x10] sm:$0xf] %vm2710_vm1, %v3148_v8 }
 0x242   : > { %v3149_v10 = vpack.c.bf16 %v2675_v44, %v2675_v44 }
 0x244   : > { %2716 = vst.msk [vmem:[%s5157_s9 + $0x14] sm:$0xf] %vm2710_vm1, %v3149_v10 }
 0x245 PF: > { %p10_p9 = scmp.ge.s32.totalorder %s4054_s16, 4   ;;  %s5207_s12 = smov %s4011_s13 }
 0x246   : > { %s5208_s13 = smov %s4063_s19  ;;  %s5209_s14 = smov %s4054_s16 }
 0x247   :  { %12 = sbr.rel (!%p10_p9) target bundleno = 2 (0x2), region = 102 }

// kernel: net_forward.6
= control target key start
LH: loop header
LB: loop body
LE: loop exit
PB: predicated region body
PF: predicated region fallthrough
CT: control target
= control target key end

     0   :  { %vm501_vm0 = vcmask 261120   ;;  %vm1610_vm1 = vcmask 519168   ;;  %s3019_s1 = inlined_call_operand.vmem [shape: bf16[800,64], index: 1, kind: input, shape index: {}]   ;;  %s3020_s0 = inlined_call_operand.vmem [shape: bf16[4,32,800], index: 0, kind: input, shape index: {}]   ;;  %s3021_s2 = inlined_call_operand.vmem [shape: f32[1,64], index: 2, kind: input, shape index: {}]   ;;  %s3022_s3 = inlined_call_operand.vmem [shape: bf16[32,64], index: 3, kind: output, shape index: {}]  }
   0x1   :  { %v2327_v0 = vld [vmem:[%s3019_s1 + $0x78] sm:$0xff]   ;;  %v2350_v4 = vld [vmem:[%s3019_s1 + $0x70] sm:$0xff]   ;;  %v2374_v8 = vld [vmem:[%s3019_s1 + $0x68] sm:$0xff]  }
   0x2   :  { %v2332_v1 = vld [vmem:[%s3019_s1 + $0xf8] sm:$0xff]   ;;  %1790 = vmatprep.subr.bf16.mxu0 %v2327_v0  ;;  %v2356_v5 = vld [vmem:[%s3019_s1 + $0xf0] sm:$0xff]   ;;  %v2380_v9 = vld [vmem:[%s3019_s1 + $0xe8] sm:$0xff]  }
   0x3   :  { %v2338_v2 = vld [vmem:[%s3019_s1 + $0x38] sm:$0xff]   ;;  %1818 = vmatprep.subr.bf16.mxu1 %v2332_v1  ;;  %v2362_v6 = vld [vmem:[%s3019_s1 + $0x30] sm:$0xff]   ;;  %v2386_v10 = vld [vmem:[%s3019_s1 + $0x28] sm:$0xff]  }
   0x4   :  { %v2344_v3 = vld [vmem:[%s3019_s1 + $0xb8] sm:$0xff]   ;;  %1791 = vmatpush3.bf16.msra.mxu0 %v2338_v2  ;;  %v2368_v7 = vld [vmem:[%s3019_s1 + $0xb0] sm:$0xff]   ;;  %v2392_v11 = vld [vmem:[%s3019_s1 + $0xa8] sm:$0xff]  }
   0x5   :  { %1819 = vmatpush3.bf16.msra.mxu1 %v2344_v3  ;;  %1792 = vmatprep.subr.bf16.mxu0 %v2350_v4  ;;  %v2398_v12 = vld [vmem:[%s3019_s1 + $0x60] sm:$0xff]   ;;  %v2422_v16 = vld [vmem:[%s3019_s1 + $0x58] sm:$0xff]   ;;  %v2446_v20 = vld [vmem:[%s3019_s1 + $0x50] sm:$0xff]  }
   0x6   :  { %1820 = vmatprep.subr.bf16.mxu1 %v2356_v5  ;;  %v2404_v13 = vld [vmem:[%s3019_s1 + $0xe0] sm:$0xff]   ;;  %v2428_v17 = vld [vmem:[%s3019_s1 + $0xd8] sm:$0xff]   ;;  %v2452_v21 = vld [vmem:[%s3019_s1 + $0xd0] sm:$0xff]  }
   0x7   :  { %v2410_v14 = vld [vmem:[%s3019_s1 + $0x20] sm:$0xff]   ;;  %v2434_v18 = vld [vmem:[%s3019_s1 + $0x18] sm:$0xff]   ;;  %v2458_v22 = vld [vmem:[%s3019_s1 + $0x10] sm:$0xff]  }
   0x8   :  { %1793 = vmatpush3.bf16.msra.mxu0 %v2362_v6  ;;  %v2416_v15 = vld [vmem:[%s3019_s1 + $0xa0] sm:$0xff]   ;;  %v2440_v19 = vld [vmem:[%s3019_s1 + $0x98] sm:$0xff]   ;;  %v2464_v23 = vld [vmem:[%s3019_s1 + $0x90] sm:$0xff]  }
   0x9   :  { %1821 = vmatpush3.bf16.msra.mxu1 %v2368_v7  ;;  %1794 = vmatprep.subr.bf16.mxu0 %v2374_v8  ;;  %v2470_v24 = vld [vmem:[%s3019_s1 + $0x48] sm:$0xff]   ;;  %v2494_v28 = vld [vmem:[%s3019_s1 + $0x40] sm:$0xff]   ;;  %v2531_v36 = vld [vmem:[%s3019_s1 + $0x178] sm:$0xff]  }
   0xa   :  { %1822 = vmatprep.subr.bf16.mxu1 %v2380_v9  ;;  %v2476_v25 = vld [vmem:[%s3019_s1 + $0xc8] sm:$0xff]   ;;  %v2500_v29 = vld [vmem:[%s3019_s1 + $0xc0] sm:$0xff]   ;;  %v2542_v38 = vld [vmem:[%s3019_s1 + $0x138] sm:$0xff]  }
   0xb   :  { %v2482_v26 = vld [vmem:[%s3019_s1 + $0x8] sm:$0xff]   ;;  %v2506_v30 = vld [vmem:[%s3019_s1] sm:$0xff]   ;;  %v2548_v39 = vld [vmem:[%s3019_s1 + $0x170] sm:$0xff]  }
   0xc   :  { %1795 = vmatpush3.bf16.msra.mxu0 %v2386_v10  ;;  %v2488_v27 = vld [vmem:[%s3019_s1 + $0x88] sm:$0xff]   ;;  %v2512_v31 = vld [vmem:[%s3019_s1 + $0x80] sm:$0xff]   ;;  %v2555_v40 = vld [vmem:[%s3019_s1 + $0x130] sm:$0xff]  }
   0xd   :  { %1823 = vmatpush3.bf16.msra.mxu1 %v2392_v11  ;;  %1796 = vmatprep.subr.bf16.mxu0 %v2398_v12  ;;  %v2206_v32 = vld [vmem:[%s3020_s0] ss:$28 sps:$4 sm:$0xff]   ;;  %v2209_v34 = vld [vmem:[%s3020_s0 + $0x8] ss:$28 sps:$4 sm:$0xff]   ;;  %v2221_v43 = vld [vmem:[%s3020_s0 + $0x38] ss:$28 sps:$4 sm:$0xff]  }
   0xe   :  { %1824 = vmatprep.subr.bf16.mxu1 %v2404_v13  ;;  %v2208_v33 = vld [vmem:[%s3020_s0 + $0x4] ss:$28 sps:$4 sm:$0xff]   ;;  %v2211_v35 = vld [vmem:[%s3020_s0 + $0xc] ss:$28 sps:$4 sm:$0xff]   ;;  %v2217_v41 = vld [vmem:[%s3020_s0 + $0x3c] ss:$28 sps:$4 sm:$0xff]  }
   0xf   :  { %540 = vmatprep.mubr.bf16.mxu0 %v2208_v33  ;;  %589 = vmatprep.mubr.bf16.mxu1 %v2211_v35  ;;  %v2536_v37 = vld [vmem:[%s3019_s1 + $0x188] sm:$0xff]   ;;  %v2219_v42 = vld [vmem:[%s3020_s0 + $0x44] ss:$28 sps:$4 sm:$0xff]   ;;  %v2228_v50 = vld [vmem:[%s3020_s0 + $0x18] ss:$28 sps:$4 sm:$0xff]  }
  0x10   :  { %1797 = vmatpush3.bf16.msra.mxu0 %v2410_v14  ;;  %v2222_v44 = vld [vmem:[%s3020_s0 + $0x40] ss:$28 sps:$4 sm:$0xff]   ;;  %v2574_v45 = vld [vmem:[%s3019_s1 + $0x168] sm:$0xff]   ;;  %v2624_v54 = vld [vmem:[%s3019_s1 + $0x150] sm:$0xff]  }
  0x11   :  { %1825 = vmatpush3.bf16.msra.mxu1 %v2416_v15  ;;  %1798 = vmatprep.subr.bf16.mxu0 %v2422_v16  ;;  %v2579_v46 = vld [vmem:[%s3019_s1 + $0x180] sm:$0xff]   ;;  %v2585_v47 = vld [vmem:[%s3019_s1 + $0x128] sm:$0xff]   ;;  %v2608_v51 = vld [vmem:[%s3019_s1 + $0x158] sm:$0xff]  }
  0x12   :  { %1826 = vmatprep.subr.bf16.mxu1 %v2428_v17  ;;  %v2591_v48 = vld [vmem:[%s3019_s1 + $0x160] sm:$0xff]   ;;  %v2230_v52 = vld [vmem:[%s3020_s0 + $0x50] ss:$28 sps:$4 sm:$0xff]   ;;  %v2618_v53 = vld [vmem:[%s3019_s1 + $0x118] sm:$0xff]  }
  0x13   :  { %v2598_v49 = vld [vmem:[%s3019_s1 + $0x120] sm:$0xff]   ;;  %v2633_v55 = vld [vmem:[%s3019_s1 + $0x110] sm:$0xff]   ;;  %v2639_v56 = vld [vmem:[%s3019_s1 + $0x148] sm:$0xff]  }
  0x14   :  { %1799 = vmatpush3.bf16.msra.mxu0 %v2434_v18  ;;  %v2240_v57 = vld [vmem:[%s3020_s0 + $0x14] ss:$28 sps:$4 sm:$0xff]   ;;  %v2650_v58 = vld [vmem:[%s3019_s1 + $0x108] sm:$0xff]   ;;  %v2656_v59 = vld [vmem:[%s3019_s1 + $0x140] sm:$0xff]  }
  0x15   :  { %1827 = vmatpush3.bf16.msra.mxu1 %v2440_v19  ;;  %1800 = vmatprep.subr.bf16.mxu0 %v2446_v20  ;;  %v2246_v60 = vld [vmem:[%s3020_s0 + $0x74] ss:$28 sps:$4 sm:$0xff]   ;;  %v2667_v61 = vld [vmem:[%s3019_s1 + $0x100] sm:$0xff]   ;;  %v2241_v63 = vld [vmem:[%s3020_s0 + $0x4c] ss:$28 sps:$4 sm:$0xff]  }
  0x16   :  { %1828 = vmatprep.subr.bf16.mxu1 %v2452_v21  ;;  %v2238_v62 = vld [vmem:[%s3020_s0 + $0x10] ss:$28 sps:$4 sm:$0xff]   ;;  %v2249_v33 = vld [vmem:[%s3020_s0 + $0x7c] ss:$28 sps:$4 sm:$0xff]  }
  0x17   :  { %v2250_v35 = vld [vmem:[%s3020_s0 + $0xac] ss:$28 sps:$4 sm:$0xff]  }
  0x18   :  { %1801 = vmatpush3.bf16.msra.mxu0 %v2458_v22 }
  0x19   :  { %1829 = vmatpush3.bf16.msra.mxu1 %v2464_v23  ;;  %1802 = vmatprep.subr.bf16.mxu0 %v2470_v24 }
  0x1a   :  { %1830 = vmatprep.subr.bf16.mxu1 %v2476_v25 }
  0x1c   :  { %1803 = vmatpush3.bf16.msra.mxu0 %v2482_v26 }
  0x1d   :  { %1831 = vmatpush3.bf16.msra.mxu1 %v2488_v27  ;;  %1804 = vmatprep.subr.bf16.mxu0 %v2494_v28 }
  0x1e   :  { %1832 = vmatprep.subr.bf16.mxu1 %v2500_v29 }
  0x20   :  { %1805 = vmatpush3.bf16.msra.mxu0 %v2506_v30 }
  0x21   :  { %1833 = vmatpush3.bf16.msra.mxu1 %v2512_v31  ;;  %1846 = vmatprep.subr.bf16.mxu0 %v2531_v36 }
  0x22   :  { %2142 = vmatprep.subr.bf16.mxu1 %v2536_v37 }
  0x23   :  { %541 = vmatmul.mubr.bf16.vlgmr.msra.gmra.mxu0 %v2206_v32  ;;  %v2243_v32 = vld [vmem:[%s3020_s0 + $0x48] ss:$28 sps:$4 sm:$0xff]  }
  0x24   :  { %590 = vmatmul.mubr.bf16.vlgmr.msra.gmra.mxu1 %v2209_v34  ;;  %1847 = vmatpush3.bf16.msra.mxu0 %v2542_v38  ;;  %v2244_v34 = vld [vmem:[%s3020_s0 + $0x70] ss:$28 sps:$4 sm:$0xff]  }
  0x25   :  { %2143 = vmatpush3.bf16.msra.mxu1 %v2536_v37  ;;  %1848 = vmatprep.subr.bf16.mxu0 %v2548_v39 }
  0x26   :  { %548 = vmatprep.mubr.bf16.mxu0 %v2217_v41  ;;  %597 = vmatprep.mubr.bf16.mxu1 %v2219_v42  ;;  %v2252_v41 = vld [vmem:[%s3020_s0 + $0xa8] ss:$28 sps:$4 sm:$0xff]  }
  0x27   :  { %2144 = vmatprep.subr.bf16.mxu1 %v2579_v46  ;;  %v2258_v42 = vld [vmem:[%s3020_s0 + $0x84] ss:$28 sps:$4 sm:$0xff]  }
  0x28   :  { %1849 = vmatpush3.bf16.msra.mxu0 %v2555_v40 }
  0x29   :  { %1850 = vmatprep.subr.bf16.mxu0 %v2574_v45  ;;  %2145 = vmatpush3.bf16.msra.mxu1 %v2579_v46 }
  0x2a   :  { %1878 = vmatprep.subr.bf16.mxu1 %v2327_v0 }
  0x2b   :  { %549 = vmatmul.mubr.bf16.gmra.mxu0 %v2221_v43  ;;  %v2247_v43 = vld [vmem:[%s3020_s0 + $0x78] ss:$28 sps:$4 sm:$0xff]  }
  0x2c   :  { %598 = vmatmul.mubr.bf16.gmra.mxu1 %v2222_v44  ;;  %1851 = vmatpush3.bf16.msra.mxu0 %v2585_v47  ;;  %v2253_v44 = vld [vmem:[%s3020_s0 + $0xb4] ss:$28 sps:$4 sm:$0xff]  }
  0x2d   :  { %1852 = vmatprep.subr.bf16.mxu0 %v2591_v48  ;;  %2146 = vmatprep.mubr.msk.bf16.mxu1 %vm501_vm0, %v2228_v50  ;;  %v2255_v50 = vld [vmem:[%s3020_s0 + $0xb0] ss:$28 sps:$4 sm:$0xff]  }
  0x2e   :  { %638 = vmatprep.mubr.bf16.mxu0 %v2240_v57  ;;  %v2256_v57 = vld [vmem:[%s3020_s0 + $0x80] ss:$28 sps:$4 sm:$0xff]  }
  0x30   :  { %1853 = vmatpush3.bf16.msra.mxu0 %v2598_v49 }
  0x31   :  { %1854 = vmatprep.subr.bf16.mxu0 %v2608_v51 }
  0x34   :  { %2147 = vmatmul.mubr.msk.bf16.vlgmr.msra.gmra.mxu1 %vm501_vm0, %v2230_v52  ;;  %1855 = vmatpush3.bf16.msra.mxu0 %v2618_v53  ;;  %v2259_v52 = vld [vmem:[%s3020_s0 + $0x88] ss:$28 sps:$4 sm:$0xff]  }
  0x35   :  { %1879 = vmatpush3.bf16.msra.mxu1 %v2338_v2  ;;  %1856 = vmatprep.subr.bf16.mxu0 %v2624_v54 }
  0x36   :  { %1880 = vmatprep.subr.bf16.mxu1 %v2350_v4  ;;  %829 = vmatprep.mubr.bf16.mxu1 %v2246_v60  ;;  %v2260_v60 = vld [vmem:[%s3020_s0 + $0xc0] ss:$28 sps:$4 sm:$0xff]  }
  0x38   :  { %1857 = vmatpush3.bf16.msra.mxu0 %v2633_v55 }
  0x39   :  { %1881 = vmatpush3.bf16.msra.mxu1 %v2362_v6  ;;  %1858 = vmatprep.subr.bf16.mxu0 %v2639_v56 }
  0x3a   :  { %1882 = vmatprep.subr.bf16.mxu1 %v2374_v8 }
  0x3c   :  { %1859 = vmatpush3.bf16.msra.mxu0 %v2650_v58 }
  0x3d   :  { %1883 = vmatpush3.bf16.msra.mxu1 %v2386_v10  ;;  %1860 = vmatprep.subr.bf16.mxu0 %v2656_v59 }
  0x3e   :  { %1884 = vmatprep.subr.bf16.mxu1 %v2398_v12 }
  0x40   :  { %1861 = vmatpush3.bf16.msra.mxu0 %v2667_v61 }
  0x41   :  { %1885 = vmatpush3.bf16.msra.mxu1 %v2410_v14  ;;  %1906 = vmatprep.subr.bf16.mxu0 %v2332_v1 }
  0x42   :  { %1886 = vmatprep.subr.bf16.mxu1 %v2422_v16 }
  0x43   :  { %639 = vmatmul.mubr.bf16.vlgmr.msra.gmra.mxu0 %v2238_v62  ;;  %v2261_v62 = vld [vmem:[%s3020_s0 + $0xbc] ss:$28 sps:$4 sm:$0xff]  }
  0x44   :  { %1907 = vmatpush3.bf16.msra.mxu0 %v2344_v3  ;;  %646 = vmatprep.mubr.bf16.mxu0 %v2241_v63  ;;  %v2266_v63 = vld [vmem:[%s3020_s0 + $0xe4] ss:$28 sps:$4 sm:$0xff]  }
  0x45   :  { %1887 = vmatpush3.bf16.msra.mxu1 %v2434_v18  ;;  %1908 = vmatprep.subr.bf16.mxu0 %v2356_v5 }
  0x46   :  { %1888 = vmatprep.subr.bf16.mxu1 %v2446_v20 }
  0x48   :  { %1909 = vmatpush3.bf16.msra.mxu0 %v2368_v7 }
  0x49   :  { %1889 = vmatpush3.bf16.msra.mxu1 %v2458_v22  ;;  %1910 = vmatprep.subr.bf16.mxu0 %v2380_v9 }
  0x4a   :  { %1890 = vmatprep.subr.bf16.mxu1 %v2470_v24 }
  0x4b   :  { %647 = vmatmul.mubr.bf16.gmra.mxu0 %v2243_v32  ;;  %v2263_v32 = vld [vmem:[%s3020_s0 + $0xb8] ss:$28 sps:$4 sm:$0xff]  }
  0x4c   :  { %1911 = vmatpush3.bf16.msra.mxu0 %v2392_v11  ;;  %878 = vmatprep.mubr.bf16.mxu0 %v2249_v33  ;;  %v2269_v33 = vld [vmem:[%s3020_s0 + $0xec] ss:$28 sps:$4 sm:$0xff]  }
  0x4d   :  { %1891 = vmatpush3.bf16.msra.mxu1 %v2482_v26  ;;  %1912 = vmatprep.subr.bf16.mxu0 %v2404_v13 }
  0x4e   :  { %1892 = vmatprep.subr.bf16.mxu1 %v2494_v28 }
  0x50   :  { %1913 = vmatpush3.bf16.msra.mxu0 %v2416_v15 }
  0x51   :  { %1893 = vmatpush3.bf16.msra.mxu1 %v2506_v30  ;;  %1914 = vmatprep.subr.bf16.mxu0 %v2428_v17 }
  0x52   :  { %1934 = vmatprep.subr.bf16.mxu1 %v2531_v36 }
  0x54   :  { %830 = vmatmul.mubr.bf16.vlgmr.msra.gmra.mxu1 %v2244_v34  ;;  %1915 = vmatpush3.bf16.msra.mxu0 %v2440_v19  ;;  %v2267_v34 = vld [vmem:[%s3020_s0 + $0xe8] ss:$28 sps:$4 sm:$0xff]  }
  0x55   :  { %1935 = vmatpush3.bf16.msra.mxu1 %v2542_v38  ;;  %837 = vmatprep.mubr.bf16.mxu1 %v2250_v35  ;;  %v2264_v35 = vld [vmem:[%s3020_s0 + $0xe0] ss:$28 sps:$4 sm:$0xff]  }
  0x56   :  { %1936 = vmatprep.subr.bf16.mxu1 %v2548_v39  ;;  %1916 = vmatprep.subr.bf16.mxu0 %v2452_v21 }
  0x58   :  { %1917 = vmatpush3.bf16.msra.mxu0 %v2464_v23 }
  0x59   :  { %1937 = vmatpush3.bf16.msra.mxu1 %v2555_v40  ;;  %1918 = vmatprep.subr.bf16.mxu0 %v2476_v25 }
  0x5a   :  { %1938 = vmatprep.subr.bf16.mxu1 %v2574_v45 }
  0x5c   :  { %838 = vmatmul.mubr.bf16.gmra.mxu1 %v2252_v41  ;;  %1919 = vmatpush3.bf16.msra.mxu0 %v2488_v27  ;;  %v2270_v41 = vld [vmem:[%s3020_s0 + $0x11c] ss:$28 sps:$4 sm:$0xff]  }
  0x5d   :  { %1939 = vmatpush3.bf16.msra.mxu1 %v2585_v47  ;;  %927 = vmatprep.mubr.bf16.mxu1 %v2258_v42  ;;  %v2272_v42 = vld [vmem:[%s3020_s0 + $0x124] ss:$28 sps:$4 sm:$0xff]  }
  0x5e   :  { %1940 = vmatprep.subr.bf16.mxu1 %v2591_v48  ;;  %1920 = vmatprep.subr.bf16.mxu0 %v2500_v29 }
  0x60   :  { %1921 = vmatpush3.bf16.msra.mxu0 %v2512_v31 }
  0x61   :  { %1941 = vmatpush3.bf16.msra.mxu1 %v2598_v49  ;;  %2150 = vmatprep.subr.bf16.mxu0 %v2536_v37 }
  0x62   :  { %1942 = vmatprep.subr.bf16.mxu1 %v2608_v51 }
  0x63   :  { %879 = vmatmul.mubr.bf16.vlgmr.msra.gmra.mxu0 %v2247_v43  ;;  %v2275_v43 = vld [vmem:[%s3020_s0 + $0x120] ss:$28 sps:$4 sm:$0xff]  }
  0x64   :  { %886 = vmatprep.mubr.bf16.mxu0 %v2253_v44  ;;  %2151 = vmatpush3.bf16.msra.mxu0 %v2536_v37  ;;  %v2274_v44 = vld [vmem:[%s3020_s0 + $0x118] ss:$28 sps:$4 sm:$0xff]  }
  0x65   :  { %1943 = vmatpush3.bf16.msra.mxu1 %v2618_v53  ;;  %2152 = vmatprep.subr.bf16.mxu0 %v2579_v46 }
  0x66   :  { %1944 = vmatprep.subr.bf16.mxu1 %v2624_v54 }
  0x68   :  { %2153 = vmatpush3.bf16.msra.mxu0 %v2579_v46 }
  0x69   :  { %1945 = vmatpush3.bf16.msra.mxu1 %v2633_v55  ;;  %1966 = vmatprep.subr.bf16.mxu0 %v2327_v0 }
  0x6a   :  { %1946 = vmatprep.subr.bf16.mxu1 %v2639_v56 }
  0x6b   :  { %887 = vmatmul.mubr.bf16.gmra.mxu0 %v2255_v50  ;;  %v2276_v50 = vld [vmem:[%s3020_s0 + $0xf8] ss:$28 sps:$4 sm:$0xff]  }
  0x6c   :  { %2154 = vmatprep.mubr.msk.bf16.mxu0 %vm501_vm0, %v2259_v52  ;;  %v2280_v52 = vld [vmem:[%s3020_s0 + $0xf4] ss:$28 sps:$4 sm:$0xff]  }
  0x6d   :  { %1947 = vmatpush3.bf16.msra.mxu1 %v2650_v58 }
  0x6e   :  { %1948 = vmatprep.subr.bf16.mxu1 %v2656_v59 }
  0x71   :  { %1949 = vmatpush3.bf16.msra.mxu1 %v2667_v61 }
  0x72   :  { %1994 = vmatprep.subr.bf16.mxu1 %v2332_v1 }
  0x73   :  { %2155 = vmatmul.mubr.msk.bf16.vlgmr.msra.gmra.mxu0 %vm501_vm0, %v2260_v60 }
  0x74   :  { %928 = vmatmul.mubr.bf16.vlgmr.msra.gmra.mxu1 %v2256_v57  ;;  %1967 = vmatpush3.bf16.msra.mxu0 %v2338_v2  ;;  %v2277_v57 = vld [vmem:[%s3020_s0 + $0x130] ss:$28 sps:$4 sm:$0xff]  }
  0x75   :  { %1995 = vmatpush3.bf16.msra.mxu1 %v2344_v3  ;;  %1968 = vmatprep.subr.bf16.mxu0 %v2350_v4 }
  0x76   :  { %1996 = vmatprep.subr.bf16.mxu1 %v2356_v5  ;;  %935 = vmatprep.mubr.bf16.mxu1 %v2261_v62 }
  0x77   :  { %1122 = vmatprep.mubr.bf16.mxu0 %v2266_v63 }
  0x78   :  { %1969 = vmatpush3.bf16.msra.mxu0 %v2362_v6 }
  0x79   :  { %1997 = vmatpush3.bf16.msra.mxu1 %v2368_v7  ;;  %1970 = vmatprep.subr.bf16.mxu0 %v2374_v8 }
  0x7a   :  { %1998 = vmatprep.subr.bf16.mxu1 %v2380_v9 }
  0x7c   :  { %936 = vmatmul.mubr.bf16.gmra.mxu1 %v2263_v32  ;;  %1971 = vmatpush3.bf16.msra.mxu0 %v2386_v10 }
  0x7d   :  { %1999 = vmatpush3.bf16.msra.mxu1 %v2392_v11  ;;  %1171 = vmatprep.mubr.bf16.mxu1 %v2269_v33 }
  0x7e   :  { %2000 = vmatprep.subr.bf16.mxu1 %v2404_v13  ;;  %1972 = vmatprep.subr.bf16.mxu0 %v2398_v12 }
  0x80   :  { %1973 = vmatpush3.bf16.msra.mxu0 %v2410_v14 }
  0x81   :  { %2001 = vmatpush3.bf16.msra.mxu1 %v2416_v15  ;;  %1974 = vmatprep.subr.bf16.mxu0 %v2422_v16 }
  0x82   :  { %2002 = vmatprep.subr.bf16.mxu1 %v2428_v17 }
  0x84   :  { %1975 = vmatpush3.bf16.msra.mxu0 %v2434_v18 }
  0x85   :  { %2003 = vmatpush3.bf16.msra.mxu1 %v2440_v19  ;;  %1976 = vmatprep.subr.bf16.mxu0 %v2446_v20 }
  0x86   :  { %2004 = vmatprep.subr.bf16.mxu1 %v2452_v21 }
  0x88   :  { %1977 = vmatpush3.bf16.msra.mxu0 %v2458_v22 }
  0x89   :  { %2005 = vmatpush3.bf16.msra.mxu1 %v2464_v23  ;;  %1978 = vmatprep.subr.bf16.mxu0 %v2470_v24 }
  0x8a   :  { %2006 = vmatprep.subr.bf16.mxu1 %v2476_v25 }
  0x8c   :  { %1979 = vmatpush3.bf16.msra.mxu0 %v2482_v26 }
  0x8d   :  { %2007 = vmatpush3.bf16.msra.mxu1 %v2488_v27  ;;  %1980 = vmatprep.subr.bf16.mxu0 %v2494_v28 }
  0x8e   :  { %2008 = vmatprep.subr.bf16.mxu1 %v2500_v29 }
  0x90   :  { %1981 = vmatpush3.bf16.msra.mxu0 %v2506_v30 }
  0x91   :  { %2009 = vmatpush3.bf16.msra.mxu1 %v2512_v31  ;;  %2022 = vmatprep.subr.bf16.mxu0 %v2531_v36 }
  0x92   :  { %2158 = vmatprep.subr.bf16.mxu1 %v2536_v37 }
  0x93   :  { %1123 = vmatmul.mubr.bf16.vlgmr.msra.gmra.mxu0 %v2264_v35 }
  0x94   :  { %1172 = vmatmul.mubr.bf16.vlgmr.msra.gmra.mxu1 %v2267_v34  ;;  %2023 = vmatpush3.bf16.msra.mxu0 %v2542_v38 }
  0x95   :  { %2159 = vmatpush3.bf16.msra.mxu1 %v2536_v37  ;;  %1130 = vmatprep.mubr.bf16.mxu0 %v2270_v41 }
  0x96   :  { %2024 = vmatprep.subr.bf16.mxu0 %v2548_v39  ;;  %1179 = vmatprep.mubr.bf16.mxu1 %v2272_v42 }
  0x97   :  { %2160 = vmatprep.subr.bf16.mxu1 %v2579_v46 }
  0x98   :  { %2025 = vmatpush3.bf16.msra.mxu0 %v2555_v40 }
  0x99   :  { %2161 = vmatpush3.bf16.msra.mxu1 %v2579_v46  ;;  %2026 = vmatprep.subr.bf16.mxu0 %v2574_v45 }
  0x9a   :  { %2054 = vmatprep.subr.bf16.mxu1 %v2327_v0  ;;  %v2286_v0 = vld [vmem:[%s3020_s0 + $0x154] ss:$28 sps:$4 sm:$0xff]  }
  0x9b   :  { %1131 = vmatmul.mubr.bf16.gmra.mxu0 %v2274_v44 }
  0x9c   :  { %1180 = vmatmul.mubr.bf16.gmra.mxu1 %v2275_v43  ;;  %2027 = vmatpush3.bf16.msra.mxu0 %v2585_v47 }
  0x9d   :  { %2162 = vmatprep.mubr.msk.bf16.mxu1 %vm501_vm0, %v2276_v50  ;;  %1220 = vmatprep.mubr.bf16.mxu0 %v2280_v52 }
  0x9e   :  { %2028 = vmatprep.subr.bf16.mxu0 %v2591_v48 }
  0xa0   :  { %2029 = vmatpush3.bf16.msra.mxu0 %v2598_v49 }
  0xa1   :  { %2030 = vmatprep.subr.bf16.mxu0 %v2608_v51 }
  0xa4   :  { %2163 = vmatmul.mubr.msk.bf16.vlgmr.msra.gmra.mxu1 %vm501_vm0, %v2277_v57  ;;  %2031 = vmatpush3.bf16.msra.mxu0 %v2618_v53 }
  0xa5   :  { %2055 = vmatpush3.bf16.msra.mxu1 %v2338_v2  ;;  %1415 = vmatprep.mubr.bf16.mxu1 %v2286_v0  ;;  %v2278_v2 = vld [vmem:[%s3020_s0 + $0xf0] ss:$28 sps:$4 sm:$0xff]  }
  0xa6   :  { %2056 = vmatprep.subr.bf16.mxu1 %v2350_v4  ;;  %2032 = vmatprep.subr.bf16.mxu0 %v2624_v54  ;;  %v2281_v4 = vld [vmem:[%s3020_s0 + $0x12c] ss:$28 sps:$4 sm:$0xff]  }
  0xa8   :  { %2033 = vmatpush3.bf16.msra.mxu0 %v2633_v55 }
  0xa9   :  { %2057 = vmatpush3.bf16.msra.mxu1 %v2362_v6  ;;  %2034 = vmatprep.subr.bf16.mxu0 %v2639_v56  ;;  %v2290_v6 = vld [vmem:[%s3020_s0 + $0x18c] ss:$28 sps:$4 sm:$0xff]  }
  0xaa   :  { %2058 = vmatprep.subr.bf16.mxu1 %v2374_v8  ;;  %v2298_v8 = vld [vmem:[%s3020_s0 + $0x164] ss:$28 sps:$4 sm:$0xff]  }
  0xac   :  { %2035 = vmatpush3.bf16.msra.mxu0 %v2650_v58 }
  0xad   :  { %2059 = vmatpush3.bf16.msra.mxu1 %v2386_v10  ;;  %2036 = vmatprep.subr.bf16.mxu0 %v2656_v59  ;;  %v2293_v10 = vld [vmem:[%s3020_s0 + $0x194] ss:$28 sps:$4 sm:$0xff]  }
  0xae   :  { %2060 = vmatprep.subr.bf16.mxu1 %v2398_v12  ;;  %v2299_v12 = vld [vmem:[%s3020_s0 + $0x168] ss:$28 sps:$4 sm:$0xff]  }
  0xb0   :  { %2037 = vmatpush3.bf16.msra.mxu0 %v2667_v61 }
  0xb1   :  { %2061 = vmatpush3.bf16.msra.mxu1 %v2410_v14  ;;  %2082 = vmatprep.subr.bf16.mxu0 %v2332_v1  ;;  %v2283_v1 = vld [vmem:[%s3020_s0 + $0x128] ss:$28 sps:$4 sm:$0xff]   ;;  %v2300_v14 = vld [vmem:[%s3020_s0 + $0x1a0] ss:$28 sps:$4 sm:$0xff]  }
  0xb2   :  { %2062 = vmatprep.subr.bf16.mxu1 %v2422_v16 }
  0xb3   :  { %1221 = vmatmul.mubr.bf16.vlgmr.msra.gmra.mxu0 %v2278_v2 }
  0xb4   :  { %2083 = vmatpush3.bf16.msra.mxu0 %v2344_v3  ;;  %1228 = vmatprep.mubr.bf16.mxu0 %v2281_v4  ;;  %v2289_v3 = vld [vmem:[%s3020_s0 + $0x15c] ss:$28 sps:$4 sm:$0xff]  }
  0xb5   :  { %2063 = vmatpush3.bf16.msra.mxu1 %v2434_v18  ;;  %2084 = vmatprep.subr.bf16.mxu0 %v2356_v5  ;;  %v2284_v5 = vld [vmem:[%s3020_s0 + $0x150] ss:$28 sps:$4 sm:$0xff]  }
  0xb6   :  { %2064 = vmatprep.subr.bf16.mxu1 %v2446_v20 }
  0xb8   :  { %2085 = vmatpush3.bf16.msra.mxu0 %v2368_v7  ;;  %v2292_v7 = vld [vmem:[%s3020_s0 + $0x188] ss:$28 sps:$4 sm:$0xff]  }
  0xb9   :  { %2065 = vmatpush3.bf16.msra.mxu1 %v2458_v22  ;;  %2086 = vmatprep.subr.bf16.mxu0 %v2380_v9  ;;  %v2287_v9 = vld [vmem:[%s3020_s0 + $0x158] ss:$28 sps:$4 sm:$0xff]  }
  0xba   :  { %2066 = vmatprep.subr.bf16.mxu1 %v2470_v24  ;;  %v2303_v24 = vld [vmem:[%s3020_s0 + $0x198] ss:$28 sps:$4 sm:$0xff]  }
  0xbb   :  { %1229 = vmatmul.mubr.bf16.gmra.mxu0 %v2283_v1 }
  0xbc   :  { %2087 = vmatpush3.bf16.msra.mxu0 %v2392_v11  ;;  %1464 = vmatprep.mubr.bf16.mxu0 %v2289_v3  ;;  %v2295_v11 = vld [vmem:[%s3020_s0 + $0x190] ss:$28 sps:$4 sm:$0xff]  }
  0xbd   :  { %2067 = vmatpush3.bf16.msra.mxu1 %v2482_v26  ;;  %2088 = vmatprep.subr.bf16.mxu0 %v2404_v13  ;;  %v2296_v13 = vld [vmem:[%s3020_s0 + $0x160] ss:$28 sps:$4 sm:$0xff]  }
  0xbe   :  { %2068 = vmatprep.subr.bf16.mxu1 %v2494_v28 }
  0xc0   :  { %2089 = vmatpush3.bf16.msra.mxu0 %v2416_v15  ;;  %v2301_v15 = vld [vmem:[%s3020_s0 + $0x19c] ss:$28 sps:$4 sm:$0xff]  }
  0xc1   :  { %2069 = vmatpush3.bf16.msra.mxu1 %v2506_v30  ;;  %2090 = vmatprep.subr.bf16.mxu0 %v2428_v17 }
  0xc2   :  { %2110 = vmatprep.subr.bf16.mxu1 %v2531_v36 }
  0xc4   :  { %1416 = vmatmul.mubr.bf16.vlgmr.msra.gmra.mxu1 %v2284_v5  ;;  %2091 = vmatpush3.bf16.msra.mxu0 %v2440_v19 }
  0xc5   :  { %2111 = vmatpush3.bf16.msra.mxu1 %v2542_v38  ;;  %1423 = vmatprep.mubr.bf16.mxu1 %v2290_v6 }
  0xc6   :  { %2112 = vmatprep.subr.bf16.mxu1 %v2548_v39  ;;  %2092 = vmatprep.subr.bf16.mxu0 %v2452_v21 }
  0xc8   :  { %2093 = vmatpush3.bf16.msra.mxu0 %v2464_v23 }
  0xc9   :  { %2113 = vmatpush3.bf16.msra.mxu1 %v2555_v40  ;;  %2094 = vmatprep.subr.bf16.mxu0 %v2476_v25 }
  0xca   :  { %2114 = vmatprep.subr.bf16.mxu1 %v2574_v45 }
  0xcc   :  { %1424 = vmatmul.mubr.bf16.gmra.mxu1 %v2292_v7  ;;  %2095 = vmatpush3.bf16.msra.mxu0 %v2488_v27 }
  0xcd   :  { %2115 = vmatpush3.bf16.msra.mxu1 %v2585_v47  ;;  %1513 = vmatprep.mubr.bf16.mxu1 %v2298_v8 }
  0xce   :  { %2116 = vmatprep.subr.bf16.mxu1 %v2591_v48  ;;  %2096 = vmatprep.subr.bf16.mxu0 %v2500_v29 }
  0xd0   :  { %2097 = vmatpush3.bf16.msra.mxu0 %v2512_v31 }
  0xd1   :  { %2117 = vmatpush3.bf16.msra.mxu1 %v2598_v49  ;;  %2166 = vmatprep.subr.bf16.mxu0 %v2536_v37 }
  0xd2   :  { %2118 = vmatprep.subr.bf16.mxu1 %v2608_v51 }
  0xd3   :  { %1465 = vmatmul.mubr.bf16.vlgmr.msra.gmra.mxu0 %v2287_v9 }
  0xd4   :  { %1472 = vmatprep.mubr.bf16.mxu0 %v2293_v10  ;;  %2167 = vmatpush3.bf16.msra.mxu0 %v2536_v37 }
  0xd5   :  { %2119 = vmatpush3.bf16.msra.mxu1 %v2618_v53  ;;  %2168 = vmatprep.subr.bf16.mxu0 %v2579_v46 }
  0xd6   :  { %2120 = vmatprep.subr.bf16.mxu1 %v2624_v54 }
  0xd8   :  { %2169 = vmatpush3.bf16.msra.mxu0 %v2579_v46 }
  0xd9   :  { %2121 = vmatpush3.bf16.msra.mxu1 %v2633_v55 }
  0xda   :  { %2122 = vmatprep.subr.bf16.mxu1 %v2639_v56 }
  0xdb   :  { %1473 = vmatmul.mubr.bf16.gmra.mxu0 %v2295_v11 }
  0xdc   :  { %2170 = vmatprep.mubr.msk.bf16.mxu0 %vm501_vm0, %v2299_v12 }
  0xdd   :  { %2123 = vmatpush3.bf16.msra.mxu1 %v2650_v58 }
  0xde   :  { %2124 = vmatprep.subr.bf16.mxu1 %v2656_v59 }
  0xe1   :  { %2125 = vmatpush3.bf16.msra.mxu1 %v2667_v61 }
  0xe3   :  { %v1806_v16 = vpop.f32.mrf.mxu0  ;;  %2171 = vmatmul.mubr.msk.bf16.vlgmr.msra.gmra.mxu0 %vm501_vm0, %v2300_v14 }
  0xe4   :  { %1514 = vmatmul.mubr.bf16.vlgmr.msra.gmra.mxu1 %v2296_v13  ;;  %v1834_v17 = vpop.f32.mrf.mxu1 }
  0xe5   :  { %v1807_v18 = vpop.f32.mrf.mxu0  ;;  %1521 = vmatprep.mubr.bf16.mxu1 %v2301_v15 }
  0xe6   :  { %v1808_v19 = vadd.f32 %v1807_v18, %v1806_v16  ;;  %v1835_v20 = vpop.f32.mrf.mxu1 }
  0xe7   :  { %v1836_v21 = vadd.f32 %v1835_v20, %v1834_v17  ;;  %v1809_v22 = vpop.f32.mrf.mxu0 }
  0xe8   :  { %v1837_v23 = vpop.f32.mrf.mxu1 }
  0xe9   :  { %v592_v25 = vadd.f32 %v1836_v21, %v1808_v19  ;;  %v1810_v26 = vpop.f32.mrf.mxu0 }
  0xea   :  { %v1811_v27 = vadd.f32 %v1810_v26, %v1809_v22  ;;  %v1838_v28 = vpop.f32.mrf.mxu1 }
  0xeb   :  { %v1839_v29 = vadd.f32 %v1838_v28, %v1837_v23  ;;  %v1812_v30 = vpop.f32.mrf.mxu0 }
  0xec   :  { %1522 = vmatmul.mubr.bf16.gmra.mxu1 %v2303_v24  ;;  %v1840_v31 = vpop.f32.mrf.mxu1 }
  0xed   :  { %v595_v36 = vadd.f32 %v1839_v29, %v1811_v27  ;;  %v1813_v37 = vpop.f32.mrf.mxu0 }
  0xee   :  { %v1814_v38 = vadd.f32 %v1813_v37, %v1812_v30  ;;  %v1841_v39 = vpop.f32.mrf.mxu1 }
  0xef   :  { %v1842_v40 = vadd.f32 %v1841_v39, %v1840_v31  ;;  %v1815_v45 = vpop.f32.mrf.mxu0 }
  0xf0   :  { %v1843_v46 = vpop.f32.mrf.mxu1 }
  0xf1   :  { %v600_v47 = vadd.f32 %v1842_v40, %v1814_v38  ;;  %v1816_v48 = vpop.f32.mrf.mxu0 }
  0xf2   :  { %v1817_v49 = vadd.f32 %v1816_v48, %v1815_v45  ;;  %v1844_v51 = vpop.f32.mrf.mxu1 }
  0xf3   :  { %v1845_v53 = vadd.f32 %v1844_v51, %v1843_v46 }
  0xf4   :  { %v2148_v55 = vpop.f32.mrf.mxu1 }
  0xf5   :  { %v603_v54 = vadd.f32 %v1845_v53, %v1817_v49 }
  0xf6   :  { %v689_v58 = vpop.f32.mrf.mxu1 }
  0xf8   :  { %v2149_v63 = vpop.f32.mrf.mxu1 }
  0xfa   :  { %v692_v42 = vpop.f32.mrf.mxu1 }
 0x103   :  { %v1862_v56 = vpop.f32.mrf.mxu0 }
 0x105   :  { %v1863_v59 = vpop.f32.mrf.mxu0 }
 0x106   :  { %v1864_v61 = vadd.f32 %v1863_v59, %v1862_v56 }
 0x107   :  { %v1865_v60 = vpop.f32.mrf.mxu0 }
 0x108   :  { %v641_v62 = vadd.f32 %v1864_v61, %v592_v25 }
 0x109   :  { %v1866_v32 = vpop.f32.mrf.mxu0 }
 0x10a   :  { %v1867_v33 = vadd.f32 %v1866_v32, %v1865_v60  ;;  %v2958_v34 = vadd.f32 %v689_v58, %v641_v62 }
 0x10b   :  { %v1868_v35 = vpop.f32.mrf.mxu0 }
 0x10c   :  { %v644_v41 = vadd.f32 %v1867_v33, %v595_v36 }
 0x10d   :  { %v1869_v43 = vpop.f32.mrf.mxu0 }
 0x10e   :  { %v1870_v44 = vadd.f32 %v1869_v43, %v1868_v35  ;;  %v2960_v50 = vadd.f32 %v692_v42, %v644_v41 }
 0x10f   :  { %v1871_v52 = vpop.f32.mrf.mxu0 }
 0x110   :  { %v649_v57 = vadd.f32 %v1870_v44, %v600_v47 }
 0x111   :  { %v1872_v0 = vpop.f32.mrf.mxu0 }
 0x112   :  { %v2962_v2 = vadd.f32 %v2148_v55, %v649_v57  ;;  %v1873_v4 = vadd.f32 %v1872_v0, %v1871_v52 }
 0x114   :  { %v1894_v1 = vpop.f32.mrf.mxu1  ;;  %v652_v3 = vadd.f32 %v1873_v4, %v603_v54 }
 0x116   :  { %v1895_v5 = vpop.f32.mrf.mxu1  ;;  %v2964_v7 = vadd.f32 %v2149_v63, %v652_v3 }
 0x117   :  { %v1896_v6 = vadd.f32 %v1895_v5, %v1894_v1 }
 0x118   :  { %3025 = vst [vmem:[#allocation2_spill] sm:$0xff] %v2964_v7  ;;  %v1897_v8 = vpop.f32.mrf.mxu1 }
 0x11a   :  { %v1898_v9 = vpop.f32.mrf.mxu1 }
 0x11b   :  { %v1899_v10 = vadd.f32 %v1898_v9, %v1897_v8 }
 0x11c   :  { %v1900_v11 = vpop.f32.mrf.mxu1 }
 0x11e   :  { %v1901_v12 = vpop.f32.mrf.mxu1 }
 0x11f   :  { %v1902_v13 = vadd.f32 %v1901_v12, %v1900_v11 }
 0x120   :  { %v1903_v14 = vpop.f32.mrf.mxu1 }
 0x122   :  { %v1904_v15 = vpop.f32.mrf.mxu1 }
 0x123   :  { %v1905_v16 = vadd.f32 %v1904_v15, %v1903_v14  ;;  %v1922_v17 = vpop.f32.mrf.mxu0 }
 0x125   :  { %v1923_v18 = vpop.f32.mrf.mxu0 }
 0x126   :  { %v1924_v19 = vadd.f32 %v1923_v18, %v1922_v17 }
 0x127   :  { %v1925_v20 = vpop.f32.mrf.mxu0 }
 0x128   :  { %v881_v21 = vadd.f32 %v1924_v19, %v1896_v6 }
 0x129   :  { %v1926_v22 = vpop.f32.mrf.mxu0 }
 0x12a   :  { %v1927_v23 = vadd.f32 %v1926_v22, %v1925_v20 }
 0x12b   :  { %v1928_v24 = vpop.f32.mrf.mxu0 }
 0x12c   :  { %v884_v25 = vadd.f32 %v1927_v23, %v1899_v10 }
 0x12d   :  { %v1929_v26 = vpop.f32.mrf.mxu0 }
 0x12e   :  { %v1930_v27 = vadd.f32 %v1929_v26, %v1928_v24 }
 0x12f   :  { %v1931_v28 = vpop.f32.mrf.mxu0 }
 0x130   :  { %v889_v29 = vadd.f32 %v1930_v27, %v1902_v13 }
 0x131   :  { %v1932_v30 = vpop.f32.mrf.mxu0 }
 0x132   :  { %v1933_v31 = vadd.f32 %v1932_v30, %v1931_v28 }
 0x133   :  { %v2156_v37 = vpop.f32.mrf.mxu0 }
 0x134   :  { %v1950_v36 = vpop.f32.mrf.mxu1  ;;  %v892_v38 = vadd.f32 %v1933_v31, %v1905_v16 }
 0x135   :  { %v978_v45 = vpop.f32.mrf.mxu0 }
 0x136   :  { %v1951_v39 = vpop.f32.mrf.mxu1 }
 0x137   :  { %v1952_v40 = vadd.f32 %v1951_v39, %v1950_v36  ;;  %v2157_v48 = vpop.f32.mrf.mxu0 }
 0x138   :  { %v1953_v46 = vpop.f32.mrf.mxu1 }
 0x139   :  { %v930_v47 = vadd.f32 %v1952_v40, %v881_v21  ;;  %v981_v55 = vpop.f32.mrf.mxu0 }
 0x13a   :  { %v1954_v49 = vpop.f32.mrf.mxu1 }
 0x13b   :  { %v1955_v51 = vadd.f32 %v1954_v49, %v1953_v46  ;;  %v2966_v53 = vadd.f32 %v978_v45, %v930_v47 }
 0x13c   :  { %v1956_v54 = vpop.f32.mrf.mxu1 }
 0x13d   :  { %v933_v58 = vadd.f32 %v1955_v51, %v884_v25 }
 0x13e   :  { %v1957_v59 = vpop.f32.mrf.mxu1 }
 0x13f   :  { %v1958_v61 = vadd.f32 %v1957_v59, %v1956_v54  ;;  %v2970_v60 = vadd.f32 %v981_v55, %v933_v58 }
 0x140   :  { %v1959_v62 = vpop.f32.mrf.mxu1 }
 0x141   :  { %v938_v63 = vadd.f32 %v1958_v61, %v889_v29 }
 0x142   :  { %v1960_v33 = vpop.f32.mrf.mxu1 }
 0x143   :  { %v2974_v35 = vadd.f32 %v2156_v37, %v938_v63  ;;  %v1961_v41 = vadd.f32 %v1960_v33, %v1959_v62 }
 0x145   :  { %v941_v43 = vadd.f32 %v1961_v41, %v892_v38 }
 0x147   :  { %v2978_v44 = vadd.f32 %v2157_v48, %v941_v43 }
 0x149   :  { %3026 = vst [vmem:[#allocation3_spill] sm:$0xff] %v2978_v44 }
 0x153   :  { %v1982_v57 = vpop.f32.mrf.mxu0 }
 0x154   :  { %v2010_v0 = vpop.f32.mrf.mxu1 }
 0x155   :  { %v1983_v4 = vpop.f32.mrf.mxu0 }
 0x156   :  { %v2011_v1 = vpop.f32.mrf.mxu1  ;;  %v1984_v47 = vadd.f32 %v1983_v4, %v1982_v57 }
 0x157   :  { %v1985_v3 = vpop.f32.mrf.mxu0  ;;  %v2012_v48 = vadd.f32 %v2011_v1, %v2010_v0 }
 0x158   :  { %v2013_v5 = vpop.f32.mrf.mxu1 }
 0x159   :  { %v1986_v6 = vpop.f32.mrf.mxu0  ;;  %v1174_v61 = vadd.f32 %v2012_v48, %v1984_v47 }
 0x15a   :  { %v2014_v8 = vpop.f32.mrf.mxu1  ;;  %v1987_v58 = vadd.f32 %v1986_v6, %v1985_v3 }
 0x15b   :  { %v1988_v9 = vpop.f32.mrf.mxu0  ;;  %v2015_v59 = vadd.f32 %v2014_v8, %v2013_v5 }
 0x15c   :  { %v2016_v10 = vpop.f32.mrf.mxu1 }
 0x15d   :  { %v1989_v11 = vpop.f32.mrf.mxu0  ;;  %v1177_v42 = vadd.f32 %v2015_v59, %v1987_v58 }
 0x15e   :  { %v2017_v12 = vpop.f32.mrf.mxu1  ;;  %v1990_v32 = vadd.f32 %v1989_v11, %v1988_v9 }
 0x15f   :  { %v1991_v13 = vpop.f32.mrf.mxu0  ;;  %v2018_v56 = vadd.f32 %v2017_v12, %v2016_v10 }
 0x160   :  { %v2019_v14 = vpop.f32.mrf.mxu1 }
 0x161   :  { %v1992_v15 = vpop.f32.mrf.mxu0  ;;  %v1182_v8 = vadd.f32 %v2018_v56, %v1990_v32  ;;  %v1781_v32 = vld [vmem:[%s3021_s2] ss:$0 sm:$0xff] }
 0x162   :  { %v2020_v16 = vpop.f32.mrf.mxu1 }
 0x164   :  { %v2982_v18 = vpop.f32.mrf.mxu1 }
 0x166   :  { %v1271_v20 = vpop.f32.mrf.mxu1 }
 0x168   :  { %v2984_v22 = vpop.f32.mrf.mxu1 }
 0x16a   :  { %v1274_v24 = vpop.f32.mrf.mxu1 }
 0x173   :  { %v2038_v17 = vpop.f32.mrf.mxu0 }
 0x175   :  { %v2039_v19 = vpop.f32.mrf.mxu0 }
 0x176   :  { %v2040_v54 = vadd.f32 %v2039_v19, %v2038_v17 }
 0x177   :  { %v2041_v21 = vpop.f32.mrf.mxu0 }
 0x178   :  { %v1223_v41 = vadd.f32 %v2040_v54, %v1174_v61 }
 0x179   :  { %v2042_v23 = vpop.f32.mrf.mxu0 }
 0x17a   :  { %v2043_v63 = vadd.f32 %v2042_v23, %v2041_v21  ;;  %v1272_v17 = vadd.f32 %v1271_v20, %v1223_v41  ;;  %v1993_v21 = vadd.f32 %v1992_v15, %v1991_v13  ;;  %v2021_v23 = vadd.f32 %v2020_v16, %v2019_v14  ;;  %v3030_v41 = vld [vmem:[#allocation2_spill] sm:$0xff] }
 0x17b   :  { %v2044_v25 = vpop.f32.mrf.mxu0 }
 0x17c   :  { %v1226_v0 = vadd.f32 %v2043_v63, %v1177_v42 }
 0x17d   :  { %v2045_v27 = vpop.f32.mrf.mxu0 }
 0x17e   :  { %v2046_v4 = vadd.f32 %v2045_v27, %v2044_v25  ;;  %v1275_v9 = vadd.f32 %v1274_v24, %v1226_v0  ;;  %v1185_v27 = vadd.f32 %v2021_v23, %v1993_v21 }
 0x17f   :  { %v2047_v29 = vpop.f32.mrf.mxu0 }
 0x180   :  { %v1231_v10 = vadd.f32 %v2046_v4, %v1182_v8 }
 0x181   :  { %v2048_v31 = vpop.f32.mrf.mxu0 }
 0x182   :  { %v2049_v11 = vadd.f32 %v2048_v31, %v2047_v29  ;;  %v1280_v24 = vadd.f32 %v2982_v18, %v1231_v10  ;;  %v3029_v18 = vmax.f32 %v2962_v2, %v2974_v35 }
 0x184   :  { %v2070_v26 = vpop.f32.mrf.mxu1  ;;  %v1288_v58 = vmax.f32 %v3029_v18, %v1280_v24 }
 0x186   :  { %v2071_v28 = vpop.f32.mrf.mxu1 }
 0x187   :  { %v2072_v7 = vadd.f32 %v2071_v28, %v2070_v26  ;;  %v1234_v28 = vadd.f32 %v2049_v11, %v1185_v27 }
 0x188   :  { %v2073_v30 = vpop.f32.mrf.mxu1 }
 0x189   :  { %v1283_v59 = vadd.f32 %v2984_v22, %v1234_v28 }
 0x18a   :  { %v2074_v36 = vpop.f32.mrf.mxu1 }
 0x18c   :  { %v2076_v38 = vpop.f32.mrf.mxu1 }
 0x18e   :  { %v2077_v45 = vpop.f32.mrf.mxu1 }
 0x18f   :  { %v2078_v56 = vadd.f32 %v2077_v45, %v2076_v38 }
 0x190   :  { %v2079_v51 = vpop.f32.mrf.mxu1 }
 0x192   :  { %v2080_v33 = vpop.f32.mrf.mxu1 }
 0x193   :  { %v2098_v37 = vpop.f32.mrf.mxu0 }
 0x195   :  { %v2099_v39 = vpop.f32.mrf.mxu0 }
 0x196   :  { %v2100_v43 = vadd.f32 %v2099_v39, %v2098_v37  ;;  %v2075_v37 = vadd.f32 %v2074_v36, %v2073_v30 }
 0x197   :  { %v2101_v40 = vpop.f32.mrf.mxu0 }
 0x198   :  { %v1467_v19 = vadd.f32 %v2100_v43, %v2072_v7  ;;  %v3027_v7 = vmax.f32 %v2958_v34, %v2966_v53  ;;  %v3028_v34 = vmax.f32 %v2960_v50, %v2970_v60  ;;  %v3031_v43 = vld [vmem:[#allocation3_spill] sm:$0xff] }
 0x199   :  { %v2102_v46 = vpop.f32.mrf.mxu0  ;;  %v3032_v0 = vmax.f32 %v3030_v41, %v3031_v43 }
 0x19a   :  { %v2103_v3 = vadd.f32 %v2102_v46, %v2101_v40  ;;  %v1286_v20 = vmax.f32 %v3027_v7, %v1272_v17  ;;  %v1287_v53 = vmax.f32 %v3028_v34, %v1275_v9  ;;  %v2081_v46 = vadd.f32 %v2080_v33, %v2079_v51 }
 0x19b   :  { %v2104_v49 = vpop.f32.mrf.mxu0  ;;  %v1289_v2 = vmax.f32 %v3032_v0, %v1283_v59 }
 0x19c   :  { %v1470_v42 = vadd.f32 %v2103_v3, %v2075_v37 }
 0x19d   :  { %v2105_v55 = vpop.f32.mrf.mxu0 }
 0x19e   :  { %v2106_v12 = vadd.f32 %v2105_v55, %v2104_v49 }
 0x19f   :  { %v2107_v62 = vpop.f32.mrf.mxu0 }
 0x1a0   :  { %v1475_v29 = vadd.f32 %v2106_v12, %v2078_v56 }
 0x1a1   :  { %v2108_v52 = vpop.f32.mrf.mxu0 }
 0x1a2   :  { %v2109_v31 = vadd.f32 %v2108_v52, %v2107_v62 }
 0x1a3   :  { %v2172_v57 = vpop.f32.mrf.mxu0 }
 0x1a4   :  { %v2126_v44 = vpop.f32.mrf.mxu1  ;;  %v1478_v63 = vadd.f32 %v2109_v31, %v2081_v46 }
 0x1a5   :  { %v1564_v6 = vpop.f32.mrf.mxu0 }
 0x1a6   :  { %v2127_v1 = vpop.f32.mrf.mxu1 }
 0x1a7   :  { %v2128_v5 = vadd.f32 %v2127_v1, %v2126_v44  ;;  %v2173_v48 = vpop.f32.mrf.mxu0 }
 0x1a8   :  { %v2129_v47 = vpop.f32.mrf.mxu1 }
 0x1a9   :  { %v1516_v39 = vadd.f32 %v2128_v5, %v1467_v19  ;;  %v1567_v14 = vpop.f32.mrf.mxu0 }
 0x1aa   :  { %v2130_v26 = vpop.f32.mrf.mxu1 }
 0x1ab   :  { %v2131_v25 = vadd.f32 %v2130_v26, %v2129_v47  ;;  %v1565_v44 = vadd.f32 %v1564_v6, %v1516_v39 }
 0x1ac   :  { %v2132_v13 = vpop.f32.mrf.mxu1 }
 0x1ad   :  { %v1579_v15 = vmax.f32 %v1286_v20, %v1565_v44  ;;  %v1519_v16 = vadd.f32 %v2131_v25, %v1470_v42 }
 0x1ae   :  { %v2133_v30 = vpop.f32.mrf.mxu1 }
 0x1af   :  { %v1590_v36 = vadd.f32 %v1781_v32, %v1579_v15  ;;  %v2134_v38 = vadd.f32 %v2133_v30, %v2132_v13  ;;  %v1568_v40 = vadd.f32 %v1567_v14, %v1519_v16 }
 0x1b0   :  { %v2135_v45 = vpop.f32.mrf.mxu1 }
 0x1b1   :  { %v1786_v49 = vpack.c.bf16 %v1590_v36, %v1590_v36  ;;  %v1524_v54 = vadd.f32 %v2134_v38, %v1475_v29  ;;  %v1580_v55 = vmax.f32 %v1287_v53, %v1568_v40 }
 0x1b2   :  { %v2136_v61 = vpop.f32.mrf.mxu1 }
 0x1b3   :  { %1611 = vst.msk [vmem:[%s3022_s3] sm:$0xf] %vm1610_vm1, %v1786_v49  ;;  %v1573_v50 = vadd.f32 %v2172_v57, %v1524_v54  ;;  %v1591_v60 = vadd.f32 %v1781_v32, %v1580_v55  ;;  %v2137_v52 = vadd.f32 %v2136_v61, %v2135_v45 }
 0x1b5   :  { %v1581_v51 = vmax.f32 %v1288_v58, %v1573_v50  ;;  %v1787_v62 = vpack.c.bf16 %v1591_v60, %v1591_v60  ;;  %v1527_v33 = vadd.f32 %v2137_v52, %v1478_v63 }
 0x1b7   :  { %v1592_v35 = vadd.f32 %v1781_v32, %v1581_v51  ;;  %1612 = vst.msk [vmem:[%s3022_s3 + $0x4] sm:$0xf] %vm1610_vm1, %v1787_v62  ;;  %v1576_v22 = vadd.f32 %v2173_v48, %v1527_v33 }
 0x1b9   :  { %v1788_v4 = vpack.c.bf16 %v1592_v35, %v1592_v35  ;;  %v1582_v1 = vmax.f32 %v1289_v2, %v1576_v22 }
 0x1bb   :  { %1613 = vst.msk [vmem:[%s3022_s3 + $0x8] sm:$0xf] %vm1610_vm1, %v1788_v4  ;;  %v1593_v57 = vadd.f32 %v1781_v32, %v1582_v1 }
 0x1bd   :  { %v1789_v17 = vpack.c.bf16 %v1593_v57, %v1593_v57 }
 0x1bf   :  { %1614 = vst.msk [vmem:[%s3022_s3 + $0xc] sm:$0xf] %vm1610_vm1, %v1789_v17 }

// kernel: net_forward.7
= control target key start
LH: loop header
LB: loop body
LE: loop exit
PB: predicated region body
PF: predicated region fallthrough
CT: control target
= control target key end

     0   :  { %v163_v28 = vlaneseq  ;;  %v1131_v36 = vmov 1966171168   ;;  %s1394_s0 = inlined_call_operand.vmem [shape: bf16[2,1024], index: 0, kind: input, shape index: {}]   ;;  %s1395_s1 = inlined_call_operand.vmem [shape: bf16[1024,64], index: 1, kind: input, shape index: {}]   ;;  %s1396_s2 = inlined_call_operand.vmem [shape: f32[1,64], index: 2, kind: input, shape index: {}]   ;;  %s1397_s3 = inlined_call_operand.vmem [shape: bf16[64,10], index: 3, kind: input, shape index: {}]   ;;  %s1398_s4 = inlined_call_operand.vmem [shape: f32[1,10], index: 4, kind: input, shape index: {}]   ;;  %s1399_s5 = inlined_call_operand.hbm [shape: f32[2,10], index: 5, kind: output, shape index: {}]  }
   0x1   :  { %v1040_v0 = vld [vmem:[%s1395_s1 + $0x78] sm:$0xff]   ;;  %v1044_v4 = vld [vmem:[%s1395_s1 + $0x70] sm:$0xff]   ;;  %v1048_v8 = vld [vmem:[%s1395_s1 + $0x68] sm:$0xff]   ;;  %v161_v37 = vunpack.c.l.s4 %v1131_v36 }
   0x2   :  { %v1041_v1 = vld [vmem:[%s1395_s1 + $0xf8] sm:$0xff]   ;;  %931 = vmatprep.subr.bf16.mxu0 %v1040_v0  ;;  %v1045_v5 = vld [vmem:[%s1395_s1 + $0xf0] sm:$0xff]   ;;  %v1049_v9 = vld [vmem:[%s1395_s1 + $0xe8] sm:$0xff]   ;;  %v164_v33 = vshrl.u32 %v163_v28, 7 }
   0x3   :  { %v1042_v2 = vld [vmem:[%s1395_s1 + $0x38] sm:$0xff]   ;;  %953 = vmatprep.subr.bf16.mxu1 %v1041_v1  ;;  %v1046_v6 = vld [vmem:[%s1395_s1 + $0x30] sm:$0xff]   ;;  %v1050_v10 = vld [vmem:[%s1395_s1 + $0x28] sm:$0xff]   ;;  %v162_v40 = vunpack.c.0.s8 %v161_v37 }
   0x4   :  { %v1043_v3 = vld [vmem:[%s1395_s1 + $0xb8] sm:$0xff]   ;;  %932 = vmatpush3.bf16.msra.mxu0 %v1042_v2  ;;  %v1047_v7 = vld [vmem:[%s1395_s1 + $0xb0] sm:$0xff]   ;;  %v1051_v11 = vld [vmem:[%s1395_s1 + $0xa8] sm:$0xff]  }
   0x5   :  { %954 = vmatpush3.bf16.msra.mxu1 %v1043_v3  ;;  %933 = vmatprep.subr.bf16.mxu0 %v1044_v4  ;;  %v1052_v12 = vld [vmem:[%s1395_s1 + $0x60] sm:$0xff]   ;;  %v1056_v16 = vld [vmem:[%s1395_s1 + $0x58] sm:$0xff]   ;;  %v1060_v20 = vld [vmem:[%s1395_s1 + $0x50] sm:$0xff]   ;;  %v1270_v41 = vsub.s32 %v162_v40, %v164_v33 }
   0x6   :  { %955 = vmatprep.subr.bf16.mxu1 %v1045_v5  ;;  %v1053_v13 = vld [vmem:[%s1395_s1 + $0xe0] sm:$0xff]   ;;  %v1057_v17 = vld [vmem:[%s1395_s1 + $0xd8] sm:$0xff]   ;;  %v1061_v21 = vld [vmem:[%s1395_s1 + $0xd0] sm:$0xff]  }
   0x7   :  { %v1054_v14 = vld [vmem:[%s1395_s1 + $0x20] sm:$0xff]   ;;  %v1058_v18 = vld [vmem:[%s1395_s1 + $0x18] sm:$0xff]   ;;  %v1062_v22 = vld [vmem:[%s1395_s1 + $0x10] sm:$0xff]  }
   0x8   :  { %934 = vmatpush3.bf16.msra.mxu0 %v1046_v6  ;;  %v1055_v15 = vld [vmem:[%s1395_s1 + $0xa0] sm:$0xff]   ;;  %v1059_v19 = vld [vmem:[%s1395_s1 + $0x98] sm:$0xff]   ;;  %v1063_v23 = vld [vmem:[%s1395_s1 + $0x90] sm:$0xff]  }
   0x9   :  { %956 = vmatpush3.bf16.msra.mxu1 %v1047_v7  ;;  %935 = vmatprep.subr.bf16.mxu0 %v1048_v8  ;;  %v1064_v24 = vld [vmem:[%s1395_s1 + $0x48] sm:$0xff]   ;;  %v1068_v29 = vld [vmem:[%s1395_s1 + $0x40] sm:$0xff]   ;;  %v1073_v35 = vld [vmem:[%s1395_s1 + $0x178] sm:$0xff]  }
   0xa   :  { %957 = vmatprep.subr.bf16.mxu1 %v1049_v9  ;;  %v1065_v25 = vld [vmem:[%s1395_s1 + $0xc8] sm:$0xff]   ;;  %v1069_v30 = vld [vmem:[%s1395_s1 + $0xc0] sm:$0xff]   ;;  %v1074_v38 = vld [vmem:[%s1395_s1 + $0x1f8] sm:$0xff]  }
   0xb   :  { %v1066_v26 = vld [vmem:[%s1395_s1 + $0x8] sm:$0xff]   ;;  %v1070_v31 = vld [vmem:[%s1395_s1] sm:$0xff]   ;;  %v1075_v47 = vld [vmem:[%s1395_s1 + $0x138] sm:$0xff]  }
   0xc   :  { %936 = vmatpush3.bf16.msra.mxu0 %v1050_v10  ;;  %v1067_v27 = vld [vmem:[%s1395_s1 + $0x88] sm:$0xff]   ;;  %v1071_v32 = vld [vmem:[%s1395_s1 + $0x80] sm:$0xff]   ;;  %v1076_v49 = vld [vmem:[%s1395_s1 + $0x1b8] sm:$0xff]  }
   0xd   :  { %958 = vmatpush3.bf16.msra.mxu1 %v1051_v11  ;;  %937 = vmatprep.subr.bf16.mxu0 %v1052_v12  ;;  %v22_v34 = vld [vmem:[%s1394_s0] sm:$0xff]  ;;  %v1077_v52 = vld [vmem:[%s1395_s1 + $0x170] sm:$0xff]   ;;  %v1081_v58 = vld [vmem:[%s1395_s1 + $0x168] sm:$0xff]  }
   0xe   :  { %959 = vmatprep.subr.bf16.mxu1 %v1053_v13  ;;  %v159_v39 = vcombine.high %v22_v34, %v22_v34  ;;  %v166_v42 = vrot.slane %v22_v34, %v1270_v41  ;;  %v1078_v54 = vld [vmem:[%s1395_s1 + $0x1f0] sm:$0xff]   ;;  %v1082_v59 = vld [vmem:[%s1395_s1 + $0x1e8] sm:$0xff]   ;;  %v1085_v62 = vld [vmem:[%s1395_s1 + $0x160] sm:$0xff]  }
   0xf   :  { %v1079_v55 = vld [vmem:[%s1395_s1 + $0x130] sm:$0xff]   ;;  %v1083_v60 = vld [vmem:[%s1395_s1 + $0x128] sm:$0xff]   ;;  %v1086_v63 = vld [vmem:[%s1395_s1 + $0x1e0] sm:$0xff]  }
  0x10   :  { %938 = vmatpush3.bf16.msra.mxu0 %v1054_v14  ;;  %v1274_v43 = vrot.slane %v159_v39, %v1270_v41  ;;  %v174_v44 = vcombine.high %v166_v42, %v166_v42  ;;  %v182_v45 = vrot.slane %v166_v42, %v1270_v41  ;;  %v1080_v57 = vld [vmem:[%s1395_s1 + $0x1b0] sm:$0xff]   ;;  %v1084_v61 = vld [vmem:[%s1395_s1 + $0x1a8] sm:$0xff]   ;;  %v1087_v0 = vld [vmem:[%s1395_s1 + $0x120] sm:$0xff]  }
  0x11   :  { %960 = vmatpush3.bf16.msra.mxu1 %v1055_v15  ;;  %939 = vmatprep.subr.bf16.mxu0 %v1056_v16  ;;  %v1088_v1 = vld [vmem:[%s1395_s1 + $0x1a0] sm:$0xff]   ;;  %v1089_v2 = vld [vmem:[%s1395_s1 + $0x158] sm:$0xff]   ;;  %v1093_v6 = vld [vmem:[%s1395_s1 + $0x150] sm:$0xff]  }
  0x12   :  { %961 = vmatprep.subr.bf16.mxu1 %v1057_v17  ;;  %v175_v46 = vcombine.high %v1274_v43, %v1274_v43  ;;  %v196_v48 = vrot.slane %v174_v44, %v1270_v41  ;;  %v204_v51 = vcombine.high %v182_v45, %v182_v45  ;;  %v1090_v3 = vld [vmem:[%s1395_s1 + $0x1d8] sm:$0xff]   ;;  %v1094_v7 = vld [vmem:[%s1395_s1 + $0x1d0] sm:$0xff]   ;;  %v1097_v10 = vld [vmem:[%s1395_s1 + $0x148] sm:$0xff]  }
  0x13   :  { %v1091_v4 = vld [vmem:[%s1395_s1 + $0x118] sm:$0xff]   ;;  %v1095_v8 = vld [vmem:[%s1395_s1 + $0x110] sm:$0xff]   ;;  %v1098_v11 = vld [vmem:[%s1395_s1 + $0x1c8] sm:$0xff]  }
  0x14   :  { %940 = vmatpush3.bf16.msra.mxu0 %v1058_v18  ;;  %v203_v50 = vrot.slane %v175_v46, %v1270_v41  ;;  %632 = vmatprep.mubr.bf16.mxu0 %v196_v48  ;;  %v206_v53 = vcombine.high %v196_v48, %v196_v48  ;;  %v1092_v5 = vld [vmem:[%s1395_s1 + $0x198] sm:$0xff]   ;;  %v1096_v9 = vld [vmem:[%s1395_s1 + $0x190] sm:$0xff]   ;;  %v1099_v12 = vld [vmem:[%s1395_s1 + $0x108] sm:$0xff]  }
  0x15   :  { %962 = vmatpush3.bf16.msra.mxu1 %v1059_v19  ;;  %941 = vmatprep.subr.bf16.mxu0 %v1060_v20 }
  0x16   :  { %963 = vmatprep.subr.bf16.mxu1 %v1061_v21  ;;  %v207_v56 = vcombine.high %v203_v50, %v203_v50  ;;  %672 = vmatprep.mubr.bf16.mxu1 %v206_v53 }
  0x18   :  { %942 = vmatpush3.bf16.msra.mxu0 %v1062_v22 }
  0x19   :  { %964 = vmatpush3.bf16.msra.mxu1 %v1063_v23  ;;  %943 = vmatprep.subr.bf16.mxu0 %v1064_v24 }
  0x1a   :  { %965 = vmatprep.subr.bf16.mxu1 %v1065_v25 }
  0x1c   :  { %944 = vmatpush3.bf16.msra.mxu0 %v1066_v26 }
  0x1d   :  { %966 = vmatpush3.bf16.msra.mxu1 %v1067_v27  ;;  %945 = vmatprep.subr.bf16.mxu0 %v1068_v29 }
  0x1e   :  { %967 = vmatprep.subr.bf16.mxu1 %v1069_v30 }
  0x20   :  { %946 = vmatpush3.bf16.msra.mxu0 %v1070_v31 }
  0x21   :  { %968 = vmatpush3.bf16.msra.mxu1 %v1071_v32  ;;  %975 = vmatprep.subr.bf16.mxu0 %v1073_v35 }
  0x22   :  { %997 = vmatprep.subr.bf16.mxu1 %v1074_v38 }
  0x23   :  { %633 = vmatmul.mubr.bf16.vlgmr.msra.gmra.mxu0 %v182_v45 }
  0x24   :  { %976 = vmatpush3.bf16.msra.mxu0 %v1075_v47  ;;  %673 = vmatmul.mubr.bf16.vlgmr.msra.gmra.mxu1 %v204_v51 }
  0x25   :  { %977 = vmatprep.subr.bf16.mxu0 %v1077_v52  ;;  %998 = vmatpush3.bf16.msra.mxu1 %v1076_v49 }
  0x26   :  { %712 = vmatprep.mubr.bf16.mxu0 %v203_v50  ;;  %999 = vmatprep.subr.bf16.mxu1 %v1078_v54 }
  0x27   :  { %752 = vmatprep.mubr.bf16.mxu1 %v207_v56 }
  0x28   :  { %978 = vmatpush3.bf16.msra.mxu0 %v1079_v55 }
  0x29   :  { %979 = vmatprep.subr.bf16.mxu0 %v1081_v58  ;;  %1000 = vmatpush3.bf16.msra.mxu1 %v1080_v57 }
  0x2a   :  { %1001 = vmatprep.subr.bf16.mxu1 %v1082_v59 }
  0x2c   :  { %980 = vmatpush3.bf16.msra.mxu0 %v1083_v60 }
  0x2d   :  { %981 = vmatprep.subr.bf16.mxu0 %v1085_v62  ;;  %1002 = vmatpush3.bf16.msra.mxu1 %v1084_v61 }
  0x2e   :  { %1003 = vmatprep.subr.bf16.mxu1 %v1086_v63 }
  0x30   :  { %982 = vmatpush3.bf16.msra.mxu0 %v1087_v0 }
  0x31   :  { %983 = vmatprep.subr.bf16.mxu0 %v1089_v2  ;;  %1004 = vmatpush3.bf16.msra.mxu1 %v1088_v1 }
  0x32   :  { %1005 = vmatprep.subr.bf16.mxu1 %v1090_v3 }
  0x34   :  { %984 = vmatpush3.bf16.msra.mxu0 %v1091_v4 }
  0x35   :  { %985 = vmatprep.subr.bf16.mxu0 %v1093_v6  ;;  %1006 = vmatpush3.bf16.msra.mxu1 %v1092_v5 }
  0x36   :  { %1007 = vmatprep.subr.bf16.mxu1 %v1094_v7 }
  0x38   :  { %986 = vmatpush3.bf16.msra.mxu0 %v1095_v8 }
  0x39   :  { %10 = vsyncpa [#allocation3], 0  ;;  %987 = vmatprep.subr.bf16.mxu0 %v1097_v10  ;;  %v1101_v13 = vld [vmem:[%s1395_s1 + $0x140] sm:$0xff]   ;;  %1008 = vmatpush3.bf16.msra.mxu1 %v1096_v9  ;;  %v1100_v14 = vld [vmem:[%s1395_s1 + $0x188] sm:$0xff]   ;;  %v189_v17 = vrot.slane %v1274_v43, %v1270_v41  ;;  %v1132_v21 = vmov 0.0   ;;  %vm1133_vm0 = vmmov 0  }
  0x3a   :  { %1009 = vmatprep.subr.bf16.mxu1 %v1098_v11  ;;  %v1102_v15 = vld [vmem:[%s1395_s1 + $0x1c0] sm:$0xff]   ;;  %v1105_v20 = vld [vmem:[%s1397_s3 + $0x18] sm:$0xff]   ;;  %v1106_v22 = vld [vmem:[%s1397_s3 + $0x10] sm:$0xff]   ;;  %vm800_vm1 = vcmask 523264   ;;  %s1134_s29 = smov [#allocation2]   ;;  %vm844_vm2 = vcmask 74752  }
  0x3b   :  { %v1103_v16 = vld [vmem:[%s1395_s1 + $0x100] sm:$0xff]   ;;  %v205_v19 = vcombine.high %v189_v17, %v189_v17  ;;  %v1107_v23 = vld [vmem:[%s1397_s3 + $0x8] sm:$0xff]   ;;  %s852_s30 = sshll.u32 %s1134_s29, 4  ;;  %s853_s30 = int_to_ptr.vmem [resolvable:$true] %s852_s30 }
  0x3c   :  { %988 = vmatpush3.bf16.msra.mxu0 %v1099_v12  ;;  %v1104_v18 = vld [vmem:[%s1395_s1 + $0x180] sm:$0xff]   ;;  %s1109_s6 = scalar_lea.vmem %s853_s30, 32  ;;  %p1114_p1 = scmp.lt.s32.totalorder %s853_s30, %s853_s30 }
  0x3d   :  { %989 = vmatprep.subr.bf16.mxu0 %v1101_v13  ;;  %1010 = vmatpush3.bf16.msra.mxu1 %v1100_v14  ;;  %v1108_v24 = vld [vmem:[%s1397_s3] sm:$0xff]   ;;  %p1110_p0 = scmp.ne.s32.totalorder %s853_s30, %s1109_s6  ;;  %p1115_p2 = scmp.lt.s32.totalorder %s1109_s6, %s1109_s6 }
  0x3e   :  { %1011 = vmatprep.subr.bf16.mxu1 %v1102_v15  ;;  %v860_v34 = vld [vmem:[%s1396_s2] ss:$0 sm:$0xff] }
  0x3f   :  { %v925_v51 = vld [vmem:[%s1398_s4] ss:$0 sm:$0xff]  ;;  %p1116_p3 = por %p1115_p2, %p1114_p1 }
  0x40   :  { %990 = vmatpush3.bf16.msra.mxu0 %v1103_v16 }
  0x41   :  { %1012 = vmatpush3.bf16.msra.mxu1 %v1104_v18  ;;  %1024 = vmatprep.subr.bf16.mxu0 %v1132_v21  ;;  %p1117_p4 = pnand %p1116_p3, %p1110_p0 }
  0x43   :  { %713 = vmatmul.mubr.bf16.vlgmr.msra.gmra.mxu0 %v189_v17 }
  0x44   :  { %753 = vmatmul.mubr.bf16.vlgmr.msra.gmra.mxu1 %v205_v19  ;;  %1025 = vmatpush3.bf16.msra.mxu0 %v1105_v20 }
  0x45   :  { %1026 = vmatprep.subr.bf16.mxu0 %v1132_v21  ;;  %1032 = vmatprep.mubr.msk.bf16.mxu0 %vm1133_vm0, %v1132_v21 }
  0x48   :  { %1027 = vmatpush3.bf16.msra.mxu0 %v1106_v22 }
  0x49   :  { %1028 = vmatprep.subr.bf16.mxu0 %v1132_v21 }
  0x4c   :  { %1029 = vmatpush3.bf16.msra.mxu0 %v1107_v23 }
  0x4d   :  { %1030 = vmatprep.subr.bf16.mxu0 %v1132_v21 }
  0x50   :  { %1031 = vmatpush3.bf16.msra.mxu0 %v1108_v24 }
  0xe3   :  { %v947_v25 = vpop.f32.mrf.mxu0 }
  0xe4   :  { %v969_v26 = vpop.f32.mrf.mxu1 }
  0xe5   :  { %v948_v27 = vpop.f32.mrf.mxu0 }
  0xe6   :  { %v970_v28 = vpop.f32.mrf.mxu1  ;;  %v949_v33 = vadd.f32 %v948_v27, %v947_v25 }
  0xe7   :  { %v950_v29 = vpop.f32.mrf.mxu0  ;;  %v971_v36 = vadd.f32 %v970_v28, %v969_v26 }
  0xe8   :  { %v972_v30 = vpop.f32.mrf.mxu1  ;;  %v635_v35 = vadd.f32 %v949_v33, %v860_v34 }
  0xe9   :  { %v951_v31 = vpop.f32.mrf.mxu0 }
  0xea   :  { %v973_v32 = vpop.f32.mrf.mxu1  ;;  %v675_v40 = vadd.f32 %v971_v36, %v635_v35 }
 0x103   :  { %v991_v37 = vpop.f32.mrf.mxu0 }
 0x104   :  { %v1013_v38 = vpop.f32.mrf.mxu1 }
 0x105   :  { %v992_v39 = vpop.f32.mrf.mxu0 }
 0x106   :  { %v993_v41 = vadd.f32 %v992_v39, %v991_v37  ;;  %v1014_v42 = vpop.f32.mrf.mxu1 }
 0x107   :  { %v994_v43 = vpop.f32.mrf.mxu0  ;;  %v1015_v45 = vadd.f32 %v1014_v42, %v1013_v38 }
 0x108   :  { %v715_v44 = vadd.f32 %v993_v41, %v675_v40  ;;  %v1016_v46 = vpop.f32.mrf.mxu1 }
 0x109   :  { %v995_v47 = vpop.f32.mrf.mxu0 }
 0x10a   :  { %v755_v48 = vadd.f32 %v1015_v45, %v715_v44  ;;  %v1017_v49 = vpop.f32.mrf.mxu1 }
 0x10c   :  { %v760_v50 = vpack.c.bf16 %v755_v48, %v755_v48 }
 0x10e   :  { %1033 = vmatmul.mubr.msk.bf16.vlgmr.msra.gmra.mxu0 %vm800_vm1, %v760_v50 }
 0x1ce   :  { %v838_v52 = vpop.f32.mrf.mxu0 }
 0x1cf   :  { %v839_v53 = vadd.f32 %v925_v51, %v838_v52 }
 0x1d0   :  { %v1034_v54 = vpop.f32.mrf.mxu0 }
 0x1d1   :  { %845 = vst.msk [vmem:[#allocation2] sm:$0x3] %vm844_vm2, %v839_v53 }
 0x1d2   :  { %v841_v55 = vpop.f32.mrf.mxu0 }
 0x1d3   :  { %1120 = shalt.err (!%p1117_p4)
}
 0x1d4   :  { %855 = dma.vmem_to_hbm [thread:$0]  %s853_s30, 32, %s1399_s5, [#allocation3]   ;;  %v1035_v56 = vpop.f32.mrf.mxu0 }
 0x1d5   :  { %1129 = dma.done.wait [#allocation3], 32  }
 0x1d6   :  { %1130 = vsyncadd [#allocation3], 4294967264 }
 0x1d7   :  { %859 = vsyncpa [#allocation3], 1 }

</bundles_post_ra>
